<compile_context>
chip_gen: v7x
topology: tpu7x:2x2x1
jax: 0.10.0
libtpu: 0.0.40
codegen_flags: <defaults>
</compile_context>

<pallas_src>
import jax
import jax.numpy as jnp
import numpy as np
from jax.experimental import pallas as pl
from jax.experimental.pallas import tpu as pltpu

EPS = 1e-5  # nn.BatchNorm2d default eps

# The padded-activation scratch keeps the H axis offset so that the *interior*
# starts at sublane 8 (tile aligned): row _H0-1 is the top zero border, rows
# [_H0, _H0+H) the interior, row _H0+H the bottom zero border.  This keeps all
# activation *stores* into the scratch unmasked full-tile stores; the 3x3 tap
# *loads* (sublane offsets 7/8/9) are ordinary offset loads.
_H0 = 8


def conv_res_block_kernel(x_ref, w1_ref, b1_ref, g1_ref, beta1_ref, a_ref,
                          w2_ref, g2_ref, beta2_ref, o_ref,
                          xpad_ref, col_ref):
    """Fused Conv1(+bias) -> BN1 -> PReLU -> Conv2 -> BN2 -> (+x).

    x_ref   : (N*H, W*C)         f32  lane-dense NHWC slab (aliased with o_ref)
    w*_ref  : (9*C, C)           bf16 K-packed 3x3 weights (tap-major rows)
    b1/g/beta: (1, C)            f32
    a_ref   : (1, 1)             f32  PReLU slope, SMEM
    o_ref   : (N*H, W*C)         f32  lane-dense NHWC slab
    xpad_ref: (W+2, N, H+_H0+1, C) f32 VMEM scratch, w-major padded activations
    col_ref : (N*H*W, 9*C)       bf16 VMEM scratch, K-packed im2col buffer
    """
    Wp, N, HS, C = xpad_ref.shape
    W = Wp - 2
    H = HS - _H0 - 1
    NH = N * H
    M = NH * W

    # ---- in-kernel zero padding of x into the w-major activation scratch ----
    xpad_ref[...] = jnp.zeros(xpad_ref.shape, xpad_ref.dtype)
    for wi in range(W):
        xpad_ref[wi + 1, :, _H0:_H0 + H, :] = (
            x_ref[:, wi * C:(wi + 1) * C].reshape(N, H, C))

    def conv3x3(w_ref):
        # im2col: pack the 9 shifted taps into one (M, 9C) bf16 buffer, then a
        # single K-packed MXU matmul with f32 accumulation (instead of nine
        # narrow K=C matmuls accumulated on the VPU).
        xp = xpad_ref[...]
        k = 0
        for dy in range(3):
            for dx in range(3):
                col_ref[:, k * C:(k + 1) * C] = (
                    xp[dx:dx + W, :, _H0 - 1 + dy:_H0 - 1 + dy + H, :]
                    .reshape(M, C).astype(col_ref.dtype))
                k += 1
        return jnp.dot(col_ref[...], w_ref[...],
                       preferred_element_type=jnp.float32)          # (M, C) f32

    def batchnorm(y, g, beta):
        # Training-mode BatchNorm2d: biased batch stats over N*H*W, two-pass
        # variance (numerically safer than E[x^2]-mean^2).
        mean = jnp.mean(y, axis=0, keepdims=True)
        cen = y - mean
        var = jnp.mean(cen * cen, axis=0, keepdims=True)
        return cen * (g * jax.lax.rsqrt(var + EPS)) + beta

    # ---- Conv1 (+bias) -> BN1 -> PReLU ----
    t = conv3x3(w1_ref) + b1_ref[...]
    t = batchnorm(t, g1_ref[...], beta1_ref[...])
    slope = a_ref[0, 0]                                              # SMEM scalar
    t = jnp.where(t >= 0.0, t, slope * t)

    # ---- write t back into the same padded scratch (borders are still 0) ----
    xpad_ref[1:W + 1, :, _H0:_H0 + H, :] = t.reshape(W, N, H, C)

    # ---- Conv2 (no bias) -> BN2 -> + residual, assembled lane-dense ----
    y = batchnorm(conv3x3(w2_ref), g2_ref[...], beta2_ref[...])
    y = y.reshape(W, NH, C)                         # rows were (w, n, h)-major
    for wi in range(W):
        o_ref[:, wi * C:(wi + 1) * C] = y[wi] + x_ref[:, wi * C:(wi + 1) * C]


def conv_res_block(x_nchw, p):
    """Pallas implementation of ConvResBlock.forward.  x_nchw: (N, C, H, W)."""
    x = jnp.transpose(x_nchw, (0, 2, 3, 1)).astype(jnp.float32)      # NHWC
    N, H, W, C = x.shape
    x_slab = x.reshape(N * H, W * C)     # lane-dense slab; same bytes as NHWC

    vmem = pl.BlockSpec(memory_space=pltpu.MemorySpace.VMEM)
    smem = pl.BlockSpec(memory_space=pltpu.MemorySpace.SMEM)

    out_slab = pl.pallas_call(
        conv_res_block_kernel,
        out_shape=jax.ShapeDtypeStruct((N * H, W * C), jnp.float32),
        in_specs=[vmem,                       # x slab (aliased with output)
                  vmem, vmem, vmem, vmem,     # w1, b1, g1, beta1
                  smem,                       # PReLU slope (scalar in SMEM)
                  vmem, vmem, vmem],          # w2, g2, beta2
        out_specs=vmem,
        scratch_shapes=[
            pltpu.VMEM((W + 2, N, H + _H0 + 1, C), jnp.float32),  # padded acts
            pltpu.VMEM((N * H * W, 9 * C), jnp.bfloat16),         # im2col (K-packed)
        ],
        input_output_aliases={0: 0},          # x is dead after the residual add
        compiler_params=pltpu.CompilerParams(
            vmem_limit_bytes=32 * 1024 * 1024),
    )(x_slab,
      p["w1"].astype(jnp.bfloat16), p["b1"], p["g1"], p["beta1"], p["a"],
      p["w2"].astype(jnp.bfloat16), p["g2"], p["beta2"])

    return jnp.transpose(out_slab.reshape(N, H, W, C), (0, 3, 1, 2))  # NCHW


def reference(x_nchw, p):
    """Pure-JAX (f32) reference matching the PyTorch forward (training-mode BN)."""
    x = jnp.transpose(x_nchw, (0, 2, 3, 1)).astype(jnp.float32)
    N, H, W, C = x.shape

    def conv(inp, w9, bias):
        w = w9.reshape(3, 3, C, C)            # (kh, kw, C_in, C_out) == HWIO
        y = jax.lax.conv_general_dilated(
            inp, w, (1, 1), ((1, 1), (1, 1)),
            dimension_numbers=("NHWC", "HWIO", "NHWC"))
        return y if bias is None else y + bias.reshape(1, 1, 1, C)

    def bn(y, g, b):
        m = jnp.mean(y, axis=(0, 1, 2), keepdims=True)
        v = jnp.mean((y - m) ** 2, axis=(0, 1, 2), keepdims=True)
        return (y - m) * (g.reshape(1, 1, 1, C) * jax.lax.rsqrt(v + EPS)) \
            + b.reshape(1, 1, 1, C)

    t = bn(conv(x, p["w1"], p["b1"]), p["g1"], p["beta1"])
    t = jnp.where(t >= 0, t, p["a"][0, 0] * t)
    out = bn(conv(t, p["w2"], None), p["g2"], p["beta2"]) + x
    return jnp.transpose(out, (0, 3, 1, 2))


def init_params(key, C):
    k1, k2, k3, k4, k5 = jax.random.split(key, 5)
    # PyTorch conv weights are (C_out, C_in, kH, kW); repack as a K-packed
    # (9*C_in, C_out) matrix whose row order matches the kernel's im2col
    # (tap-major: k = dy*3 + dx, then C_in).
    w1_oihw = jax.random.normal(k1, (C, C, 3, 3), jnp.float32) * 0.05
    w2_oihw = jax.random.normal(k3, (C, C, 3, 3), jnp.float32) * 0.05
    w1 = jnp.transpose(w1_oihw, (2, 3, 1, 0)).reshape(9 * C, C)
    w2 = jnp.transpose(w2_oihw, (2, 3, 1, 0)).reshape(9 * C, C)
    b1 = (jax.random.normal(k2, (C,), jnp.float32) * 0.05).reshape(1, C)
    g1 = 1.0 + 0.1 * jax.random.normal(k4, (1, C), jnp.float32)
    g2 = 1.0 + 0.1 * jax.random.normal(k5, (1, C), jnp.float32)
    return {
        "w1": w1, "b1": b1,
        "g1": g1, "beta1": jnp.zeros((1, C), jnp.float32),
        "a": jnp.full((1, 1), 0.25, jnp.float32),   # nn.PReLU default slope
        "w2": w2,
        "g2": g2, "beta2": jnp.zeros((1, C), jnp.float32),
    }


if __name__ == "__main__":
    key = jax.random.PRNGKey(0)
    kx, kp = jax.random.split(key)

    N, C, H, W = 2, 64, 8, 8            # small shapes; channels = module default
    x = jax.random.normal(kx, (N, C, H, W), jnp.float32)
    params = init_params(kp, C)

    out = jax.block_until_ready(jax.jit(conv_res_block)(x, params))
    ref = jax.block_until_ready(reference(x, params))

    # bf16 MXU operands (f32 accumulation) => a few-% tolerance vs f32 reference.
    np.testing.assert_allclose(np.asarray(out), np.asarray(ref),
                               rtol=5e-2, atol=5e-2)
    assert out.shape == (N, C, H, W) and bool(jnp.all(jnp.isfinite(out)))

    print("KERNEL_OK")
</pallas_src>

<mosaic_0001>
module attributes {stable_mosaic.version = 11 : i64} {
  func.func @conv_res_block_kernel(%arg0: memref<16x512xf32, #tpu.memory_space<vmem>>, %arg1: memref<576x64xbf16, #tpu.memory_space<vmem>>, %arg2: memref<1x64xf32, #tpu.memory_space<vmem>>, %arg3: memref<1x64xf32, #tpu.memory_space<vmem>>, %arg4: memref<1x64xf32, #tpu.memory_space<vmem>>, %arg5: memref<1x1xf32, #tpu.memory_space<smem>>, %arg6: memref<576x64xbf16, #tpu.memory_space<vmem>>, %arg7: memref<1x64xf32, #tpu.memory_space<vmem>>, %arg8: memref<1x64xf32, #tpu.memory_space<vmem>>, %arg9: memref<16x512xf32, #tpu.memory_space<vmem>>, %arg10: memref<10x2x17x64xf32, #tpu.memory_space<vmem>>, %arg11: memref<128x576xbf16, #tpu.memory_space<vmem>>) attributes {dimension_semantics = [], scalar_prefetch = 0 : i64, scratch_operands = 2 : i64, tpu.core_type = #tpu.core_type<tc>} {
    %cst = arith.constant 0.000000e+00 : f32
    %0 = vector.broadcast %cst : f32 to vector<10x2x17x64xf32>
    %c0 = arith.constant 0 : index
    %c0_0 = arith.constant 0 : index
    %c0_1 = arith.constant 0 : index
    %c0_2 = arith.constant 0 : index
    %1 = vector.load %arg10[%c0, %c0_0, %c0_1, %c0_2] : memref<10x2x17x64xf32, #tpu.memory_space<vmem>>, vector<10x2x17x64xf32>
    tpu.vector_store %arg10[%c0, %c0_0, %c0_1, %c0_2], %0 {strides = array<i32>} : memref<10x2x17x64xf32, #tpu.memory_space<vmem>>, vector<10x2x17x64xf32>,
    %c0_3 = arith.constant 0 : index
    %c0_4 = arith.constant 0 : index
    %2 = vector.load %arg0[%c0_3, %c0_4] : memref<16x512xf32, #tpu.memory_space<vmem>>, vector<16x64xf32>
    %3 = vector.shape_cast %2 : vector<16x64xf32> to vector<2x8x64xf32>
    %c1 = arith.constant 1 : index
    %c0_5 = arith.constant 0 : index
    %c8 = arith.constant 8 : index
    %c0_6 = arith.constant 0 : index
    %4 = vector.load %arg10[%c1, %c0_5, %c8, %c0_6] : memref<10x2x17x64xf32, #tpu.memory_space<vmem>>, vector<1x2x8x64xf32>
    %5 = vector.shape_cast %4 : vector<1x2x8x64xf32> to vector<2x8x64xf32>
    %6 = vector.shape_cast %3 : vector<2x8x64xf32> to vector<1x2x8x64xf32>
    tpu.vector_store %arg10[%c1, %c0_5, %c8, %c0_6], %6 {strides = array<i32>} : memref<10x2x17x64xf32, #tpu.memory_space<vmem>>, vector<1x2x8x64xf32>,
    %c0_7 = arith.constant 0 : index
    %c64 = arith.constant 64 : index
    %7 = vector.load %arg0[%c0_7, %c64] : memref<16x512xf32, #tpu.memory_space<vmem>>, vector<16x64xf32>
    %8 = vector.shape_cast %7 : vector<16x64xf32> to vector<2x8x64xf32>
    %c2 = arith.constant 2 : index
    %c0_8 = arith.constant 0 : index
    %c8_9 = arith.constant 8 : index
    %c0_10 = arith.constant 0 : index
    %9 = vector.load %arg10[%c2, %c0_8, %c8_9, %c0_10] : memref<10x2x17x64xf32, #tpu.memory_space<vmem>>, vector<1x2x8x64xf32>
    %10 = vector.shape_cast %9 : vector<1x2x8x64xf32> to vector<2x8x64xf32>
    %11 = vector.shape_cast %8 : vector<2x8x64xf32> to vector<1x2x8x64xf32>
    tpu.vector_store %arg10[%c2, %c0_8, %c8_9, %c0_10], %11 {strides = array<i32>} : memref<10x2x17x64xf32, #tpu.memory_space<vmem>>, vector<1x2x8x64xf32>,
    %c0_11 = arith.constant 0 : index
    %c128 = arith.constant 128 : index
    %12 = vector.load %arg0[%c0_11, %c128] : memref<16x512xf32, #tpu.memory_space<vmem>>, vector<16x64xf32>
    %13 = vector.shape_cast %12 : vector<16x64xf32> to vector<2x8x64xf32>
    %c3 = arith.constant 3 : index
    %c0_12 = arith.constant 0 : index
    %c8_13 = arith.constant 8 : index
    %c0_14 = arith.constant 0 : index
    %14 = vector.load %arg10[%c3, %c0_12, %c8_13, %c0_14] : memref<10x2x17x64xf32, #tpu.memory_space<vmem>>, vector<1x2x8x64xf32>
    %15 = vector.shape_cast %14 : vector<1x2x8x64xf32> to vector<2x8x64xf32>
    %16 = vector.shape_cast %13 : vector<2x8x64xf32> to vector<1x2x8x64xf32>
    tpu.vector_store %arg10[%c3, %c0_12, %c8_13, %c0_14], %16 {strides = array<i32>} : memref<10x2x17x64xf32, #tpu.memory_space<vmem>>, vector<1x2x8x64xf32>,
    %c0_15 = arith.constant 0 : index
    %c192 = arith.constant 192 : index
    %17 = vector.load %arg0[%c0_15, %c192] : memref<16x512xf32, #tpu.memory_space<vmem>>, vector<16x64xf32>
    %18 = vector.shape_cast %17 : vector<16x64xf32> to vector<2x8x64xf32>
    %c4 = arith.constant 4 : index
    %c0_16 = arith.constant 0 : index
    %c8_17 = arith.constant 8 : index
    %c0_18 = arith.constant 0 : index
    %19 = vector.load %arg10[%c4, %c0_16, %c8_17, %c0_18] : memref<10x2x17x64xf32, #tpu.memory_space<vmem>>, vector<1x2x8x64xf32>
    %20 = vector.shape_cast %19 : vector<1x2x8x64xf32> to vector<2x8x64xf32>
    %21 = vector.shape_cast %18 : vector<2x8x64xf32> to vector<1x2x8x64xf32>
    tpu.vector_store %arg10[%c4, %c0_16, %c8_17, %c0_18], %21 {strides = array<i32>} : memref<10x2x17x64xf32, #tpu.memory_space<vmem>>, vector<1x2x8x64xf32>,
    %c0_19 = arith.constant 0 : index
    %c256 = arith.constant 256 : index
    %22 = vector.load %arg0[%c0_19, %c256] : memref<16x512xf32, #tpu.memory_space<vmem>>, vector<16x64xf32>
    %23 = vector.shape_cast %22 : vector<16x64xf32> to vector<2x8x64xf32>
    %c5 = arith.constant 5 : index
    %c0_20 = arith.constant 0 : index
    %c8_21 = arith.constant 8 : index
    %c0_22 = arith.constant 0 : index
    %24 = vector.load %arg10[%c5, %c0_20, %c8_21, %c0_22] : memref<10x2x17x64xf32, #tpu.memory_space<vmem>>, vector<1x2x8x64xf32>
    %25 = vector.shape_cast %24 : vector<1x2x8x64xf32> to vector<2x8x64xf32>
    %26 = vector.shape_cast %23 : vector<2x8x64xf32> to vector<1x2x8x64xf32>
    tpu.vector_store %arg10[%c5, %c0_20, %c8_21, %c0_22], %26 {strides = array<i32>} : memref<10x2x17x64xf32, #tpu.memory_space<vmem>>, vector<1x2x8x64xf32>,
    %c0_23 = arith.constant 0 : index
    %c320 = arith.constant 320 : index
    %27 = vector.load %arg0[%c0_23, %c320] : memref<16x512xf32, #tpu.memory_space<vmem>>, vector<16x64xf32>
    %28 = vector.shape_cast %27 : vector<16x64xf32> to vector<2x8x64xf32>
    %c6 = arith.constant 6 : index
    %c0_24 = arith.constant 0 : index
    %c8_25 = arith.constant 8 : index
    %c0_26 = arith.constant 0 : index
    %29 = vector.load %arg10[%c6, %c0_24, %c8_25, %c0_26] : memref<10x2x17x64xf32, #tpu.memory_space<vmem>>, vector<1x2x8x64xf32>
    %30 = vector.shape_cast %29 : vector<1x2x8x64xf32> to vector<2x8x64xf32>
    %31 = vector.shape_cast %28 : vector<2x8x64xf32> to vector<1x2x8x64xf32>
    tpu.vector_store %arg10[%c6, %c0_24, %c8_25, %c0_26], %31 {strides = array<i32>} : memref<10x2x17x64xf32, #tpu.memory_space<vmem>>, vector<1x2x8x64xf32>,
    %c0_27 = arith.constant 0 : index
    %c384 = arith.constant 384 : index
    %32 = vector.load %arg0[%c0_27, %c384] : memref<16x512xf32, #tpu.memory_space<vmem>>, vector<16x64xf32>
    %33 = vector.shape_cast %32 : vector<16x64xf32> to vector<2x8x64xf32>
    %c7 = arith.constant 7 : index
    %c0_28 = arith.constant 0 : index
    %c8_29 = arith.constant 8 : index
    %c0_30 = arith.constant 0 : index
    %34 = vector.load %arg10[%c7, %c0_28, %c8_29, %c0_30] : memref<10x2x17x64xf32, #tpu.memory_space<vmem>>, vector<1x2x8x64xf32>
    %35 = vector.shape_cast %34 : vector<1x2x8x64xf32> to vector<2x8x64xf32>
    %36 = vector.shape_cast %33 : vector<2x8x64xf32> to vector<1x2x8x64xf32>
    tpu.vector_store %arg10[%c7, %c0_28, %c8_29, %c0_30], %36 {strides = array<i32>} : memref<10x2x17x64xf32, #tpu.memory_space<vmem>>, vector<1x2x8x64xf32>,
    %c0_31 = arith.constant 0 : index
    %c448 = arith.constant 448 : index
    %37 = vector.load %arg0[%c0_31, %c448] : memref<16x512xf32, #tpu.memory_space<vmem>>, vector<16x64xf32>
    %38 = vector.shape_cast %37 : vector<16x64xf32> to vector<2x8x64xf32>
    %c8_32 = arith.constant 8 : index
    %c0_33 = arith.constant 0 : index
    %c8_34 = arith.constant 8 : index
    %c0_35 = arith.constant 0 : index
    %39 = vector.load %arg10[%c8_32, %c0_33, %c8_34, %c0_35] : memref<10x2x17x64xf32, #tpu.memory_space<vmem>>, vector<1x2x8x64xf32>
    %40 = vector.shape_cast %39 : vector<1x2x8x64xf32> to vector<2x8x64xf32>
    %41 = vector.shape_cast %38 : vector<2x8x64xf32> to vector<1x2x8x64xf32>
    tpu.vector_store %arg10[%c8_32, %c0_33, %c8_34, %c0_35], %41 {strides = array<i32>} : memref<10x2x17x64xf32, #tpu.memory_space<vmem>>, vector<1x2x8x64xf32>,
    %c0_36 = arith.constant 0 : index
    %c0_37 = arith.constant 0 : index
    %c0_38 = arith.constant 0 : index
    %c0_39 = arith.constant 0 : index
    %42 = vector.load %arg10[%c0_36, %c0_37, %c0_38, %c0_39] : memref<10x2x17x64xf32, #tpu.memory_space<vmem>>, vector<10x2x17x64xf32>
    %43 = vector.extract_strided_slice %42 {offsets = [0, 0, 7, 0], sizes = [8, 2, 8, 64], strides = [1, 1, 1, 1]} : vector<10x2x17x64xf32> to vector<8x2x8x64xf32>
    %44 = vector.shape_cast %43 : vector<8x2x8x64xf32> to vector<128x64xf32>
    %45 = arith.truncf %44 : vector<128x64xf32> to vector<128x64xbf16>
    %c0_40 = arith.constant 0 : index
    %c0_41 = arith.constant 0 : index
    %46 = vector.load %arg11[%c0_40, %c0_41] : memref<128x576xbf16, #tpu.memory_space<vmem>>, vector<128x64xbf16>
    tpu.vector_store %arg11[%c0_40, %c0_41], %45 {strides = array<i32>} : memref<128x576xbf16, #tpu.memory_space<vmem>>, vector<128x64xbf16>,
    %47 = vector.extract_strided_slice %42 {offsets = [1, 0, 7, 0], sizes = [8, 2, 8, 64], strides = [1, 1, 1, 1]} : vector<10x2x17x64xf32> to vector<8x2x8x64xf32>
    %48 = vector.shape_cast %47 : vector<8x2x8x64xf32> to vector<128x64xf32>
    %49 = arith.truncf %48 : vector<128x64xf32> to vector<128x64xbf16>
    %c0_42 = arith.constant 0 : index
    %c64_43 = arith.constant 64 : index
    %50 = vector.load %arg11[%c0_42, %c64_43] : memref<128x576xbf16, #tpu.memory_space<vmem>>, vector<128x64xbf16>
    tpu.vector_store %arg11[%c0_42, %c64_43], %49 {strides = array<i32>} : memref<128x576xbf16, #tpu.memory_space<vmem>>, vector<128x64xbf16>,
    %51 = vector.extract_strided_slice %42 {offsets = [2, 0, 7, 0], sizes = [8, 2, 8, 64], strides = [1, 1, 1, 1]} : vector<10x2x17x64xf32> to vector<8x2x8x64xf32>
    %52 = vector.shape_cast %51 : vector<8x2x8x64xf32> to vector<128x64xf32>
    %53 = arith.truncf %52 : vector<128x64xf32> to vector<128x64xbf16>
    %c0_44 = arith.constant 0 : index
    %c128_45 = arith.constant 128 : index
    %54 = vector.load %arg11[%c0_44, %c128_45] : memref<128x576xbf16, #tpu.memory_space<vmem>>, vector<128x64xbf16>
    tpu.vector_store %arg11[%c0_44, %c128_45], %53 {strides = array<i32>} : memref<128x576xbf16, #tpu.memory_space<vmem>>, vector<128x64xbf16>,
    %55 = vector.extract_strided_slice %42 {offsets = [0, 0, 8, 0], sizes = [8, 2, 8, 64], strides = [1, 1, 1, 1]} : vector<10x2x17x64xf32> to vector<8x2x8x64xf32>
    %56 = vector.shape_cast %55 : vector<8x2x8x64xf32> to vector<128x64xf32>
    %57 = arith.truncf %56 : vector<128x64xf32> to vector<128x64xbf16>
    %c0_46 = arith.constant 0 : index
    %c192_47 = arith.constant 192 : index
    %58 = vector.load %arg11[%c0_46, %c192_47] : memref<128x576xbf16, #tpu.memory_space<vmem>>, vector<128x64xbf16>
    tpu.vector_store %arg11[%c0_46, %c192_47], %57 {strides = array<i32>} : memref<128x576xbf16, #tpu.memory_space<vmem>>, vector<128x64xbf16>,
    %59 = vector.extract_strided_slice %42 {offsets = [1, 0, 8, 0], sizes = [8, 2, 8, 64], strides = [1, 1, 1, 1]} : vector<10x2x17x64xf32> to vector<8x2x8x64xf32>
    %60 = vector.shape_cast %59 : vector<8x2x8x64xf32> to vector<128x64xf32>
    %61 = arith.truncf %60 : vector<128x64xf32> to vector<128x64xbf16>
    %c0_48 = arith.constant 0 : index
    %c256_49 = arith.constant 256 : index
    %62 = vector.load %arg11[%c0_48, %c256_49] : memref<128x576xbf16, #tpu.memory_space<vmem>>, vector<128x64xbf16>
    tpu.vector_store %arg11[%c0_48, %c256_49], %61 {strides = array<i32>} : memref<128x576xbf16, #tpu.memory_space<vmem>>, vector<128x64xbf16>,
    %63 = vector.extract_strided_slice %42 {offsets = [2, 0, 8, 0], sizes = [8, 2, 8, 64], strides = [1, 1, 1, 1]} : vector<10x2x17x64xf32> to vector<8x2x8x64xf32>
    %64 = vector.shape_cast %63 : vector<8x2x8x64xf32> to vector<128x64xf32>
    %65 = arith.truncf %64 : vector<128x64xf32> to vector<128x64xbf16>
    %c0_50 = arith.constant 0 : index
    %c320_51 = arith.constant 320 : index
    %66 = vector.load %arg11[%c0_50, %c320_51] : memref<128x576xbf16, #tpu.memory_space<vmem>>, vector<128x64xbf16>
    tpu.vector_store %arg11[%c0_50, %c320_51], %65 {strides = array<i32>} : memref<128x576xbf16, #tpu.memory_space<vmem>>, vector<128x64xbf16>,
    %67 = vector.extract_strided_slice %42 {offsets = [0, 0, 9, 0], sizes = [8, 2, 8, 64], strides = [1, 1, 1, 1]} : vector<10x2x17x64xf32> to vector<8x2x8x64xf32>
    %68 = vector.shape_cast %67 : vector<8x2x8x64xf32> to vector<128x64xf32>
    %69 = arith.truncf %68 : vector<128x64xf32> to vector<128x64xbf16>
    %c0_52 = arith.constant 0 : index
    %c384_53 = arith.constant 384 : index
    %70 = vector.load %arg11[%c0_52, %c384_53] : memref<128x576xbf16, #tpu.memory_space<vmem>>, vector<128x64xbf16>
    tpu.vector_store %arg11[%c0_52, %c384_53], %69 {strides = array<i32>} : memref<128x576xbf16, #tpu.memory_space<vmem>>, vector<128x64xbf16>,
    %71 = vector.extract_strided_slice %42 {offsets = [1, 0, 9, 0], sizes = [8, 2, 8, 64], strides = [1, 1, 1, 1]} : vector<10x2x17x64xf32> to vector<8x2x8x64xf32>
    %72 = vector.shape_cast %71 : vector<8x2x8x64xf32> to vector<128x64xf32>
    %73 = arith.truncf %72 : vector<128x64xf32> to vector<128x64xbf16>
    %c0_54 = arith.constant 0 : index
    %c448_55 = arith.constant 448 : index
    %74 = vector.load %arg11[%c0_54, %c448_55] : memref<128x576xbf16, #tpu.memory_space<vmem>>, vector<128x64xbf16>
    tpu.vector_store %arg11[%c0_54, %c448_55], %73 {strides = array<i32>} : memref<128x576xbf16, #tpu.memory_space<vmem>>, vector<128x64xbf16>,
    %75 = vector.extract_strided_slice %42 {offsets = [2, 0, 9, 0], sizes = [8, 2, 8, 64], strides = [1, 1, 1, 1]} : vector<10x2x17x64xf32> to vector<8x2x8x64xf32>
    %76 = vector.shape_cast %75 : vector<8x2x8x64xf32> to vector<128x64xf32>
    %77 = arith.truncf %76 : vector<128x64xf32> to vector<128x64xbf16>
    %c0_56 = arith.constant 0 : index
    %c512 = arith.constant 512 : index
    %78 = vector.load %arg11[%c0_56, %c512] : memref<128x576xbf16, #tpu.memory_space<vmem>>, vector<128x64xbf16>
    tpu.vector_store %arg11[%c0_56, %c512], %77 {strides = array<i32>} : memref<128x576xbf16, #tpu.memory_space<vmem>>, vector<128x64xbf16>,
    %c0_57 = arith.constant 0 : index
    %c0_58 = arith.constant 0 : index
    %79 = vector.load %arg11[%c0_57, %c0_58] : memref<128x576xbf16, #tpu.memory_space<vmem>>, vector<128x576xbf16>
    %c0_59 = arith.constant 0 : index
    %c0_60 = arith.constant 0 : index
    %80 = vector.load %arg1[%c0_59, %c0_60] : memref<576x64xbf16, #tpu.memory_space<vmem>>, vector<576x64xbf16>
    %cst_61 = arith.constant dense<0.000000e+00> : vector<128x64xf32>
    %81 = tpu.matmul %79, %80, %cst_61 {dimension_numbers = #tpu.dot_dimension_numbers<[1], [0], [0], [1], [0, 0, 1, 1], [], []>} : vector<128x576xbf16>, vector<576x64xbf16>, vector<128x64xf32> -> vector<128x64xf32>
    %c0_62 = arith.constant 0 : index
    %c0_63 = arith.constant 0 : index
    %82 = vector.load %arg2[%c0_62, %c0_63] : memref<1x64xf32, #tpu.memory_space<vmem>>, vector<1x64xf32>
    %83 = vector.broadcast %82 : vector<1x64xf32> to vector<128x64xf32>
    %84 = arith.addf %81, %83 : vector<128x64xf32>
    %c0_64 = arith.constant 0 : index
    %c0_65 = arith.constant 0 : index
    %85 = vector.load %arg3[%c0_64, %c0_65] : memref<1x64xf32, #tpu.memory_space<vmem>>, vector<1x64xf32>
    %c0_66 = arith.constant 0 : index
    %c0_67 = arith.constant 0 : index
    %86 = vector.load %arg4[%c0_66, %c0_67] : memref<1x64xf32, #tpu.memory_space<vmem>>, vector<1x64xf32>
    %cst_68 = arith.constant dense<0.000000e+00> : vector<64xf32>
    %87 = vector.multi_reduction <add>, %84, %cst_68 [0] : vector<128x64xf32> to vector<64xf32>
    %88 = vector.shape_cast %87 : vector<64xf32> to vector<1x64xf32>
    %cst_69 = arith.constant 1.280000e+02 : f32
    %89 = vector.broadcast %cst_69 : f32 to vector<1x64xf32>
    %90 = arith.divf %88, %89 : vector<1x64xf32>
    %91 = vector.broadcast %90 : vector<1x64xf32> to vector<128x64xf32>
    %92 = arith.subf %84, %91 : vector<128x64xf32>
    %93 = arith.mulf %92, %92 : vector<128x64xf32>
    %cst_70 = arith.constant dense<0.000000e+00> : vector<64xf32>
    %94 = vector.multi_reduction <add>, %93, %cst_70 [0] : vector<128x64xf32> to vector<64xf32>
    %95 = vector.shape_cast %94 : vector<64xf32> to vector<1x64xf32>
    %cst_71 = arith.constant 1.280000e+02 : f32
    %96 = vector.broadcast %cst_71 : f32 to vector<1x64xf32>
    %97 = arith.divf %95, %96 : vector<1x64xf32>
    %cst_72 = arith.constant 9.99999974E-6 : f32
    %98 = vector.broadcast %cst_72 : f32 to vector<1x64xf32>
    %99 = arith.addf %97, %98 : vector<1x64xf32>
    %100 = math.rsqrt %99 : vector<1x64xf32>
    %101 = arith.mulf %85, %100 : vector<1x64xf32>
    %102 = vector.broadcast %101 : vector<1x64xf32> to vector<128x64xf32>
    %103 = arith.mulf %92, %102 : vector<128x64xf32>
    %104 = vector.broadcast %86 : vector<1x64xf32> to vector<128x64xf32>
    %105 = arith.addf %103, %104 : vector<128x64xf32>
    %c0_73 = arith.constant 0 : index
    %c0_74 = arith.constant 0 : index
    %106 = memref.load %arg5[%c0_73, %c0_74] : memref<1x1xf32, #tpu.memory_space<smem>>
    %cst_75 = arith.constant 0.000000e+00 : f32
    %107 = vector.broadcast %cst_75 : f32 to vector<128x64xf32>
    %108 = arith.cmpf oge, %105, %107 : vector<128x64xf32>
    %109 = vector.broadcast %106 : f32 to vector<128x64xf32>
    %110 = arith.mulf %109, %105 : vector<128x64xf32>
    %111 = arith.select %108, %105, %110 : vector<128x64xi1>, vector<128x64xf32>
    %112 = vector.shape_cast %111 : vector<128x64xf32> to vector<8x2x8x64xf32>
    %c1_76 = arith.constant 1 : index
    %c0_77 = arith.constant 0 : index
    %c8_78 = arith.constant 8 : index
    %c0_79 = arith.constant 0 : index
    %113 = vector.load %arg10[%c1_76, %c0_77, %c8_78, %c0_79] : memref<10x2x17x64xf32, #tpu.memory_space<vmem>>, vector<8x2x8x64xf32>
    tpu.vector_store %arg10[%c1_76, %c0_77, %c8_78, %c0_79], %112 {strides = array<i32>} : memref<10x2x17x64xf32, #tpu.memory_space<vmem>>, vector<8x2x8x64xf32>,
    %c0_80 = arith.constant 0 : index
    %c0_81 = arith.constant 0 : index
    %c0_82 = arith.constant 0 : index
    %c0_83 = arith.constant 0 : index
    %114 = vector.load %arg10[%c0_80, %c0_81, %c0_82, %c0_83] : memref<10x2x17x64xf32, #tpu.memory_space<vmem>>, vector<10x2x17x64xf32>
    %115 = vector.extract_strided_slice %114 {offsets = [0, 0, 7, 0], sizes = [8, 2, 8, 64], strides = [1, 1, 1, 1]} : vector<10x2x17x64xf32> to vector<8x2x8x64xf32>
    %116 = vector.shape_cast %115 : vector<8x2x8x64xf32> to vector<128x64xf32>
    %117 = arith.truncf %116 : vector<128x64xf32> to vector<128x64xbf16>
    %c0_84 = arith.constant 0 : index
    %c0_85 = arith.constant 0 : index
    %118 = vector.load %arg11[%c0_84, %c0_85] : memref<128x576xbf16, #tpu.memory_space<vmem>>, vector<128x64xbf16>
    tpu.vector_store %arg11[%c0_84, %c0_85], %117 {strides = array<i32>} : memref<128x576xbf16, #tpu.memory_space<vmem>>, vector<128x64xbf16>,
    %119 = vector.extract_strided_slice %114 {offsets = [1, 0, 7, 0], sizes = [8, 2, 8, 64], strides = [1, 1, 1, 1]} : vector<10x2x17x64xf32> to vector<8x2x8x64xf32>
    %120 = vector.shape_cast %119 : vector<8x2x8x64xf32> to vector<128x64xf32>
    %121 = arith.truncf %120 : vector<128x64xf32> to vector<128x64xbf16>
    %c0_86 = arith.constant 0 : index
    %c64_87 = arith.constant 64 : index
    %122 = vector.load %arg11[%c0_86, %c64_87] : memref<128x576xbf16, #tpu.memory_space<vmem>>, vector<128x64xbf16>
    tpu.vector_store %arg11[%c0_86, %c64_87], %121 {strides = array<i32>} : memref<128x576xbf16, #tpu.memory_space<vmem>>, vector<128x64xbf16>,
    %123 = vector.extract_strided_slice %114 {offsets = [2, 0, 7, 0], sizes = [8, 2, 8, 64], strides = [1, 1, 1, 1]} : vector<10x2x17x64xf32> to vector<8x2x8x64xf32>
    %124 = vector.shape_cast %123 : vector<8x2x8x64xf32> to vector<128x64xf32>
    %125 = arith.truncf %124 : vector<128x64xf32> to vector<128x64xbf16>
    %c0_88 = arith.constant 0 : index
    %c128_89 = arith.constant 128 : index
    %126 = vector.load %arg11[%c0_88, %c128_89] : memref<128x576xbf16, #tpu.memory_space<vmem>>, vector<128x64xbf16>
    tpu.vector_store %arg11[%c0_88, %c128_89], %125 {strides = array<i32>} : memref<128x576xbf16, #tpu.memory_space<vmem>>, vector<128x64xbf16>,
    %127 = vector.extract_strided_slice %114 {offsets = [0, 0, 8, 0], sizes = [8, 2, 8, 64], strides = [1, 1, 1, 1]} : vector<10x2x17x64xf32> to vector<8x2x8x64xf32>
    %128 = vector.shape_cast %127 : vector<8x2x8x64xf32> to vector<128x64xf32>
    %129 = arith.truncf %128 : vector<128x64xf32> to vector<128x64xbf16>
    %c0_90 = arith.constant 0 : index
    %c192_91 = arith.constant 192 : index
    %130 = vector.load %arg11[%c0_90, %c192_91] : memref<128x576xbf16, #tpu.memory_space<vmem>>, vector<128x64xbf16>
    tpu.vector_store %arg11[%c0_90, %c192_91], %129 {strides = array<i32>} : memref<128x576xbf16, #tpu.memory_space<vmem>>, vector<128x64xbf16>,
    %131 = vector.extract_strided_slice %114 {offsets = [1, 0, 8, 0], sizes = [8, 2, 8, 64], strides = [1, 1, 1, 1]} : vector<10x2x17x64xf32> to vector<8x2x8x64xf32>
    %132 = vector.shape_cast %131 : vector<8x2x8x64xf32> to vector<128x64xf32>
    %133 = arith.truncf %132 : vector<128x64xf32> to vector<128x64xbf16>
    %c0_92 = arith.constant 0 : index
    %c256_93 = arith.constant 256 : index
    %134 = vector.load %arg11[%c0_92, %c256_93] : memref<128x576xbf16, #tpu.memory_space<vmem>>, vector<128x64xbf16>
    tpu.vector_store %arg11[%c0_92, %c256_93], %133 {strides = array<i32>} : memref<128x576xbf16, #tpu.memory_space<vmem>>, vector<128x64xbf16>,
    %135 = vector.extract_strided_slice %114 {offsets = [2, 0, 8, 0], sizes = [8, 2, 8, 64], strides = [1, 1, 1, 1]} : vector<10x2x17x64xf32> to vector<8x2x8x64xf32>
    %136 = vector.shape_cast %135 : vector<8x2x8x64xf32> to vector<128x64xf32>
    %137 = arith.truncf %136 : vector<128x64xf32> to vector<128x64xbf16>
    %c0_94 = arith.constant 0 : index
    %c320_95 = arith.constant 320 : index
    %138 = vector.load %arg11[%c0_94, %c320_95] : memref<128x576xbf16, #tpu.memory_space<vmem>>, vector<128x64xbf16>
    tpu.vector_store %arg11[%c0_94, %c320_95], %137 {strides = array<i32>} : memref<128x576xbf16, #tpu.memory_space<vmem>>, vector<128x64xbf16>,
    %139 = vector.extract_strided_slice %114 {offsets = [0, 0, 9, 0], sizes = [8, 2, 8, 64], strides = [1, 1, 1, 1]} : vector<10x2x17x64xf32> to vector<8x2x8x64xf32>
    %140 = vector.shape_cast %139 : vector<8x2x8x64xf32> to vector<128x64xf32>
    %141 = arith.truncf %140 : vector<128x64xf32> to vector<128x64xbf16>
    %c0_96 = arith.constant 0 : index
    %c384_97 = arith.constant 384 : index
    %142 = vector.load %arg11[%c0_96, %c384_97] : memref<128x576xbf16, #tpu.memory_space<vmem>>, vector<128x64xbf16>
    tpu.vector_store %arg11[%c0_96, %c384_97], %141 {strides = array<i32>} : memref<128x576xbf16, #tpu.memory_space<vmem>>, vector<128x64xbf16>,
    %143 = vector.extract_strided_slice %114 {offsets = [1, 0, 9, 0], sizes = [8, 2, 8, 64], strides = [1, 1, 1, 1]} : vector<10x2x17x64xf32> to vector<8x2x8x64xf32>
    %144 = vector.shape_cast %143 : vector<8x2x8x64xf32> to vector<128x64xf32>
    %145 = arith.truncf %144 : vector<128x64xf32> to vector<128x64xbf16>
    %c0_98 = arith.constant 0 : index
    %c448_99 = arith.constant 448 : index
    %146 = vector.load %arg11[%c0_98, %c448_99] : memref<128x576xbf16, #tpu.memory_space<vmem>>, vector<128x64xbf16>
    tpu.vector_store %arg11[%c0_98, %c448_99], %145 {strides = array<i32>} : memref<128x576xbf16, #tpu.memory_space<vmem>>, vector<128x64xbf16>,
    %147 = vector.extract_strided_slice %114 {offsets = [2, 0, 9, 0], sizes = [8, 2, 8, 64], strides = [1, 1, 1, 1]} : vector<10x2x17x64xf32> to vector<8x2x8x64xf32>
    %148 = vector.shape_cast %147 : vector<8x2x8x64xf32> to vector<128x64xf32>
    %149 = arith.truncf %148 : vector<128x64xf32> to vector<128x64xbf16>
    %c0_100 = arith.constant 0 : index
    %c512_101 = arith.constant 512 : index
    %150 = vector.load %arg11[%c0_100, %c512_101] : memref<128x576xbf16, #tpu.memory_space<vmem>>, vector<128x64xbf16>
    tpu.vector_store %arg11[%c0_100, %c512_101], %149 {strides = array<i32>} : memref<128x576xbf16, #tpu.memory_space<vmem>>, vector<128x64xbf16>,
    %c0_102 = arith.constant 0 : index
    %c0_103 = arith.constant 0 : index
    %151 = vector.load %arg11[%c0_102, %c0_103] : memref<128x576xbf16, #tpu.memory_space<vmem>>, vector<128x576xbf16>
    %c0_104 = arith.constant 0 : index
    %c0_105 = arith.constant 0 : index
    %152 = vector.load %arg6[%c0_104, %c0_105] : memref<576x64xbf16, #tpu.memory_space<vmem>>, vector<576x64xbf16>
    %cst_106 = arith.constant dense<0.000000e+00> : vector<128x64xf32>
    %153 = tpu.matmul %151, %152, %cst_106 {dimension_numbers = #tpu.dot_dimension_numbers<[1], [0], [0], [1], [0, 0, 1, 1], [], []>} : vector<128x576xbf16>, vector<576x64xbf16>, vector<128x64xf32> -> vector<128x64xf32>
    %c0_107 = arith.constant 0 : index
    %c0_108 = arith.constant 0 : index
    %154 = vector.load %arg7[%c0_107, %c0_108] : memref<1x64xf32, #tpu.memory_space<vmem>>, vector<1x64xf32>
    %c0_109 = arith.constant 0 : index
    %c0_110 = arith.constant 0 : index
    %155 = vector.load %arg8[%c0_109, %c0_110] : memref<1x64xf32, #tpu.memory_space<vmem>>, vector<1x64xf32>
    %cst_111 = arith.constant dense<0.000000e+00> : vector<64xf32>
    %156 = vector.multi_reduction <add>, %153, %cst_111 [0] : vector<128x64xf32> to vector<64xf32>
    %157 = vector.shape_cast %156 : vector<64xf32> to vector<1x64xf32>
    %cst_112 = arith.constant 1.280000e+02 : f32
    %158 = vector.broadcast %cst_112 : f32 to vector<1x64xf32>
    %159 = arith.divf %157, %158 : vector<1x64xf32>
    %160 = vector.broadcast %159 : vector<1x64xf32> to vector<128x64xf32>
    %161 = arith.subf %153, %160 : vector<128x64xf32>
    %162 = arith.mulf %161, %161 : vector<128x64xf32>
    %cst_113 = arith.constant dense<0.000000e+00> : vector<64xf32>
    %163 = vector.multi_reduction <add>, %162, %cst_113 [0] : vector<128x64xf32> to vector<64xf32>
    %164 = vector.shape_cast %163 : vector<64xf32> to vector<1x64xf32>
    %cst_114 = arith.constant 1.280000e+02 : f32
    %165 = vector.broadcast %cst_114 : f32 to vector<1x64xf32>
    %166 = arith.divf %164, %165 : vector<1x64xf32>
    %cst_115 = arith.constant 9.99999974E-6 : f32
    %167 = vector.broadcast %cst_115 : f32 to vector<1x64xf32>
    %168 = arith.addf %166, %167 : vector<1x64xf32>
    %169 = math.rsqrt %168 : vector<1x64xf32>
    %170 = arith.mulf %154, %169 : vector<1x64xf32>
    %171 = vector.broadcast %170 : vector<1x64xf32> to vector<128x64xf32>
    %172 = arith.mulf %161, %171 : vector<128x64xf32>
    %173 = vector.broadcast %155 : vector<1x64xf32> to vector<128x64xf32>
    %174 = arith.addf %172, %173 : vector<128x64xf32>
    %175 = vector.shape_cast %174 : vector<128x64xf32> to vector<8x16x64xf32>
    %176 = vector.extract_strided_slice %175 {offsets = [0, 0, 0], sizes = [1, 16, 64], strides = [1, 1, 1]} : vector<8x16x64xf32> to vector<1x16x64xf32>
    %177 = vector.shape_cast %176 : vector<1x16x64xf32> to vector<16x64xf32>
    %c0_116 = arith.constant 0 : index
    %c0_117 = arith.constant 0 : index
    %178 = vector.load %arg0[%c0_116, %c0_117] : memref<16x512xf32, #tpu.memory_space<vmem>>, vector<16x64xf32>
    %179 = arith.addf %177, %178 : vector<16x64xf32>
    %c0_118 = arith.constant 0 : index
    %c0_119 = arith.constant 0 : index
    %180 = vector.load %arg9[%c0_118, %c0_119] : memref<16x512xf32, #tpu.memory_space<vmem>>, vector<16x64xf32>
    tpu.vector_store %arg9[%c0_118, %c0_119], %179 {strides = array<i32>} : memref<16x512xf32, #tpu.memory_space<vmem>>, vector<16x64xf32>,
    %181 = vector.extract_strided_slice %175 {offsets = [1, 0, 0], sizes = [1, 16, 64], strides = [1, 1, 1]} : vector<8x16x64xf32> to vector<1x16x64xf32>
    %182 = vector.shape_cast %181 : vector<1x16x64xf32> to vector<16x64xf32>
    %c0_120 = arith.constant 0 : index
    %c64_121 = arith.constant 64 : index
    %183 = vector.load %arg0[%c0_120, %c64_121] : memref<16x512xf32, #tpu.memory_space<vmem>>, vector<16x64xf32>
    %184 = arith.addf %182, %183 : vector<16x64xf32>
    %c0_122 = arith.constant 0 : index
    %c64_123 = arith.constant 64 : index
    %185 = vector.load %arg9[%c0_122, %c64_123] : memref<16x512xf32, #tpu.memory_space<vmem>>, vector<16x64xf32>
    tpu.vector_store %arg9[%c0_122, %c64_123], %184 {strides = array<i32>} : memref<16x512xf32, #tpu.memory_space<vmem>>, vector<16x64xf32>,
    %186 = vector.extract_strided_slice %175 {offsets = [2, 0, 0], sizes = [1, 16, 64], strides = [1, 1, 1]} : vector<8x16x64xf32> to vector<1x16x64xf32>
    %187 = vector.shape_cast %186 : vector<1x16x64xf32> to vector<16x64xf32>
    %c0_124 = arith.constant 0 : index
    %c128_125 = arith.constant 128 : index
    %188 = vector.load %arg0[%c0_124, %c128_125] : memref<16x512xf32, #tpu.memory_space<vmem>>, vector<16x64xf32>
    %189 = arith.addf %187, %188 : vector<16x64xf32>
    %c0_126 = arith.constant 0 : index
    %c128_127 = arith.constant 128 : index
    %190 = vector.load %arg9[%c0_126, %c128_127] : memref<16x512xf32, #tpu.memory_space<vmem>>, vector<16x64xf32>
    tpu.vector_store %arg9[%c0_126, %c128_127], %189 {strides = array<i32>} : memref<16x512xf32, #tpu.memory_space<vmem>>, vector<16x64xf32>,
    %191 = vector.extract_strided_slice %175 {offsets = [3, 0, 0], sizes = [1, 16, 64], strides = [1, 1, 1]} : vector<8x16x64xf32> to vector<1x16x64xf32>
    %192 = vector.shape_cast %191 : vector<1x16x64xf32> to vector<16x64xf32>
    %c0_128 = arith.constant 0 : index
    %c192_129 = arith.constant 192 : index
    %193 = vector.load %arg0[%c0_128, %c192_129] : memref<16x512xf32, #tpu.memory_space<vmem>>, vector<16x64xf32>
    %194 = arith.addf %192, %193 : vector<16x64xf32>
    %c0_130 = arith.constant 0 : index
    %c192_131 = arith.constant 192 : index
    %195 = vector.load %arg9[%c0_130, %c192_131] : memref<16x512xf32, #tpu.memory_space<vmem>>, vector<16x64xf32>
    tpu.vector_store %arg9[%c0_130, %c192_131], %194 {strides = array<i32>} : memref<16x512xf32, #tpu.memory_space<vmem>>, vector<16x64xf32>,
    %196 = vector.extract_strided_slice %175 {offsets = [4, 0, 0], sizes = [1, 16, 64], strides = [1, 1, 1]} : vector<8x16x64xf32> to vector<1x16x64xf32>
    %197 = vector.shape_cast %196 : vector<1x16x64xf32> to vector<16x64xf32>
    %c0_132 = arith.constant 0 : index
    %c256_133 = arith.constant 256 : index
    %198 = vector.load %arg0[%c0_132, %c256_133] : memref<16x512xf32, #tpu.memory_space<vmem>>, vector<16x64xf32>
    %199 = arith.addf %197, %198 : vector<16x64xf32>
    %c0_134 = arith.constant 0 : index
    %c256_135 = arith.constant 256 : index
    %200 = vector.load %arg9[%c0_134, %c256_135] : memref<16x512xf32, #tpu.memory_space<vmem>>, vector<16x64xf32>
    tpu.vector_store %arg9[%c0_134, %c256_135], %199 {strides = array<i32>} : memref<16x512xf32, #tpu.memory_space<vmem>>, vector<16x64xf32>,
    %201 = vector.extract_strided_slice %175 {offsets = [5, 0, 0], sizes = [1, 16, 64], strides = [1, 1, 1]} : vector<8x16x64xf32> to vector<1x16x64xf32>
    %202 = vector.shape_cast %201 : vector<1x16x64xf32> to vector<16x64xf32>
    %c0_136 = arith.constant 0 : index
    %c320_137 = arith.constant 320 : index
    %203 = vector.load %arg0[%c0_136, %c320_137] : memref<16x512xf32, #tpu.memory_space<vmem>>, vector<16x64xf32>
    %204 = arith.addf %202, %203 : vector<16x64xf32>
    %c0_138 = arith.constant 0 : index
    %c320_139 = arith.constant 320 : index
    %205 = vector.load %arg9[%c0_138, %c320_139] : memref<16x512xf32, #tpu.memory_space<vmem>>, vector<16x64xf32>
    tpu.vector_store %arg9[%c0_138, %c320_139], %204 {strides = array<i32>} : memref<16x512xf32, #tpu.memory_space<vmem>>, vector<16x64xf32>,
    %206 = vector.extract_strided_slice %175 {offsets = [6, 0, 0], sizes = [1, 16, 64], strides = [1, 1, 1]} : vector<8x16x64xf32> to vector<1x16x64xf32>
    %207 = vector.shape_cast %206 : vector<1x16x64xf32> to vector<16x64xf32>
    %c0_140 = arith.constant 0 : index
    %c384_141 = arith.constant 384 : index
    %208 = vector.load %arg0[%c0_140, %c384_141] : memref<16x512xf32, #tpu.memory_space<vmem>>, vector<16x64xf32>
    %209 = arith.addf %207, %208 : vector<16x64xf32>
    %c0_142 = arith.constant 0 : index
    %c384_143 = arith.constant 384 : index
    %210 = vector.load %arg9[%c0_142, %c384_143] : memref<16x512xf32, #tpu.memory_space<vmem>>, vector<16x64xf32>
    tpu.vector_store %arg9[%c0_142, %c384_143], %209 {strides = array<i32>} : memref<16x512xf32, #tpu.memory_space<vmem>>, vector<16x64xf32>,
    %211 = vector.extract_strided_slice %175 {offsets = [7, 0, 0], sizes = [1, 16, 64], strides = [1, 1, 1]} : vector<8x16x64xf32> to vector<1x16x64xf32>
    %212 = vector.shape_cast %211 : vector<1x16x64xf32> to vector<16x64xf32>
    %c0_144 = arith.constant 0 : index
    %c448_145 = arith.constant 448 : index
    %213 = vector.load %arg0[%c0_144, %c448_145] : memref<16x512xf32, #tpu.memory_space<vmem>>, vector<16x64xf32>
    %214 = arith.addf %212, %213 : vector<16x64xf32>
    %c0_146 = arith.constant 0 : index
    %c448_147 = arith.constant 448 : index
    %215 = vector.load %arg9[%c0_146, %c448_147] : memref<16x512xf32, #tpu.memory_space<vmem>>, vector<16x64xf32>
    tpu.vector_store %arg9[%c0_146, %c448_147], %214 {strides = array<i32>} : memref<16x512xf32, #tpu.memory_space<vmem>>, vector<16x64xf32>,
    return
  }
}

</mosaic_0001>

<bundles_post_ra>
// kernel: conv_res_block.1
= control target key start
LH: loop header
LB: loop body
LE: loop exit
PB: predicated region body
PF: predicated region fallthrough
CT: control target
= control target key end

     0   :  { %vm34_vm0 = vcmask 523264   ;;  %vm37_vm1 = vcmask 516096   ;;  %v3432_v3 = vmov 0.0   ;;  %s3433_s15 = smov 64   ;;  %vm260_vm2 = vcmask 1040384   ;;  %s5175_s0 = inlined_call_operand.vmem [shape: f32[16,512], index: 0, kind: input, shape index: {}, may-alias: {0,9}]   ;;  %s5176_s1 = inlined_call_operand.vmem [shape: bf16[576,64], index: 1, kind: input, shape index: {}]   ;;  %s5177_s2 = inlined_call_operand.vmem [shape: f32[1,64], index: 2, kind: input, shape index: {}]   ;;  %s5178_s6 = inlined_call_operand.vmem [shape: bf16[576,64], index: 6, kind: input, shape index: {}]   ;;  %s5179_s3 = inlined_call_operand.vmem [shape: f32[1,64], index: 3, kind: input, shape index: {}]   ;;  %s5180_s5 = inlined_call_operand.<no memory space> [shape: f32[1,1], index: 5, kind: input, shape index: {}]   ;;  %s5181_s4 = inlined_call_operand.vmem [shape: f32[1,64], index: 4, kind: input, shape index: {}]   ;;  %s5182_s7 = inlined_call_operand.vmem [shape: f32[1,64], index: 7, kind: input, shape index: {}]   ;;  %s5183_s8 = inlined_call_operand.vmem [shape: f32[1,64], index: 8, kind: input, shape index: {}]   ;;  %s5184_s9 = inlined_call_operand.vmem [shape: f32[16,512], index: 9, kind: output, shape index: {}, may-alias: {0,9}]  }
   0x1   :  { %v3487_v0 = vld [vmem:[%s5175_s0] sm:$0xff]  ;;  %v3497_v2 = vld [vmem:[%s5175_s0 + $0x8] sm:$0xff]  ;;  %49 = vst.msk [vmem:[#allocation2 + $0x68] sm:$0xff] %vm34_vm0, %v3432_v3  ;;  %35 = vst.msk [vmem:[#allocation2] sm:$0xff] %vm34_vm0, %v3432_v3  ;;  %vm5187_vm3 = vcmask 1046528   ;;  %vm5186_vm4 = vcmask 1048064  }
   0x2   :  { %v3492_v1 = vld [vmem:[%s5175_s0 + $0x20] sm:$0xff]  ;;  %36 = vst.msk [vmem:[#allocation2 + $0x8] sm:$0xff] %vm34_vm0, %v3432_v3  ;;  %39 = vst.msk [vmem:[#allocation2 + $0x18] sm:$0xff] %vm34_vm0, %v3432_v3  ;;  %105 = vrot.lane.b32.xlu0 %v3487_v0, %s3433_s15  ;;  %123 = vrot.lane.b32.xlu1 %v3497_v2, %s3433_s15  ;;  %v120_v4 = vld [vmem:[%s5175_s0 + $0x28] sm:$0xff] }
   0x3   :  { %40 = vst.msk [vmem:[#allocation2 + $0x20] sm:$0xff] %vm34_vm0, %v3432_v3  ;;  %42 = vst.msk [vmem:[#allocation2 + $0x30] sm:$0xff] %vm34_vm0, %v3432_v3  ;;  %v138_v5 = vld [vmem:[%s5175_s0 + $0x30] sm:$0xff]  ;;  %v156_v7 = vld [vmem:[%s5175_s0 + $0x38] sm:$0xff] }
   0x4   :  { %43 = vst.msk [vmem:[#allocation2 + $0x38] sm:$0xff] %vm34_vm0, %v3432_v3  ;;  %45 = vst.msk [vmem:[#allocation2 + $0x48] sm:$0xff] %vm34_vm0, %v3432_v3  ;;  %v137_v6 = vld [vmem:[%s5175_s0 + $0x10] sm:$0xff]  ;;  %v155_v8 = vld [vmem:[%s5175_s0 + $0x18] sm:$0xff] }
   0x5   :  { %46 = vst.msk [vmem:[#allocation2 + $0x50] sm:$0xff] %vm34_vm0, %v3432_v3  ;;  %48 = vst.msk [vmem:[#allocation2 + $0x60] sm:$0xff] %vm34_vm0, %v3432_v3 }
   0x6   :  { %51 = vst.msk [vmem:[#allocation2 + $0x78] sm:$0xff] %vm34_vm0, %v3432_v3  ;;  %52 = vst.msk [vmem:[#allocation2 + $0x80] sm:$0xff] %vm34_vm0, %v3432_v3  ;;  %107 = vrot.lane.b32.xlu0 %v3492_v1, %s3433_s15  ;;  %125 = vrot.lane.b32.xlu1 %v120_v4, %s3433_s15 }
   0x7   :  { %54 = vst.msk [vmem:[#allocation2 + $0x90] sm:$0xff] %vm34_vm0, %v3432_v3  ;;  %55 = vst.msk [vmem:[#allocation2 + $0x98] sm:$0xff] %vm34_vm0, %v3432_v3 }
   0x8   :  { %57 = vst.msk [vmem:[#allocation2 + $0xa8] sm:$0xff] %vm34_vm0, %v3432_v3  ;;  %58 = vst.msk [vmem:[#allocation2 + $0xb0] sm:$0xff] %vm34_vm0, %v3432_v3 }
   0x9   :  { %60 = vst.msk [vmem:[#allocation2 + $0xc0] sm:$0xff] %vm34_vm0, %v3432_v3  ;;  %61 = vst.msk [vmem:[#allocation2 + $0xc8] sm:$0xff] %vm34_vm0, %v3432_v3  ;;  %v3594_v13 = vld [vmem:[#allocation2 + $0x8] sm:$0xff] }
   0xa   :  { %63 = vst.msk [vmem:[#allocation2 + $0xd8] sm:$0xff] %vm34_vm0, %v3432_v3  ;;  %64 = vst.msk [vmem:[#allocation2 + $0xe0] sm:$0xff] %vm34_vm0, %v3432_v3  ;;  %v174_v9 = vld [vmem:[#allocation2 + $0x30] sm:$0xff]  ;;  %143 = vrot.lane.b32.xlu1 %v138_v5, %s3433_s15  ;;  %141 = vrot.lane.b32.xlu0 %v137_v6, %s3433_s15  ;;  %v3596_v14 = vld [vmem:[#allocation2 + $0x20] sm:$0xff] }
   0xb   :  { %66 = vst.msk [vmem:[#allocation2 + $0xf0] sm:$0xff] %vm34_vm0, %v3432_v3  ;;  %67 = vst.msk [vmem:[#allocation2 + $0xf8] sm:$0xff] %vm34_vm0, %v3432_v3  ;;  %v177_v11 = vld [vmem:[#allocation2 + $0x48] sm:$0xff]  ;;  %v267_v15 = vrot.slane %v174_v9, 7  ;;  %v416_v34 = vpack.c.bf16 %v3596_v14, %v3594_v13 }
   0xc   :  { %69 = vst.msk [vmem:[#allocation2 + $0x108] sm:$0xff] %vm34_vm0, %v3432_v3  ;;  %70 = vst.msk [vmem:[#allocation2 + $0x110] sm:$0xff] %vm34_vm0, %v3432_v3  ;;  %v270_v17 = vrot.slane %v177_v11, 7 }
   0xd   :  { %72 = vst.msk [vmem:[#allocation2 + $0x120] sm:$0xff] %vm34_vm0, %v3432_v3  ;;  %73 = vst.msk [vmem:[#allocation2 + $0x128] sm:$0xff] %vm34_vm0, %v3432_v3 }
   0xe   :  { %75 = vst.msk [vmem:[#allocation2 + $0x138] sm:$0xff] %vm34_vm0, %v3432_v3  ;;  %76 = vst.msk [vmem:[#allocation2 + $0x140] sm:$0xff] %vm34_vm0, %v3432_v3  ;;  %v186_v22 = vld [vmem:[#allocation2 + $0x90] sm:$0xff]  ;;  %161 = vrot.lane.b32.xlu1 %v156_v7, %s3433_s15  ;;  %159 = vrot.lane.b32.xlu0 %v155_v8, %s3433_s15 }
   0xf   :  { %78 = vst.msk [vmem:[#allocation2 + $0x150] sm:$0xff] %vm34_vm0, %v3432_v3  ;;  %79 = vst.msk [vmem:[#allocation2 + $0x158] sm:$0xff] %vm34_vm0, %v3432_v3  ;;  %v189_v25 = vld [vmem:[#allocation2 + $0xa8] sm:$0xff]  ;;  %v279_v26 = vrot.slane %v186_v22, 7 }
  0x10   :  { %81 = vst.msk [vmem:[#allocation2 + $0x168] sm:$0xff] %vm34_vm0, %v3432_v3  ;;  %82 = vst.msk [vmem:[#allocation2 + $0x170] sm:$0xff] %vm34_vm0, %v3432_v3  ;;  %v282_v29 = vrot.slane %v189_v25, 7 }
  0x11   :  { %84 = vst.msk [vmem:[#allocation2 + $0x180] sm:$0xff] %vm34_vm0, %v3432_v3  ;;  %85 = vst.msk [vmem:[#allocation2 + $0x188] sm:$0xff] %vm34_vm0, %v3432_v3 }
  0x12   :  { %87 = vst.msk [vmem:[#allocation2 + $0x198] sm:$0xff] %vm34_vm0, %v3432_v3  ;;  %88 = vst.msk [vmem:[#allocation2 + $0x1a0] sm:$0xff] %vm34_vm0, %v3432_v3  ;;  %v198_v31 = vld [vmem:[#allocation2 + $0xf0] sm:$0xff]  ;;  %432 = vrot.lane.b32.xlu0 %v416_v34, %s3433_s15 }
  0x13   :  { %90 = vst.msk [vmem:[#allocation2 + $0x1b0] sm:$0xff] %vm34_vm0, %v3432_v3  ;;  %91 = vst.msk [vmem:[#allocation2 + $0x1b8] sm:$0xff] %vm34_vm0, %v3432_v3  ;;  %v201_v33 = vld [vmem:[#allocation2 + $0x108] sm:$0xff]  ;;  %v291_v38 = vrot.slane %v198_v31, 7 }
  0x14   :  { %93 = vst.msk [vmem:[#allocation2 + $0x1c8] sm:$0xff] %vm34_vm0, %v3432_v3  ;;  %94 = vst.msk [vmem:[#allocation2 + $0x1d0] sm:$0xff] %vm34_vm0, %v3432_v3  ;;  %v294_v42 = vrot.slane %v201_v33, 7 }
  0x15   :  { %44 = vst.msk [vmem:[#allocation2 + $0x40] sm:$0x1] %vm37_vm1, %v3432_v3  ;;  %47 = vst.msk [vmem:[#allocation2 + $0x58] sm:$0x1] %vm37_vm1, %v3432_v3 }
  0x16   :  { %38 = vst.msk [vmem:[#allocation2 + $0x10] sm:$0x1] %vm37_vm1, %v3432_v3  ;;  %41 = vst.msk [vmem:[#allocation2 + $0x28] sm:$0x1] %vm37_vm1, %v3432_v3  ;;  %v210_v57 = vld [vmem:[#allocation2 + $0x150] sm:$0xff] }
  0x17   :  { %50 = vst.msk [vmem:[#allocation2 + $0x70] sm:$0x1] %vm37_vm1, %v3432_v3  ;;  %53 = vst.msk [vmem:[#allocation2 + $0x88] sm:$0x1] %vm37_vm1, %v3432_v3  ;;  %v213_v59 = vld [vmem:[#allocation2 + $0x168] sm:$0xff]  ;;  %v303_v61 = vrot.slane %v210_v57, 7 }
  0x18   :  { %56 = vst.msk [vmem:[#allocation2 + $0xa0] sm:$0x1] %vm37_vm1, %v3432_v3  ;;  %59 = vst.msk [vmem:[#allocation2 + $0xb8] sm:$0x1] %vm37_vm1, %v3432_v3  ;;  %v306_v63 = vrot.slane %v213_v59, 7  ;;  %v3355_v57 = vld [vmem:[%s5176_s1] sm:$0xff]  }
  0x19   :  { %62 = vst.msk [vmem:[#allocation2 + $0xd0] sm:$0x1] %vm37_vm1, %v3432_v3  ;;  %65 = vst.msk [vmem:[#allocation2 + $0xe8] sm:$0x1] %vm37_vm1, %v3432_v3  ;;  %v3356_v59 = vld [vmem:[%s5176_s1 + $0x48] sm:$0xff]  }
  0x1a   :  { %68 = vst.msk [vmem:[#allocation2 + $0x100] sm:$0x1] %vm37_vm1, %v3432_v3  ;;  %71 = vst.msk [vmem:[#allocation2 + $0x118] sm:$0x1] %vm37_vm1, %v3432_v3  ;;  %v3685_v34 = vld [vmem:[#allocation2 + $0x1b8] sm:$0xff] }
  0x1b   :  { %74 = vst.msk [vmem:[#allocation2 + $0x130] sm:$0x1] %vm37_vm1, %v3432_v3  ;;  %77 = vst.msk [vmem:[#allocation2 + $0x148] sm:$0x1] %vm37_vm1, %v3432_v3 }
  0x1c   :  { %80 = vst.msk [vmem:[#allocation2 + $0x160] sm:$0x1] %vm37_vm1, %v3432_v3  ;;  %83 = vst.msk [vmem:[#allocation2 + $0x178] sm:$0x1] %vm37_vm1, %v3432_v3  ;;  %v176_v39 = vld [vmem:[#allocation2 + $0x40] sm:$0x1] }
  0x1d   :  { %86 = vst.msk [vmem:[#allocation2 + $0x190] sm:$0x1] %vm37_vm1, %v3432_v3  ;;  %89 = vst.msk [vmem:[#allocation2 + $0x1a8] sm:$0x1] %vm37_vm1, %v3432_v3  ;;  %v179_v44 = vld [vmem:[#allocation2 + $0x58] sm:$0x1] }
  0x1e   :  { %92 = vst.msk [vmem:[#allocation2 + $0x1c0] sm:$0x1] %vm37_vm1, %v3432_v3  ;;  %95 = vst.msk [vmem:[#allocation2 + $0x1d8] sm:$0x1] %vm37_vm1, %v3432_v3  ;;  %v514_v47 = vrot.slane %v176_v39, 1  ;;  %v517_v51 = vrot.slane %v179_v44, 1 }
  0x1f   :  { %99 = vst.msk [vmem:[#allocation2 + $0x38] sm:$0xff] %vm34_vm0, %v3487_v0  ;;  %100 = vst.msk [vmem:[#allocation2 + $0x50] sm:$0xff] %vm34_vm0, %v3492_v1  ;;  %v191_v3 = vld [vmem:[#allocation2 + $0xb8] sm:$0x1] }
  0x20   :  { %117 = vst.msk [vmem:[#allocation2 + $0x98] sm:$0xff] %vm34_vm0, %v3497_v2  ;;  %118 = vst.msk [vmem:[#allocation2 + $0xb0] sm:$0xff] %vm34_vm0, %v120_v4  ;;  %v188_v2 = vld [vmem:[#allocation2 + $0xa0] sm:$0x1]  ;;  %v529_v9 = vrot.slane %v191_v3, 1  ;;  %v3361_v3 = vld [vmem:[%s5176_s1 + $0x18] sm:$0xff]  }
  0x21   :  { %136 = vst.msk [vmem:[#allocation2 + $0x110] sm:$0xff] %vm34_vm0, %v138_v5  ;;  %135 = vst.msk [vmem:[#allocation2 + $0xf8] sm:$0xff] %vm34_vm0, %v137_v6  ;;  %v526_v6 = vrot.slane %v188_v2, 1  ;;  %v3360_v2 = vld [vmem:[%s5176_s1 + $0x58] sm:$0xff]  }
  0x22   :  { %153 = vst.msk [vmem:[#allocation2 + $0x158] sm:$0xff] %vm34_vm0, %v155_v8  ;;  %154 = vst.msk [vmem:[#allocation2 + $0x170] sm:$0xff] %vm34_vm0, %v156_v7 }
  0x23   :  { %v212_v22 = vld [vmem:[#allocation2 + $0x160] sm:$0x1] }
  0x26   :  { %v175_v10 = vld [vmem:[#allocation2 + $0x38] sm:$0xff]  ;;  %v178_v12 = vld [vmem:[#allocation2 + $0x50] sm:$0xff] }
  0x27   :  { %v268_v16 = vrot.slane %v175_v10, 7  ;;  %v271_v18 = vrot.slane %v178_v12, 7  ;;  %v417_v19 = vpack.c.bf16 %v178_v12, %v175_v10  ;;  %v3598_v20 = vld [vmem:[#allocation2 + $0x98] sm:$0xff]  ;;  %v3600_v21 = vld [vmem:[#allocation2 + $0xb0] sm:$0xff]  ;;  %v513_v46 = vrot.slane %v175_v10, 1 }
  0x28   :  { %v3605_v24 = vpack.c.bf16 %v3600_v21, %v3598_v20  ;;  %v280_v27 = vrot.slane %v3598_v20, 7  ;;  %v283_v30 = vrot.slane %v3600_v21, 7  ;;  %v3611_v32 = vld [vmem:[#allocation2 + $0xf8] sm:$0xff]  ;;  %v3620_v37 = vld [vmem:[#allocation2 + $0x110] sm:$0xff]  ;;  %v516_v48 = vrot.slane %v178_v12, 1 }
  0x29   :  { %v269_v23 = vsel %vm260_vm2, %v267_v15, %v268_v16  ;;  %v272_v28 = vsel %vm260_vm2, %v270_v17, %v271_v18  ;;  %465 = vst.msk [vmem:[#allocation3 + $0x10] sm:$0xff] %vm34_vm0, %v417_v19  ;;  %v292_v41 = vrot.slane %v3611_v32, 7  ;;  %v295_v43 = vrot.slane %v3620_v37, 7  ;;  %434 = vrot.lane.b32.xlu0 %v417_v19, %s3433_s15  ;;  %v211_v58 = vld [vmem:[#allocation2 + $0x158] sm:$0xff]  ;;  %v214_v60 = vld [vmem:[#allocation2 + $0x170] sm:$0xff] }
  0x2a   :  { %v326_v35 = vpack.c.bf16 %v272_v28, %v269_v23  ;;  %467 = vst.msk [vmem:[#allocation3 + $0x60] sm:$0xff] %vm34_vm0, %v3605_v24  ;;  %v281_v36 = vsel %vm260_vm2, %v279_v26, %v280_v27  ;;  %v284_v40 = vsel %vm260_vm2, %v282_v29, %v283_v30  ;;  %v515_v53 = vsel %vm5187_vm3, %v513_v46, %v514_v47  ;;  %v200_v16 = vld [vmem:[#allocation2 + $0x100] sm:$0x1]  ;;  %v203_v17 = vld [vmem:[#allocation2 + $0x118] sm:$0x1] }
  0x2b   :  { %v3626_v45 = vpack.c.bf16 %v284_v40, %v281_v36  ;;  %v293_v49 = vsel %vm260_vm2, %v291_v38, %v292_v41  ;;  %v296_v50 = vsel %vm260_vm2, %v294_v42, %v295_v43  ;;  %v518_v54 = vsel %vm5187_vm3, %v516_v48, %v517_v51  ;;  %v215_v23 = vld [vmem:[#allocation2 + $0x178] sm:$0x1]  ;;  %v224_v36 = vld [vmem:[#allocation2 + $0x1c0] sm:$0x1] }
  0x2c   :  { %334 = vst.msk [vmem:[#allocation3 + $0x28] sm:$0xff] %vm34_vm0, %v326_v35  ;;  %362 = vrot.lane.b32.xlu1 %v326_v35, %s3433_s15  ;;  %v3636_v52 = vpack.c.bf16 %v296_v50, %v293_v49  ;;  %v3642_v55 = vpack.c.bf16 %v3620_v37, %v3611_v32  ;;  %v3648_v56 = vpack.c.bf16 %v518_v54, %v515_v53  ;;  %v304_v62 = vrot.slane %v211_v58, 7  ;;  %v227_v38 = vld [vmem:[#allocation2 + $0x1d8] sm:$0x1]  ;;  %v168_v48 = vld [vmem:[#allocation2] sm:$0xff] }
  0x2d   :  { %336 = vst.msk [vmem:[#allocation3 + $0x78] sm:$0xff] %vm34_vm0, %v3626_v45  ;;  %409 = vst.msk [vmem:[#allocation3 + $0x30] sm:$0xff] %vm34_vm0, %v3626_v45  ;;  %v307_v0 = vrot.slane %v214_v60, 7  ;;  %v525_v5 = vrot.slane %v3598_v20, 1  ;;  %v528_v7 = vrot.slane %v3600_v21, 1  ;;  %v3669_v15 = vpack.c.bf16 %v214_v60, %v211_v58  ;;  %v171_v49 = vld [vmem:[#allocation2 + $0x18] sm:$0xff] }
  0x2e   :  { %338 = vst.msk [vmem:[#allocation3 + $0xc8] sm:$0xff] %vm34_vm0, %v3636_v52  ;;  %411 = vst.msk [vmem:[#allocation3 + $0x80] sm:$0xff] %vm34_vm0, %v3636_v52  ;;  %v305_v1 = vsel %vm260_vm2, %v303_v61, %v304_v62  ;;  %v537_v18 = vrot.slane %v3611_v32, 1  ;;  %v538_v19 = vrot.slane %v200_v16, 1  ;;  %v540_v20 = vrot.slane %v3620_v37, 1  ;;  %v3693_v37 = vld [vmem:[#allocation2 + $0x1d0] sm:$0xff] }
  0x2f   :  { %469 = vst.msk [vmem:[#allocation3 + $0xb0] sm:$0xff] %vm34_vm0, %v3642_v55  ;;  %580 = vst.msk [vmem:[#allocation3 + $0x40] sm:$0xff] %vm34_vm0, %v3648_v56  ;;  %v308_v4 = vsel %vm260_vm2, %v306_v63, %v307_v0  ;;  %v527_v10 = vsel %vm5187_vm3, %v525_v5, %v526_v6  ;;  %v530_v11 = vsel %vm5187_vm3, %v528_v7, %v529_v9  ;;  %v541_v21 = vrot.slane %v203_v17, 1  ;;  %v3354_v51 = vld [vmem:[%s5176_s1 + $0x40] sm:$0xff]   ;;  %v3357_v61 = vld [vmem:[%s5176_s1 + $0x8] sm:$0xff]  }
  0x30   :  { %v3659_v8 = vpack.c.bf16 %v308_v4, %v305_v1  ;;  %v3667_v12 = vpack.c.bf16 %v530_v11, %v527_v10  ;;  %471 = vst.msk [vmem:[#allocation3 + $0x100] sm:$0xff] %vm34_vm0, %v3669_v15  ;;  %v549_v25 = vrot.slane %v211_v58, 1  ;;  %v550_v26 = vrot.slane %v212_v22, 1  ;;  %3024 = vmatprep.subr.bf16.mxu0 %v3354_v51  ;;  %v3358_v63 = vld [vmem:[%s5176_s1 + $0x50] sm:$0xff]   ;;  %v3362_v4 = vld [vmem:[%s5176_s1 + $0x60] sm:$0xff]   ;;  %v3364_v9 = vld [vmem:[%s5176_s1 + $0x68] sm:$0xff]  }
  0x31   :  { %v552_v27 = vrot.slane %v214_v60, 1  ;;  %v539_v28 = vsel %vm5187_vm3, %v537_v18, %v538_v19  ;;  %v542_v29 = vsel %vm5187_vm3, %v540_v20, %v541_v21  ;;  %v553_v30 = vrot.slane %v215_v23, 1  ;;  %3025 = vmatpush3.bf16.msra.mxu0 %v3355_v57  ;;  %v3359_v1 = vld [vmem:[%s5176_s1 + $0x10] sm:$0xff]   ;;  %v3367_v5 = vld [vmem:[%s5176_s1 + $0xc0] sm:$0xff]   ;;  %v3365_v10 = vld [vmem:[%s5176_s1 + $0x28] sm:$0xff]  }
  0x32   :  { %340 = vst.msk [vmem:[#allocation3 + $0x118] sm:$0xff] %vm34_vm0, %v3659_v8  ;;  %413 = vst.msk [vmem:[#allocation3 + $0xd0] sm:$0xff] %vm34_vm0, %v3659_v8  ;;  %v3681_v31 = vpack.c.bf16 %v542_v29, %v539_v28  ;;  %v551_v33 = vsel %vm5187_vm3, %v549_v25, %v550_v26  ;;  %v473_v39 = vpack.c.bf16 %v3693_v37, %v3685_v34  ;;  %v640_v40 = vrot.slane %v3685_v34, 1  ;;  %v3363_v6 = vld [vmem:[%s5176_s1 + $0x20] sm:$0xff]   ;;  %v3371_v11 = vld [vmem:[%s5176_s1 + $0xc8] sm:$0xff]  }
  0x33   :  { %650 = vst.msk [vmem:[#allocation3 + $0x48] sm:$0xff] %vm34_vm0, %v3667_v12  ;;  %582 = vst.msk [vmem:[#allocation3 + $0x90] sm:$0xff] %vm34_vm0, %v3667_v12  ;;  %v554_v32 = vsel %vm5187_vm3, %v552_v27, %v553_v30  ;;  %v641_v41 = vrot.slane %v224_v36, 1  ;;  %v262_v42 = vrot.slane %v3594_v13, 7  ;;  %v643_v43 = vrot.slane %v3693_v37, 1  ;;  %3026 = vmatprep.subr.bf16.mxu0 %v3356_v59  ;;  %3088 = vmatprep.subr.bf16.mxu1 %v3367_v5  ;;  %v3369_v7 = vld [vmem:[%s5176_s1 + $0x80] sm:$0xff]  }
  0x34   :  { %652 = vst.msk [vmem:[#allocation3 + $0x98] sm:$0xff] %vm34_vm0, %v3681_v31  ;;  %584 = vst.msk [vmem:[#allocation3 + $0xe0] sm:$0xff] %vm34_vm0, %v3681_v31  ;;  %v3691_v35 = vpack.c.bf16 %v554_v32, %v551_v33  ;;  %v644_v44 = vrot.slane %v227_v38, 1  ;;  %v265_v46 = vrot.slane %v3596_v14, 7  ;;  %v261_v53 = vrot.slane %v168_v48, 7  ;;  %3089 = vmatpush3.bf16.msra.mxu1 %v3369_v7  ;;  %v3366_v16 = vld [vmem:[%s5176_s1 + $0x70] sm:$0xff]  }
  0x35   :  { %v642_v47 = vsel %vm5187_vm3, %v640_v40, %v641_v41  ;;  %v264_v58 = vrot.slane %v171_v49, 7  ;;  %3027 = vmatpush3.bf16.msra.mxu0 %v3357_v61  ;;  %3090 = vmatprep.subr.bf16.mxu1 %v3371_v11  ;;  %v3373_v17 = vld [vmem:[%s5176_s1 + $0x88] sm:$0xff]   ;;  %v3368_v18 = vld [vmem:[%s5176_s1 + $0x30] sm:$0xff]   ;;  %v3370_v19 = vld [vmem:[%s5176_s1 + $0x78] sm:$0xff]   ;;  %v507_v36 = vrot.slane %v3594_v13, 1 }
  0x36   :  { %654 = vst.msk [vmem:[#allocation3 + $0xe8] sm:$0xff] %vm34_vm0, %v3691_v35  ;;  %586 = vst.msk [vmem:[#allocation3 + $0x130] sm:$0xff] %vm34_vm0, %v3691_v35  ;;  %v645_v50 = vsel %vm5187_vm3, %v643_v43, %v644_v44  ;;  %v263_v60 = vsel %vm260_vm2, %v261_v53, %v262_v42  ;;  %3028 = vmatprep.subr.bf16.mxu0 %v3358_v63  ;;  %v3372_v20 = vld [vmem:[%s5176_s1 + $0x38] sm:$0xff]   ;;  %v3374_v23 = vld [vmem:[%s5176_s1 + $0xd0] sm:$0xff]   ;;  %v510_v42 = vrot.slane %v3596_v14, 1 }
  0x37   :  { %v648_v54 = vpack.c.bf16 %v645_v50, %v642_v47  ;;  %v266_v62 = vsel %vm260_vm2, %v264_v58, %v265_v46  ;;  %v3375_v25 = vld [vmem:[%s5176_s1 + $0x90] sm:$0xff]   ;;  %v3782_v26 = vld [vmem:[%s5176_s1 + $0x100] sm:$0xff]   ;;  %v3784_v28 = vld [vmem:[#allocation2 + $0x78] sm:$0xff] }
  0x38   :  { %v325_v0 = vpack.c.bf16 %v266_v62, %v263_v60  ;;  %3091 = vmatpush3.bf16.msra.mxu1 %v3373_v17  ;;  %v180_v27 = vld [vmem:[#allocation2 + $0x60] sm:$0xff]  ;;  %v3786_v32 = vld [vmem:[#allocation2 + $0xd8] sm:$0xff]  ;;  %v182_v38 = vld [vmem:[#allocation2 + $0x70] sm:$0x1]  ;;  %v276_v44 = vrot.slane %v3784_v28, 7 }
  0x39   :  { %656 = vst.msk [vmem:[#allocation3 + $0x138] sm:$0xff] %vm34_vm0, %v648_v54  ;;  %3029 = vmatpush3.bf16.msra.mxu0 %v3359_v1  ;;  %3092 = vmatprep.subr.bf16.mxu1 %v3374_v23  ;;  %v192_v33 = vld [vmem:[#allocation2 + $0xc0] sm:$0xff]  ;;  %v194_v40 = vld [vmem:[#allocation2 + $0xd0] sm:$0x1]  ;;  %v3377_v41 = vld [vmem:[%s5176_s1 + $0xd8] sm:$0xff]   ;;  %v273_v43 = vrot.slane %v180_v27, 7 }
  0x3a   :  { %333 = vst.msk [vmem:[#allocation3] sm:$0xff] %vm34_vm0, %v325_v0  ;;  %3030 = vmatprep.subr.bf16.mxu0 %v3360_v2  ;;  %v3797_v46 = vld [vmem:[#allocation2 + $0x88] sm:$0x1]  ;;  %v3378_v47 = vld [vmem:[%s5176_s1 + $0x98] sm:$0xff]   ;;  %v285_v48 = vrot.slane %v192_v33, 7  ;;  %v288_v49 = vrot.slane %v3786_v32, 7 }
  0x3b   :  { %v3803_v50 = vld [vmem:[#allocation2 + $0x120] sm:$0xff]  ;;  %v3805_v51 = vld [vmem:[#allocation2 + $0x138] sm:$0xff]  ;;  %v3807_v53 = vld [vmem:[#allocation2 + $0xe8] sm:$0x1]  ;;  %v520_v59 = vrot.slane %v182_v38, 1  ;;  %v532_v60 = vrot.slane %v194_v40, 1 }
  0x3c   :  { %3093 = vmatpush3.bf16.msra.mxu1 %v3375_v25  ;;  %v3809_v61 = vld [vmem:[#allocation2 + $0x130] sm:$0x1]  ;;  %v3379_v2 = vld [vmem:[%s5176_s1 + $0xe0] sm:$0xff]   ;;  %v300_v5 = vrot.slane %v3805_v51, 7  ;;  %v173_v17 = vld [vmem:[#allocation2 + $0x28] sm:$0x1] }
  0x3d   :  { %3031 = vmatpush3.bf16.msra.mxu0 %v3361_v3  ;;  %3094 = vmatprep.subr.bf16.mxu1 %v3377_v41  ;;  %v523_v3 = vrot.slane %v3797_v46, 1  ;;  %v3380_v7 = vld [vmem:[%s5176_s1 + $0xa0] sm:$0xff]   ;;  %v544_v11 = vrot.slane %v3809_v61, 1  ;;  %v3828_v25 = vld [vmem:[#allocation2 + $0x148] sm:$0x1]  ;;  %v511_v28 = vrot.slane %v173_v17, 1 }
  0x3e   :  { %3032 = vmatprep.subr.bf16.mxu0 %v3362_v4  ;;  %v297_v4 = vrot.slane %v3803_v50, 7  ;;  %v3381_v38 = vld [vmem:[%s5176_s1 + $0xe8] sm:$0xff]   ;;  %v547_v13 = vrot.slane %v3828_v25, 1 }
  0x40   :  { %3095 = vmatpush3.bf16.msra.mxu1 %v3378_v47  ;;  %v512_v47 = vsel %vm5187_vm3, %v510_v42, %v511_v28 }
  0x41   :  { %3033 = vmatpush3.bf16.msra.mxu0 %v3363_v6  ;;  %v535_v6 = vrot.slane %v3807_v53, 1  ;;  %3096 = vmatprep.subr.bf16.mxu1 %v3379_v2 }
  0x42   :  { %3034 = vmatprep.subr.bf16.mxu0 %v3364_v9 }
  0x44   :  { %3097 = vmatpush3.bf16.msra.mxu1 %v3380_v7 }
  0x45   :  { %3035 = vmatpush3.bf16.msra.mxu0 %v3365_v10  ;;  %3098 = vmatprep.subr.bf16.mxu1 %v3381_v38  ;;  %v3387_v38 = vld [vmem:[%s5176_s1 + $0xb8] sm:$0xff]  }
  0x46   :  { %3036 = vmatprep.subr.bf16.mxu0 %v3366_v16  ;;  %v170_v16 = vld [vmem:[#allocation2 + $0x10] sm:$0x1] }
  0x47   :  { %v508_v27 = vrot.slane %v170_v16, 1 }
  0x49   :  { %3037 = vmatpush3.bf16.msra.mxu0 %v3368_v18  ;;  %v509_v46 = vsel %vm5187_vm3, %v507_v36, %v508_v27 }
  0x4a   :  { %3038 = vmatprep.subr.bf16.mxu0 %v3370_v19  ;;  %v571_v36 = vpack.c.bf16 %v512_v47, %v509_v46 }
  0x4c   :  { %579 = vst.msk [vmem:[#allocation3 + $0x18] sm:$0xff] %vm34_vm0, %v571_v36  ;;  %v222_v36 = vld [vmem:[#allocation2 + $0x1b0] sm:$0xff] }
  0x4d   :  { %3039 = vmatpush3.bf16.msra.mxu0 %v3372_v20 }
  0x4e   :  { %3304 = vmatprep.subr.bf16.mxu0 %v3782_v26 }
  0x74   :  { %v106_v21 = vpop.permute.xlu0 %105  ;;  %v124_v22 = vpop.permute.xlu1 %123 }
  0x75   :  { %112 = vst.msk [vmem:[#allocation2 + $0x68] sm:$0xff] %vm34_vm0, %v106_v21  ;;  %130 = vst.msk [vmem:[#allocation2 + $0xc8] sm:$0xff] %vm34_vm0, %v124_v22 }
  0x78   :  { %v108_v29 = vpop.permute.xlu0 %107  ;;  %v126_v30 = vpop.permute.xlu1 %125 }
  0x79   :  { %113 = vst.msk [vmem:[#allocation2 + $0x80] sm:$0xff] %vm34_vm0, %v108_v29  ;;  %131 = vst.msk [vmem:[#allocation2 + $0xe0] sm:$0xff] %vm34_vm0, %v126_v30 }
  0x7c   :  { %v181_v14 = vld [vmem:[#allocation2 + $0x68] sm:$0xff]  ;;  %v144_v57 = vpop.permute.xlu1 %143  ;;  %v142_v58 = vpop.permute.xlu0 %141 }
  0x7d   :  { %v193_v54 = vld [vmem:[#allocation2 + $0xc8] sm:$0xff]  ;;  %v274_v62 = vrot.slane %v181_v14, 7  ;;  %149 = vst.msk [vmem:[#allocation2 + $0x140] sm:$0xff] %vm34_vm0, %v144_v57  ;;  %148 = vst.msk [vmem:[#allocation2 + $0x128] sm:$0xff] %vm34_vm0, %v142_v58  ;;  %v519_v0 = vrot.slane %v181_v14, 1 }
  0x7e   :  { %v286_v63 = vrot.slane %v193_v54, 7  ;;  %v531_v1 = vrot.slane %v193_v54, 1 }
  0x7f   :  { %v275_v9 = vsel %vm260_vm2, %v273_v43, %v274_v62  ;;  %v521_v20 = vsel %vm5187_vm3, %v519_v0, %v520_v59  ;;  %v3382_v43 = vld [vmem:[%s5176_s1 + $0xa8] sm:$0xff]   ;;  %v3859_v62 = vld [vmem:[#allocation2 + $0x190] sm:$0x1] }
  0x80   :  { %v287_v10 = vsel %vm260_vm2, %v285_v48, %v286_v63  ;;  %v184_v18 = vld [vmem:[#allocation2 + $0x80] sm:$0xff]  ;;  %v162_v21 = vpop.permute.xlu1 %161  ;;  %v160_v22 = vpop.permute.xlu0 %159  ;;  %v533_v23 = vsel %vm5187_vm3, %v531_v1, %v532_v60  ;;  %3099 = vmatpush3.bf16.msra.mxu1 %v3382_v43 }
  0x81   :  { %v196_v19 = vld [vmem:[#allocation2 + $0xe0] sm:$0xff]  ;;  %v418_v29 = vpack.c.bf16 %v184_v18, %v181_v14  ;;  %v277_v30 = vrot.slane %v184_v18, 7  ;;  %167 = vst.msk [vmem:[#allocation2 + $0x1a0] sm:$0xff] %vm34_vm0, %v162_v21  ;;  %166 = vst.msk [vmem:[#allocation2 + $0x188] sm:$0xff] %vm34_vm0, %v160_v22  ;;  %v522_v40 = vrot.slane %v184_v18, 1  ;;  %v3384_v18 = vld [vmem:[%s5176_s1 + $0xb0] sm:$0xff]  }
  0x82   :  { %v3830_v33 = vpack.c.bf16 %v196_v19, %v193_v54  ;;  %v289_v32 = vrot.slane %v196_v19, 7  ;;  %v534_v41 = vrot.slane %v196_v19, 1  ;;  %v3850_v14 = vld [vmem:[#allocation2 + $0x180] sm:$0xff]  ;;  %v3852_v54 = vld [vmem:[#allocation2 + $0x198] sm:$0xff] }
  0x83   :  { %436 = vrot.lane.b32.xlu0 %v418_v29, %s3433_s15  ;;  %466 = vst.msk [vmem:[#allocation3 + $0x38] sm:$0xff] %vm34_vm0, %v418_v29  ;;  %v278_v48 = vsel %vm260_vm2, %v276_v44, %v277_v30  ;;  %v524_v58 = vsel %vm5187_vm3, %v522_v40, %v523_v3  ;;  %v3383_v3 = vld [vmem:[%s5176_s1 + $0xf0] sm:$0xff]   ;;  %v348_v21 = vrot.slane %v3852_v54, 7  ;;  %v400_v54 = vrot.slane %v3685_v34, 7 }
  0x84   :  { %468 = vst.msk [vmem:[#allocation3 + $0x88] sm:$0xff] %vm34_vm0, %v3830_v33  ;;  %v290_v53 = vsel %vm260_vm2, %v288_v49, %v289_v32  ;;  %v327_v42 = vpack.c.bf16 %v278_v48, %v275_v9  ;;  %v205_v59 = vld [vmem:[#allocation2 + $0x128] sm:$0xff]  ;;  %v208_v44 = vld [vmem:[#allocation2 + $0x140] sm:$0xff]  ;;  %v536_v60 = vsel %vm5187_vm3, %v534_v41, %v535_v6  ;;  %v433_v49 = vpop.permute.xlu0 %432  ;;  %v3861_v0 = vpack.c.bf16 %v524_v58, %v521_v20  ;;  %v3386_v32 = vld [vmem:[%s5176_s1 + $0xf8] sm:$0xff]  }
  0x85   :  { %v3855_v57 = vpack.c.bf16 %v290_v53, %v287_v10  ;;  %v3863_v1 = vpack.c.bf16 %v208_v44, %v205_v59  ;;  %v298_v2 = vrot.slane %v205_v59, 7  ;;  %v301_v7 = vrot.slane %v208_v44, 7  ;;  %v221_v9 = vld [vmem:[#allocation2 + $0x1a8] sm:$0x1]  ;;  %3100 = vmatprep.subr.bf16.mxu1 %v3383_v3 }
  0x86   :  { %364 = vrot.lane.b32.xlu1 %v327_v42, %s3433_s15  ;;  %335 = vst.msk [vmem:[#allocation3 + $0x50] sm:$0xff] %vm34_vm0, %v327_v42  ;;  %408 = vst.msk [vmem:[#allocation3 + $0x8] sm:$0xff] %vm34_vm0, %v327_v42  ;;  %v3877_v6 = vpack.c.bf16 %v536_v60, %v533_v23  ;;  %v345_v10 = vrot.slane %v3850_v14, 7  ;;  %v543_v16 = vrot.slane %v205_v59, 1  ;;  %v546_v17 = vrot.slane %v208_v44, 1  ;;  %3101 = vmatpush3.bf16.msra.mxu1 %v3384_v18  ;;  %v3385_v53 = vld [vmem:[%s5176_s1 + $0x108] sm:$0xff]  }
  0x87   :  { %337 = vst.msk [vmem:[#allocation3 + $0xa0] sm:$0xff] %vm34_vm0, %v3855_v57  ;;  %410 = vst.msk [vmem:[#allocation3 + $0x58] sm:$0xff] %vm34_vm0, %v3855_v57  ;;  %438 = vrot.lane.b32.xlu0 %v3605_v24, %s3433_s15  ;;  %v299_v19 = vsel %vm260_vm2, %v297_v4, %v298_v2  ;;  %v302_v20 = vsel %vm260_vm2, %v300_v5, %v301_v7  ;;  %v590_v24 = vrot.slane %v3859_v62, 1  ;;  %v593_v23 = vrot.slane %v221_v9, 1  ;;  %v225_v42 = vld [vmem:[#allocation2 + $0x1c8] sm:$0xff] }
  0x88   :  { %649 = vst.msk [vmem:[#allocation3 + $0x20] sm:$0xff] %vm34_vm0, %v3861_v0  ;;  %581 = vst.msk [vmem:[#allocation3 + $0x68] sm:$0xff] %vm34_vm0, %v3861_v0  ;;  %v3900_v22 = vpack.c.bf16 %v302_v20, %v299_v19  ;;  %v217_v50 = vld [vmem:[#allocation2 + $0x188] sm:$0xff]  ;;  %v220_v4 = vld [vmem:[#allocation2 + $0x1a0] sm:$0xff]  ;;  %v545_v51 = vsel %vm5187_vm3, %v543_v16, %v544_v11  ;;  %v548_v5 = vsel %vm5187_vm3, %v546_v17, %v547_v13  ;;  %3102 = vmatprep.subr.bf16.mxu1 %v3386_v32 }
  0x89   :  { %470 = vst.msk [vmem:[#allocation3 + $0xd8] sm:$0xff] %vm34_vm0, %v3863_v1  ;;  %651 = vst.msk [vmem:[#allocation3 + $0x70] sm:$0xff] %vm34_vm0, %v3877_v6  ;;  %v346_v27 = vrot.slane %v217_v50, 7  ;;  %v349_v28 = vrot.slane %v220_v4, 7  ;;  %v3910_v29 = vpack.c.bf16 %v548_v5, %v545_v51  ;;  %v3912_v30 = vpack.c.bf16 %v220_v4, %v217_v50 }
  0x8a   :  { %456 = vst.msk [vmem:[#allocation3 + $0x8] sm:$0xff] %vm5186_vm4, %v433_v49  ;;  %366 = vrot.lane.b32.xlu1 %v3626_v45, %s3433_s15  ;;  %v589_v61 = vrot.slane %v217_v50, 1  ;;  %v592_v11 = vrot.slane %v220_v4, 1  ;;  %3103 = vmatpush3.bf16.msra.mxu1 %v3387_v38  ;;  %v403_v13 = vrot.slane %v3693_v37, 7 }
  0x8b   :  { %583 = vst.msk [vmem:[#allocation3 + $0xb8] sm:$0xff] %vm34_vm0, %v3877_v6  ;;  %339 = vst.msk [vmem:[#allocation3 + $0xf0] sm:$0xff] %vm34_vm0, %v3900_v22  ;;  %440 = vrot.lane.b32.xlu0 %v3830_v33, %s3433_s15  ;;  %v347_v40 = vsel %vm260_vm2, %v345_v10, %v346_v27  ;;  %v350_v41 = vsel %vm260_vm2, %v348_v21, %v349_v28 }
  0x8c   :  { %412 = vst.msk [vmem:[#allocation3 + $0xa8] sm:$0xff] %vm34_vm0, %v3900_v22  ;;  %653 = vst.msk [vmem:[#allocation3 + $0xc0] sm:$0xff] %vm34_vm0, %v3910_v29  ;;  %v353_v45 = vpack.c.bf16 %v350_v41, %v347_v40  ;;  %v591_v43 = vsel %vm5187_vm3, %v589_v61, %v590_v24  ;;  %v594_v46 = vsel %vm5187_vm3, %v592_v11, %v593_v23 }
  0x8d   :  { %585 = vst.msk [vmem:[#allocation3 + $0x108] sm:$0xff] %vm34_vm0, %v3910_v29  ;;  %472 = vst.msk [vmem:[#allocation3 + $0x128] sm:$0xff] %vm34_vm0, %v3912_v30  ;;  %v597_v33 = vpack.c.bf16 %v594_v46, %v591_v43 }
  0x8e   :  { %368 = vrot.lane.b32.xlu1 %v3855_v57, %s3433_s15  ;;  %414 = vst.msk [vmem:[#allocation3 + $0xf8] sm:$0xff] %vm34_vm0, %v353_v45  ;;  %v402_v57 = vrot.slane %v225_v42, 7 }
  0x8f   :  { %370 = vrot.lane.b32.xlu0 %v3636_v52, %s3433_s15  ;;  %655 = vst.msk [vmem:[#allocation3 + $0x110] sm:$0xff] %vm34_vm0, %v597_v33  ;;  %v399_v52 = vrot.slane %v222_v36, 7  ;;  %v661_v46 = vld [vmem:[#allocation3 + $0x20] sm:$0xff] }
  0x90   :  { %v404_v59 = vsel %vm260_vm2, %v402_v57, %v403_v13  ;;  %v676_v13 = vld [vmem:[#allocation3 + $0x98] sm:$0xff] }
  0x91   :  { %v658_v48 = vld [vmem:[#allocation3 + $0x8] sm:$0xff]  ;;  %v401_v58 = vsel %vm260_vm2, %v399_v52, %v400_v54 }
  0x92   :  { %1048 = vmatprep.mubr.bf16.mxu0 %v658_v48  ;;  %606 = vrot.lane.b32.xlu1 %v3648_v56, %s3433_s15  ;;  %v3388_v56 = vld [vmem:[%s5176_s1 + $0x110] sm:$0xff]   ;;  %v666_v48 = vld [vmem:[#allocation3 + $0x48] sm:$0xff] }
  0x93   :  { %608 = vrot.lane.b32.xlu0 %v3861_v0, %s3433_s15  ;;  %v681_v36 = vld [vmem:[#allocation3 + $0xc0] sm:$0xff]  ;;  %v686_v52 = vld [vmem:[#allocation3 + $0xe8] sm:$0xff] }
  0x96   :  { %442 = vrot.lane.b32.xlu1 %v3642_v55, %s3433_s15  ;;  %v3389_v55 = vld [vmem:[%s5176_s1 + $0x118] sm:$0xff]   ;;  %v691_v57 = vld [vmem:[#allocation3 + $0x110] sm:$0xff] }
  0x97   :  { %444 = vrot.lane.b32.xlu0 %v3863_v1, %s3433_s15 }
  0x9a   :  { %372 = vrot.lane.b32.xlu1 %v3900_v22, %s3433_s15 }
  0x9b   :  { %v435_v25 = vpop.permute.xlu0 %434  ;;  %374 = vrot.lane.b32.xlu0 %v3659_v8, %s3433_s15 }
  0x9c   :  { %457 = vst.msk [vmem:[#allocation3 + $0x30] sm:$0xff] %vm5186_vm4, %v435_v25 }
  0x9e   :  { %v363_v63 = vpop.permute.xlu1 %362  ;;  %610 = vrot.lane.b32.xlu1 %v3667_v12, %s3433_s15 }
  0x9f   :  { %387 = vst.msk [vmem:[#allocation3] sm:$0xff] %vm5186_vm4, %v363_v63  ;;  %612 = vrot.lane.b32.xlu0 %v3877_v6, %s3433_s15 }
  0xa2   :  { %446 = vrot.lane.b32.xlu1 %v3669_v15, %s3433_s15 }
  0xa3   :  { %v663_v14 = vld [vmem:[#allocation3 + $0x30] sm:$0xff]  ;;  %614 = vrot.lane.b32.xlu0 %v3681_v31, %s3433_s15 }
  0xa6   :  { %v657_v47 = vld [vmem:[#allocation3] sm:$0xff]  ;;  %376 = vrot.lane.b32.xlu1 %v353_v45, %s3433_s15 }
  0xa7   :  { %1049 = vmatmul.mubr.bf16.vlgmr.msra.gmra.mrb[0].mxu0 %v657_v47  ;;  %618 = vrot.lane.b32.xlu0 %v3691_v35, %s3433_s15 }
  0xa8   :  { %3305 = vmatpush3.bf16.msra.mxu0 %v3782_v26  ;;  %1056 = vmatprep.mubr.bf16.mxu0 %v663_v14  ;;  %v407_v26 = vpack.c.bf16 %v404_v59, %v401_v58  ;;  %v696_v58 = vld [vmem:[#allocation3 + $0x138] sm:$0xff] }
  0xa9   :  { %3306 = vmatprep.subr.bf16.mxu0 %v3385_v53 }
  0xaa   :  { %415 = vst.msk [vmem:[#allocation3 + $0x120] sm:$0xff] %vm34_vm0, %v407_v26  ;;  %616 = vrot.lane.b32.xlu1 %v3910_v29, %s3433_s15 }
  0xab   :  { %620 = vrot.lane.b32.xlu0 %v597_v33, %s3433_s15 }
  0xac   :  { %3307 = vmatpush3.bf16.msra.mxu0 %v3385_v53  ;;  %v671_v53 = vld [vmem:[#allocation3 + $0x70] sm:$0xff] }
  0xad   :  { %3308 = vmatprep.subr.bf16.mxu0 %v3388_v56 }
  0xae   :  { %476 = vrot.lane.b32.xlu1 %v3912_v30, %s3433_s15 }
  0xb0   :  { %3309 = vmatpush3.bf16.msra.mxu0 %v3388_v56 }
  0xb1   :  { %3310 = vmatprep.subr.bf16.mxu0 %v3389_v55 }
  0xb2   :  { %478 = vrot.lane.b32.xlu1 %v473_v39, %s3433_s15 }
  0xb4   :  { %3311 = vmatpush3.bf16.msra.mxu0 %v3389_v55 }
  0xf5   :  { %v437_v8 = vpop.permute.xlu0 %436 }
  0xf6   :  { %458 = vst.msk [vmem:[#allocation3 + $0x58] sm:$0xff] %vm5186_vm4, %v437_v8  ;;  %482 = vst.msk [vmem:[#allocation3 + $0x10] sm:$0xff] %vm5186_vm4, %v437_v8 }
  0xf8   :  { %v365_v12 = vpop.permute.xlu1 %364 }
  0xf9   :  { %388 = vst.msk [vmem:[#allocation3 + $0x28] sm:$0xff] %vm5186_vm4, %v365_v12  ;;  %v439_v15 = vpop.permute.xlu0 %438 }
  0xfa   :  { %459 = vst.msk [vmem:[#allocation3 + $0x80] sm:$0xff] %vm5186_vm4, %v439_v15  ;;  %483 = vst.msk [vmem:[#allocation3 + $0x38] sm:$0xff] %vm5186_vm4, %v439_v15 }
  0xfc   :  { %v367_v31 = vpop.permute.xlu1 %366 }
  0xfd   :  { %389 = vst.msk [vmem:[#allocation3 + $0x50] sm:$0xff] %vm5186_vm4, %v367_v31  ;;  %v441_v35 = vpop.permute.xlu0 %440  ;;  %v668_v44 = vld [vmem:[#allocation3 + $0x58] sm:$0xff]  ;;  %v659_v3 = vld [vmem:[#allocation3 + $0x10] sm:$0xff] }
  0xfe   :  { %460 = vst.msk [vmem:[#allocation3 + $0xa8] sm:$0xff] %vm5186_vm4, %v441_v35  ;;  %484 = vst.msk [vmem:[#allocation3 + $0x60] sm:$0xff] %vm5186_vm4, %v441_v35 }
 0x100   :  { %v369_v34 = vpop.permute.xlu1 %368  ;;  %v662_v37 = vld [vmem:[#allocation3 + $0x28] sm:$0xff] }
 0x101   :  { %390 = vst.msk [vmem:[#allocation3 + $0x78] sm:$0xff] %vm5186_vm4, %v369_v34  ;;  %v371_v39 = vpop.permute.xlu0 %370  ;;  %1057 = vmatmul.mubr.bf16.gmra.mrb[4].mxu0 %v662_v37  ;;  %v673_v63 = vld [vmem:[#allocation3 + $0x80] sm:$0xff]  ;;  %v664_v20 = vld [vmem:[#allocation3 + $0x38] sm:$0xff] }
 0x102   :  { %391 = vst.msk [vmem:[#allocation3 + $0xa0] sm:$0xff] %vm5186_vm4, %v371_v39  ;;  %1064 = vmatprep.mubr.bf16.mxu0 %v668_v44 }
 0x104   :  { %v607_v60 = vpop.permute.xlu1 %606  ;;  %v667_v49 = vld [vmem:[#allocation3 + $0x50] sm:$0xff] }
 0x105   :  { %630 = vst.msk [vmem:[#allocation3 + $0x18] sm:$0xff] %vm5186_vm4, %v607_v60  ;;  %v609_v62 = vpop.permute.xlu0 %608  ;;  %v678_v18 = vld [vmem:[#allocation3 + $0xa8] sm:$0xff]  ;;  %v669_v23 = vld [vmem:[#allocation3 + $0x60] sm:$0xff] }
 0x106   :  { %631 = vst.msk [vmem:[#allocation3 + $0x40] sm:$0xff] %vm5186_vm4, %v609_v62 }
 0x108   :  { %v443_v0 = vpop.permute.xlu1 %442  ;;  %v672_v16 = vld [vmem:[#allocation3 + $0x78] sm:$0xff] }
 0x109   :  { %461 = vst.msk [vmem:[#allocation3 + $0xd0] sm:$0xff] %vm5186_vm4, %v443_v0  ;;  %485 = vst.msk [vmem:[#allocation3 + $0x88] sm:$0xff] %vm5186_vm4, %v443_v0  ;;  %v445_v1 = vpop.permute.xlu0 %444  ;;  %1065 = vmatmul.mubr.bf16.gmra.mrb[8].mxu0 %v667_v49  ;;  %v677_v24 = vld [vmem:[#allocation3 + $0xa0] sm:$0xff] }
 0x10a   :  { %462 = vst.msk [vmem:[#allocation3 + $0xf8] sm:$0xff] %vm5186_vm4, %v445_v1  ;;  %486 = vst.msk [vmem:[#allocation3 + $0xb0] sm:$0xff] %vm5186_vm4, %v445_v1  ;;  %1072 = vmatprep.mubr.bf16.mxu0 %v673_v63  ;;  %v4032_v0 = vld [vmem:[%s5177_s2] ss:$0 sm:$0xff] }
 0x10c   :  { %v373_v2 = vpop.permute.xlu1 %372  ;;  %v660_v7 = vld [vmem:[#allocation3 + $0x18] sm:$0xff] }
 0x10d   :  { %392 = vst.msk [vmem:[#allocation3 + $0xc8] sm:$0xff] %vm5186_vm4, %v373_v2  ;;  %v375_v9 = vpop.permute.xlu0 %374  ;;  %1145 = vmatprep.mubr.bf16.mxu1 %v660_v7  ;;  %v665_v6 = vld [vmem:[#allocation3 + $0x40] sm:$0xff] }
 0x10e   :  { %393 = vst.msk [vmem:[#allocation3 + $0xf0] sm:$0xff] %vm5186_vm4, %v375_v9  ;;  %1146 = vmatmul.mubr.bf16.vlgmr.msra.gmra.mrb[0].mxu1 %v659_v3 }
 0x10f   :  { %1153 = vmatprep.mubr.bf16.mxu1 %v665_v6 }
 0x110   :  { %v611_v10 = vpop.permute.xlu1 %610  ;;  %v683_v22 = vld [vmem:[#allocation3 + $0xd0] sm:$0xff]  ;;  %v674_v11 = vld [vmem:[#allocation3 + $0x88] sm:$0xff] }
 0x111   :  { %632 = vst.msk [vmem:[#allocation3 + $0x68] sm:$0xff] %vm5186_vm4, %v611_v10  ;;  %v613_v17 = vpop.permute.xlu0 %612  ;;  %1073 = vmatmul.mubr.bf16.gmra.mrb[12].mxu0 %v672_v16  ;;  %v688_v30 = vld [vmem:[#allocation3 + $0xf8] sm:$0xff]  ;;  %v679_v41 = vld [vmem:[#allocation3 + $0xb0] sm:$0xff] }
 0x112   :  { %633 = vst.msk [vmem:[#allocation3 + $0x90] sm:$0xff] %vm5186_vm4, %v613_v17  ;;  %1080 = vmatprep.mubr.bf16.mxu0 %v678_v18 }
 0x114   :  { %v447_v19 = vpop.permute.xlu1 %446  ;;  %v682_v28 = vld [vmem:[#allocation3 + $0xc8] sm:$0xff] }
 0x115   :  { %463 = vst.msk [vmem:[#allocation3 + $0x120] sm:$0xff] %vm5186_vm4, %v447_v19  ;;  %487 = vst.msk [vmem:[#allocation3 + $0xd8] sm:$0xff] %vm5186_vm4, %v447_v19  ;;  %v615_v21 = vpop.permute.xlu0 %614  ;;  %v687_v38 = vld [vmem:[#allocation3 + $0xf0] sm:$0xff] }
 0x116   :  { %1154 = vmatmul.mubr.bf16.gmra.mrb[4].mxu1 %v664_v20  ;;  %634 = vst.msk [vmem:[#allocation3 + $0xb8] sm:$0xff] %vm5186_vm4, %v615_v21 }
 0x118   :  { %v377_v50 = vpop.permute.xlu1 %376  ;;  %v670_v4 = vld [vmem:[#allocation3 + $0x68] sm:$0xff] }
 0x119   :  { %394 = vst.msk [vmem:[#allocation3 + $0x118] sm:$0xff] %vm5186_vm4, %v377_v50  ;;  %1081 = vmatmul.mubr.bf16.gmra.mrb[16].mxu0 %v677_v24  ;;  %1161 = vmatprep.mubr.bf16.mxu1 %v670_v4  ;;  %v619_v51 = vpop.permute.xlu0 %618  ;;  %v675_v27 = vld [vmem:[#allocation3 + $0x90] sm:$0xff] }
 0x11a   :  { %1088 = vmatprep.mubr.bf16.mxu0 %v683_v22  ;;  %636 = vst.msk [vmem:[#allocation3 + $0x108] sm:$0xff] %vm5186_vm4, %v619_v51 }
 0x11c   :  { %v617_v5 = vpop.permute.xlu1 %616  ;;  %v693_v40 = vld [vmem:[#allocation3 + $0x120] sm:$0xff]  ;;  %v684_v47 = vld [vmem:[#allocation3 + $0xd8] sm:$0xff] }
 0x11d   :  { %635 = vst.msk [vmem:[#allocation3 + $0xe0] sm:$0xff] %vm5186_vm4, %v617_v5  ;;  %v621_v25 = vpop.permute.xlu0 %620  ;;  %v680_v32 = vld [vmem:[#allocation3 + $0xb8] sm:$0xff] }
 0x11e   :  { %1162 = vmatmul.mubr.bf16.gmra.mrb[8].mxu1 %v669_v23  ;;  %637 = vst.msk [vmem:[#allocation3 + $0x130] sm:$0xff] %vm5186_vm4, %v621_v25 }
 0x11f   :  { %1169 = vmatprep.mubr.bf16.mxu1 %v675_v27 }
 0x120   :  { %v477_v29 = vpop.permute.xlu1 %476  ;;  %v692_v43 = vld [vmem:[#allocation3 + $0x118] sm:$0xff] }
 0x121   :  { %1089 = vmatmul.mubr.bf16.gmra.mrb[20].mxu0 %v682_v28  ;;  %488 = vst.msk [vmem:[#allocation3 + $0x100] sm:$0xff] %vm5186_vm4, %v477_v29  ;;  %v690_v33 = vld [vmem:[#allocation3 + $0x108] sm:$0xff] }
 0x122   :  { %1096 = vmatprep.mubr.bf16.mxu0 %v688_v30 }
 0x124   :  { %v479_v61 = vpop.permute.xlu1 %478  ;;  %v685_v45 = vld [vmem:[#allocation3 + $0xe0] sm:$0xff] }
 0x125   :  { %489 = vst.msk [vmem:[#allocation3 + $0x128] sm:$0xff] %vm5186_vm4, %v479_v61  ;;  %v695_v54 = vld [vmem:[#allocation3 + $0x130] sm:$0xff] }
 0x126   :  { %1170 = vmatmul.mubr.bf16.gmra.mrb[12].mxu1 %v674_v11 }
 0x127   :  { %1177 = vmatprep.mubr.bf16.mxu1 %v680_v32 }
 0x128   :  { %v689_v14 = vld [vmem:[#allocation3 + $0x100] sm:$0xff] }
 0x129   :  { %1097 = vmatmul.mubr.bf16.gmra.mrb[24].mxu0 %v687_v38 }
 0x12a   :  { %1104 = vmatprep.mubr.bf16.mxu0 %v693_v40 }
 0x12c   :  { %v694_v42 = vld [vmem:[#allocation3 + $0x128] sm:$0xff] }
 0x12e   :  { %1178 = vmatmul.mubr.bf16.gmra.mrb[16].mxu1 %v679_v41 }
 0x12f   :  { %1185 = vmatprep.mubr.bf16.mxu1 %v685_v45 }
 0x131   :  { %1105 = vmatmul.mubr.bf16.gmra.mrb[28].mxu0 %v692_v43 }
 0x132   :  { %3312 = vmatprep.mubr.msk.bf16.mxu0 %vm34_vm0, %v661_v46 }
 0x136   :  { %1186 = vmatmul.mubr.bf16.gmra.mrb[20].mxu1 %v684_v47 }
 0x137   :  { %1193 = vmatprep.mubr.bf16.mxu1 %v690_v33 }
 0x139   :  { %3313 = vmatmul.mubr.msk.bf16.vlgmr.msra.gmra.mrb[32].mxu0 %vm34_vm0, %v666_v48 }
 0x13a   :  { %3316 = vmatprep.mubr.msk.bf16.mxu0 %vm34_vm0, %v671_v53 }
 0x13e   :  { %1194 = vmatmul.mubr.bf16.gmra.mrb[24].mxu1 %v689_v14 }
 0x13f   :  { %1201 = vmatprep.mubr.bf16.mxu1 %v695_v54 }
 0x141   :  { %3317 = vmatmul.mubr.msk.bf16.gmra.mrb[36].mxu0 %vm34_vm0, %v676_v13 }
 0x142   :  { %3320 = vmatprep.mubr.msk.bf16.mxu0 %vm34_vm0, %v681_v36 }
 0x146   :  { %1202 = vmatmul.mubr.bf16.gmra.mrb[28].mxu1 %v694_v42 }
 0x149   :  { %3321 = vmatmul.mubr.msk.bf16.gmra.mrb[40].mxu0 %vm34_vm0, %v686_v52 }
 0x14a   :  { %3324 = vmatprep.mubr.msk.bf16.mxu0 %vm34_vm0, %v691_v57 }
 0x151   :  { %3325 = vmatmul.mubr.msk.bf16.gmra.mrb[44].mxu0 %vm34_vm0, %v696_v58 }
 0x17a   :  { %v3040_v59 = vpop.f32.mrb[0].mxu0 }
 0x17b   :  { %v3041_v26 = vpop.f32.mrb[1].mxu0 }
 0x17c   :  { %v3042_v56 = vadd.f32 %v3041_v26, %v3040_v59  ;;  %v3043_v55 = vpop.f32.mrb[2].mxu0 }
 0x17d   :  { %v3044_v8 = vpop.f32.mrb[3].mxu0 }
 0x17e   :  { %v3045_v12 = vadd.f32 %v3044_v8, %v3043_v55  ;;  %v1051_v9 = vadd.f32 %v3042_v56, %v4032_v0 }
 0x180   :  { %v1054_v17 = vadd.f32 %v3045_v12, %v4032_v0 }
 0x1d4   :  { %v3046_v15 = vpop.f32.mrb[4].mxu0 }
 0x1d5   :  { %v3047_v31 = vpop.f32.mrb[5].mxu0 }
 0x1d6   :  { %v3048_v35 = vadd.f32 %v3047_v31, %v3046_v15  ;;  %v3049_v34 = vpop.f32.mrb[6].mxu0 }
 0x1d7   :  { %v3050_v37 = vpop.f32.mrb[7].mxu0 }
 0x1d8   :  { %v3051_v39 = vadd.f32 %v3050_v37, %v3049_v34  ;;  %v1059_v23 = vadd.f32 %v3048_v35, %v4032_v0 }
 0x1da   :  { %v1062_v30 = vadd.f32 %v3051_v39, %v4032_v0 }
 0x1dc   :  { %v3052_v44 = vpop.f32.mrb[8].mxu0 }
 0x1dd   :  { %v3053_v60 = vpop.f32.mrb[9].mxu0 }
 0x1de   :  { %v3054_v62 = vadd.f32 %v3053_v60, %v3052_v44  ;;  %v3055_v49 = vpop.f32.mrb[10].mxu0 }
 0x1df   :  { %v3056_v63 = vpop.f32.mrb[11].mxu0 }
 0x1e0   :  { %v3057_v1 = vadd.f32 %v3056_v63, %v3055_v49  ;;  %v1067_v47 = vadd.f32 %v3054_v62, %v4032_v0 }
 0x1e1   :  { %v3104_v2 = vpop.f32.mrb[0].mxu1 }
 0x1e2   :  { %v3105_v7 = vpop.f32.mrb[1].mxu1  ;;  %v1070_v13 = vadd.f32 %v3057_v1, %v4032_v0 }
 0x1e3   :  { %v3106_v3 = vadd.f32 %v3105_v7, %v3104_v2  ;;  %v3107_v6 = vpop.f32.mrb[2].mxu1 }
 0x1e4   :  { %v3058_v10 = vpop.f32.mrb[12].mxu0  ;;  %v3108_v16 = vpop.f32.mrb[3].mxu1 }
 0x1e5   :  { %v3109_v18 = vadd.f32 %v3108_v16, %v3107_v6  ;;  %v3059_v19 = vpop.f32.mrb[13].mxu0  ;;  %v4036_v20 = vadd.f32 %v3106_v3, %v1051_v9 }
 0x1e6   :  { %v3060_v21 = vadd.f32 %v3059_v19, %v3058_v10  ;;  %v3061_v24 = vpop.f32.mrb[14].mxu0 }
 0x1e7   :  { %v3062_v22 = vpop.f32.mrb[15].mxu0  ;;  %v4038_v50 = vadd.f32 %v3109_v18, %v1054_v17 }
 0x1e8   :  { %v3063_v4 = vadd.f32 %v3062_v22, %v3061_v24  ;;  %v1075_v12 = vadd.f32 %v3060_v21, %v4032_v0 }
 0x1e9   :  { %v3110_v51 = vpop.f32.mrb[4].mxu1 }
 0x1ea   :  { %v3111_v5 = vpop.f32.mrb[5].mxu1  ;;  %v1078_v37 = vadd.f32 %v3063_v4, %v4032_v0 }
 0x1eb   :  { %v3112_v25 = vadd.f32 %v3111_v5, %v3110_v51  ;;  %v3113_v27 = vpop.f32.mrb[6].mxu1 }
 0x1ec   :  { %v3064_v28 = vpop.f32.mrb[16].mxu0  ;;  %v3114_v29 = vpop.f32.mrb[7].mxu1 }
 0x1ed   :  { %v3115_v32 = vadd.f32 %v3114_v29, %v3113_v27  ;;  %v3065_v61 = vpop.f32.mrb[17].mxu0  ;;  %v4042_v11 = vadd.f32 %v3112_v25, %v1059_v23 }
 0x1ee   :  { %v3066_v38 = vadd.f32 %v3065_v61, %v3064_v28  ;;  %v3067_v40 = vpop.f32.mrb[18].mxu0 }
 0x1ef   :  { %v3068_v41 = vpop.f32.mrb[19].mxu0  ;;  %v4044_v45 = vadd.f32 %v3115_v32, %v1062_v30 }
 0x1f0   :  { %v3069_v43 = vadd.f32 %v3068_v41, %v3067_v40  ;;  %v1083_v3 = vadd.f32 %v3066_v38, %v4032_v0 }
 0x1f1   :  { %v3116_v46 = vpop.f32.mrb[8].mxu1 }
 0x1f2   :  { %v3117_v33 = vpop.f32.mrb[9].mxu1  ;;  %v1086_v18 = vadd.f32 %v3069_v43, %v4032_v0 }
 0x1f3   :  { %v3118_v48 = vadd.f32 %v3117_v33, %v3116_v46  ;;  %v3119_v53 = vpop.f32.mrb[10].mxu1 }
 0x1f4   :  { %v3070_v14 = vpop.f32.mrb[20].mxu0  ;;  %v3120_v54 = vpop.f32.mrb[11].mxu1 }
 0x1f5   :  { %v3121_v36 = vadd.f32 %v3120_v54, %v3119_v53  ;;  %v3071_v42 = vpop.f32.mrb[21].mxu0  ;;  %v4048_v52 = vadd.f32 %v3118_v48, %v1067_v47 }
 0x1f6   :  { %v3072_v57 = vadd.f32 %v3071_v42, %v3070_v14  ;;  %v3073_v58 = vpop.f32.mrb[22].mxu0 }
 0x1f7   :  { %v3074_v59 = vpop.f32.mrb[23].mxu0  ;;  %v4050_v26 = vadd.f32 %v3121_v36, %v1070_v13 }
 0x1f8   :  { %v3075_v56 = vadd.f32 %v3074_v59, %v3073_v58  ;;  %v1091_v28 = vadd.f32 %v3072_v57, %v4032_v0 }
 0x1f9   :  { %v3122_v55 = vpop.f32.mrb[12].mxu1 }
 0x1fa   :  { %v3123_v8 = vpop.f32.mrb[13].mxu1  ;;  %v1094_v38 = vadd.f32 %v3075_v56, %v4032_v0 }
 0x1fb   :  { %v3124_v15 = vadd.f32 %v3123_v8, %v3122_v55  ;;  %v3125_v31 = vpop.f32.mrb[14].mxu1 }
 0x1fc   :  { %v3076_v35 = vpop.f32.mrb[24].mxu0  ;;  %v3126_v34 = vpop.f32.mrb[15].mxu1 }
 0x1fd   :  { %v3127_v39 = vadd.f32 %v3126_v34, %v3125_v31  ;;  %v3077_v44 = vpop.f32.mrb[25].mxu0  ;;  %v1172_v60 = vadd.f32 %v3124_v15, %v1075_v12 }
 0x1fe   :  { %v3078_v62 = vadd.f32 %v3077_v44, %v3076_v35  ;;  %v3079_v49 = vpop.f32.mrb[26].mxu0 }
 0x1ff   :  { %v3080_v63 = vpop.f32.mrb[27].mxu0  ;;  %v1175_v1 = vadd.f32 %v3127_v39, %v1078_v37 }
 0x200   :  { %v3081_v2 = vadd.f32 %v3080_v63, %v3079_v49 }
 0x201   :  { %v3128_v7 = vpop.f32.mrb[16].mxu1 }
 0x202   :  { %v3129_v9 = vpop.f32.mrb[17].mxu1 }
 0x203   :  { %v3130_v6 = vadd.f32 %v3129_v9, %v3128_v7  ;;  %v3131_v10 = vpop.f32.mrb[18].mxu1  ;;  %v4096_v7 = vld [vmem:[#allocation2 + $0x8] sm:$0xff]  ;;  %v4098_v9 = vld [vmem:[#allocation2 + $0x20] sm:$0xff] }
 0x204   :  { %v3082_v16 = vpop.f32.mrb[28].mxu0  ;;  %v3132_v17 = vpop.f32.mrb[19].mxu1 }
 0x205   :  { %v3133_v19 = vadd.f32 %v3132_v17, %v3131_v10  ;;  %v3083_v21 = vpop.f32.mrb[29].mxu0  ;;  %v4056_v24 = vadd.f32 %v3130_v6, %v1083_v3 }
 0x206   :  { %v3084_v22 = vadd.f32 %v3083_v21, %v3082_v16  ;;  %v3085_v4 = vpop.f32.mrb[30].mxu0 }
 0x207   :  { %v3086_v51 = vpop.f32.mrb[31].mxu0  ;;  %v4058_v5 = vadd.f32 %v3133_v19, %v1086_v18 }
 0x208   :  { %v3087_v23 = vadd.f32 %v3086_v51, %v3085_v4  ;;  %v1107_v16 = vadd.f32 %v3084_v22, %v4032_v0 }
 0x209   :  { %v3134_v25 = vpop.f32.mrb[20].mxu1 }
 0x20a   :  { %v3135_v27 = vpop.f32.mrb[21].mxu1 }
 0x20b   :  { %v3136_v29 = vadd.f32 %v3135_v27, %v3134_v25  ;;  %v3137_v30 = vpop.f32.mrb[22].mxu1 }
 0x20c   :  { %v3138_v32 = vpop.f32.mrb[23].mxu1  ;;  %v3314_v61 = vpop.f32.mrb[32].mxu0 }
 0x20d   :  { %v3139_v40 = vadd.f32 %v3138_v32, %v3137_v30  ;;  %v4063_v41 = vadd.f32 %v3314_v61, %v4042_v11  ;;  %v1244_v43 = vpop.f32.mrb[33].mxu0  ;;  %v1188_v46 = vadd.f32 %v3136_v29, %v1091_v28 }
 0x20e   :  { %v4066_v33 = vadd.f32 %v1244_v43, %v4036_v20  ;;  %v3315_v47 = vpop.f32.mrb[34].mxu0  ;;  %v1099_v20 = vadd.f32 %v3078_v62, %v4032_v0 }
 0x20f   :  { %v4069_v48 = vadd.f32 %v3315_v47, %v4044_v45  ;;  %v1247_v53 = vpop.f32.mrb[35].mxu0  ;;  %v1191_v14 = vadd.f32 %v3139_v40, %v1094_v38  ;;  %v1102_v45 = vadd.f32 %v3081_v2, %v4032_v0  ;;  %v1312_v56 = vsel %vm34_vm0, %v4063_v41, 0.0 }
 0x210   :  { %v4072_v54 = vadd.f32 %v1247_v53, %v4038_v50  ;;  %v1309_v36 = vsel %vm34_vm0, %v4066_v33, 0.0 }
 0x211   :  { %v3140_v13 = vpop.f32.mrb[24].mxu1  ;;  %v1314_v34 = vsel %vm34_vm0, %v4069_v48, 0.0 }
 0x212   :  { %v1310_v11 = vsel %vm34_vm0, %v4072_v54, 0.0  ;;  %v3141_v42 = vpop.f32.mrb[25].mxu1 }
 0x213   :  { %v1311_v57 = vadd.f32 %v1310_v11, %v1309_v36  ;;  %v3142_v58 = vadd.f32 %v3141_v42, %v3140_v13  ;;  %v3143_v59 = vpop.f32.mrb[26].mxu1 }
 0x214   :  { %v3144_v50 = vpop.f32.mrb[27].mxu1  ;;  %v3318_v55 = vpop.f32.mrb[36].mxu0 }
 0x215   :  { %v1313_v8 = vadd.f32 %v1312_v56, %v1311_v57  ;;  %v3145_v12 = vadd.f32 %v3144_v50, %v3143_v59  ;;  %v4082_v15 = vadd.f32 %v3318_v55, %v1172_v60  ;;  %v1260_v31 = vpop.f32.mrb[37].mxu0  ;;  %v1196_v35 = vadd.f32 %v3142_v58, %v1099_v20 }
 0x216   :  { %v4087_v37 = vadd.f32 %v1260_v31, %v4048_v52  ;;  %v3319_v39 = vpop.f32.mrb[38].mxu0 }
 0x217   :  { %v1315_v44 = vadd.f32 %v1314_v34, %v1313_v8  ;;  %v4089_v62 = vadd.f32 %v3319_v39, %v1175_v1  ;;  %v1263_v49 = vpop.f32.mrb[39].mxu0  ;;  %v1199_v63 = vadd.f32 %v3145_v12, %v1102_v45  ;;  %v1777_v1 = vpack.c.bf16 %v4098_v9, %v4096_v7 }
 0x218   :  { %v1316_v2 = vsel %vm34_vm0, %v4087_v37, 0.0  ;;  %v4094_v60 = vadd.f32 %v1263_v49, %v4050_v26  ;;  %v1110_v26 = vadd.f32 %v3087_v23, %v4032_v0  ;;  %v1320_v21 = vsel %vm34_vm0, %v4082_v15, 0.0 }
 0x219   :  { %v1317_v3 = vadd.f32 %v1316_v2, %v1315_v44  ;;  %v3146_v6 = vpop.f32.mrb[28].mxu1  ;;  %1793 = vrot.lane.b32.xlu0 %v1777_v1, %s3433_s15  ;;  %v1322_v22 = vsel %vm34_vm0, %v4089_v62, 0.0 }
 0x21a   :  { %v1318_v52 = vsel %vm34_vm0, %v4094_v60, 0.0  ;;  %v3147_v10 = vpop.f32.mrb[29].mxu1 }
 0x21b   :  { %v1319_v17 = vadd.f32 %v1318_v52, %v1317_v3  ;;  %v3148_v18 = vadd.f32 %v3147_v10, %v3146_v6  ;;  %v3149_v19 = vpop.f32.mrb[30].mxu1 }
 0x21c   :  { %v3150_v4 = vpop.f32.mrb[31].mxu1  ;;  %v3322_v51 = vpop.f32.mrb[40].mxu0 }
 0x21d   :  { %v1321_v25 = vadd.f32 %v1320_v21, %v1319_v17  ;;  %v3151_v27 = vadd.f32 %v3150_v4, %v3149_v19  ;;  %v1285_v28 = vadd.f32 %v3322_v51, %v1188_v46  ;;  %v1276_v29 = vpop.f32.mrb[41].mxu0  ;;  %v1204_v30 = vadd.f32 %v3148_v18, %v1107_v16 }
 0x21e   :  { %v1277_v32 = vadd.f32 %v1276_v29, %v4056_v24  ;;  %v3323_v61 = vpop.f32.mrb[42].mxu0 }
 0x21f   :  { %v1323_v38 = vadd.f32 %v1322_v22, %v1321_v25  ;;  %v1288_v0 = vadd.f32 %v3323_v61, %v1191_v14  ;;  %v1279_v23 = vpop.f32.mrb[43].mxu0  ;;  %v1207_v40 = vadd.f32 %v3151_v27, %v1110_v26  ;;  %v1328_v36 = vsel %vm34_vm0, %v1285_v28, 0.0 }
 0x220   :  { %v1324_v43 = vsel %vm34_vm0, %v1277_v32, 0.0  ;;  %v1280_v47 = vadd.f32 %v1279_v23, %v4058_v5 }
 0x221   :  { %v1325_v53 = vadd.f32 %v1324_v43, %v1323_v38  ;;  %v1330_v24 = vsel %vm34_vm0, %v1288_v0, 0.0 }
 0x222   :  { %v1326_v13 = vsel %vm34_vm0, %v1280_v47, 0.0 }
 0x223   :  { %v1327_v46 = vadd.f32 %v1326_v13, %v1325_v53 }
 0x224   :  { %v3326_v11 = vpop.f32.mrb[44].mxu0 }
 0x225   :  { %v1329_v42 = vadd.f32 %v1328_v36, %v1327_v46  ;;  %v1301_v20 = vadd.f32 %v3326_v11, %v1204_v30  ;;  %v1292_v57 = vpop.f32.mrb[45].mxu0 }
 0x226   :  { %v1293_v58 = vadd.f32 %v1292_v57, %v1196_v35  ;;  %v3327_v14 = vpop.f32.mrb[46].mxu0 }
 0x227   :  { %v1331_v59 = vadd.f32 %v1330_v24, %v1329_v42  ;;  %v1304_v45 = vadd.f32 %v3327_v14, %v1207_v40  ;;  %v1295_v56 = vpop.f32.mrb[47].mxu0  ;;  %v1336_v31 = vsel %vm34_vm0, %v1301_v20, 0.0  ;;  %v4189_v24 = vld [vmem:[#allocation2 + $0x1b8] sm:$0xff]  ;;  %v4191_v14 = vld [vmem:[#allocation2 + $0x1d0] sm:$0xff] }
 0x228   :  { %v1332_v50 = vsel %vm34_vm0, %v1293_v58, 0.0  ;;  %v1296_v5 = vadd.f32 %v1295_v56, %v1199_v63  ;;  %5192 = vst [vmem:[#allocation5_spill] sm:$0xff] %v4189_v24  ;;  %5193 = vst [vmem:[#allocation6_spill] sm:$0xff] %v4191_v14  ;;  %v3390_v56 = vld [vmem:[%s5178_s6 + $0x40] sm:$0xff]  }
 0x229   :  { %v1333_v55 = vadd.f32 %v1332_v50, %v1331_v59  ;;  %v1338_v39 = vsel %vm34_vm0, %v1304_v45, 0.0  ;;  %3164 = vmatprep.subr.bf16.mxu1 %v3390_v56 }
 0x22a   :  { %v1334_v8 = vsel %vm34_vm0, %v1296_v5, 0.0 }
 0x22b   :  { %v1335_v12 = vadd.f32 %v1334_v8, %v1333_v55  ;;  %v3391_v8 = vld [vmem:[%s5178_s6] sm:$0xff]  }
 0x22c   :  { %3165 = vmatpush3.bf16.msra.mxu1 %v3391_v8 }
 0x22d   :  { %v1337_v34 = vadd.f32 %v1336_v31, %v1335_v12  ;;  %v3392_v31 = vld [vmem:[%s5178_s6 + $0x48] sm:$0xff]  }
 0x22e   :  { %3166 = vmatprep.subr.bf16.mxu1 %v3392_v31 }
 0x22f   :  { %v1339_v44 = vadd.f32 %v1338_v39, %v1337_v34  ;;  %v2000_v34 = vrot.slane %v4189_v24, 1 }
 0x231   :  { %v1340_v49 = vrot.slane %v1339_v44, 4 }
 0x233   :  { %v1341_v2 = vadd.f32 %v1340_v49, %v1339_v44  ;;  %v3393_v44 = vld [vmem:[%s5178_s6 + $0x8] sm:$0xff]  }
 0x234   :  { %3167 = vmatpush3.bf16.msra.mxu1 %v3393_v44 }
 0x235   :  { %v1342_v35 = vrot.slane %v1341_v2, 2 }
 0x237   :  { %v1343_v3 = vadd.f32 %v1342_v35, %v1341_v2  ;;  %v1590_v35 = vld [vmem:[#allocation2 + $0x1d8] sm:$0x1] }
 0x239   :  { %v1344_v6 = vrot.slane %v1343_v3, 1 }
 0x23b   :  { %v1345_v52 = vadd.f32 %v1344_v6, %v1343_v3  ;;  %v2003_v3 = vrot.slane %v4191_v14, 1  ;;  %v3394_v6 = vld [vmem:[%s5178_s6 + $0x50] sm:$0xff]  }
 0x23c   :  { %3168 = vmatprep.subr.bf16.mxu1 %v3394_v6  ;;  %v4272_v6 = vld [vmem:[#allocation2 + $0x48] sm:$0xff] }
 0x23d   :  { %v1347_v10 = vmul.f32 0.0078125, %v1345_v52 }
 0x23f   :  { %v4122_v1 = vsub.f32 %v4066_v33, %v1347_v10  ;;  %v4125_v63 = vsub.f32 %v4072_v54, %v1347_v10  ;;  %v4128_v16 = vsub.f32 %v4063_v41, %v1347_v10  ;;  %v4131_v17 = vsub.f32 %v4069_v48, %v1347_v10 }
 0x240   :  { %v4134_v18 = vsub.f32 %v4087_v37, %v1347_v10  ;;  %v4137_v19 = vsub.f32 %v4094_v60, %v1347_v10  ;;  %v4140_v26 = vsub.f32 %v4082_v15, %v1347_v10  ;;  %v4143_v33 = vsub.f32 %v4089_v62, %v1347_v10 }
 0x241   :  { %v4145_v54 = vsub.f32 %v1277_v32, %v1347_v10  ;;  %v4147_v21 = vsub.f32 %v1280_v47, %v1347_v10  ;;  %v4149_v41 = vsub.f32 %v1285_v28, %v1347_v10  ;;  %v4151_v48 = vsub.f32 %v1288_v0, %v1347_v10 }
 0x242   :  { %v4153_v4 = vsub.f32 %v1293_v58, %v1347_v10  ;;  %v4155_v37 = vsub.f32 %v1296_v5, %v1347_v10  ;;  %v4157_v60 = vsub.f32 %v1301_v20, %v1347_v10  ;;  %v4159_v51 = vsub.f32 %v1304_v45, %v1347_v10  ;;  %v1587_v58 = vld [vmem:[#allocation2 + $0x1c0] sm:$0x1] }
 0x243   :  { %v1364_v15 = vmul.f32 %v4122_v1, %v4122_v1  ;;  %v1365_v62 = vmul.f32 %v4125_v63, %v4125_v63  ;;  %v1366_v25 = vmul.f32 %v4128_v16, %v4128_v16  ;;  %v1367_v27 = vmul.f32 %v4131_v17, %v4131_v17 }
 0x244   :  { %v1368_v22 = vmul.f32 %v4134_v18, %v4134_v18  ;;  %v1369_v38 = vmul.f32 %v4137_v19, %v4137_v19  ;;  %v1370_v40 = vmul.f32 %v4140_v26, %v4140_v26  ;;  %v1371_v53 = vmul.f32 %v4143_v33, %v4143_v33 }
 0x245   :  { %v1380_v28 = vsel %vm34_vm0, %v1364_v15, 0.0  ;;  %v1381_v29 = vsel %vm34_vm0, %v1365_v62, 0.0  ;;  %v1383_v32 = vsel %vm34_vm0, %v1366_v25, 0.0  ;;  %v1385_v0 = vsel %vm34_vm0, %v1367_v27, 0.0 }
 0x246   :  { %v1382_v30 = vadd.f32 %v1381_v29, %v1380_v28  ;;  %v1387_v43 = vsel %vm34_vm0, %v1368_v22, 0.0  ;;  %v1389_v13 = vsel %vm34_vm0, %v1369_v38, 0.0  ;;  %v1372_v46 = vmul.f32 %v4145_v54, %v4145_v54 }
 0x247   :  { %v1373_v11 = vmul.f32 %v4147_v21, %v4147_v21  ;;  %v1391_v42 = vsel %vm34_vm0, %v1370_v40, 0.0  ;;  %v1393_v57 = vsel %vm34_vm0, %v1371_v53, 0.0  ;;  %v1374_v5 = vmul.f32 %v4149_v41, %v4149_v41 }
 0x248   :  { %v1384_v61 = vadd.f32 %v1383_v32, %v1382_v30  ;;  %v1395_v45 = vsel %vm34_vm0, %v1372_v46, 0.0  ;;  %v1375_v39 = vmul.f32 %v4151_v48, %v4151_v48  ;;  %v2001_v49 = vrot.slane %v1587_v58, 1  ;;  %v3395_v30 = vld [vmem:[%s5178_s6 + $0x10] sm:$0xff]  }
 0x249   :  { %v1397_v55 = vsel %vm34_vm0, %v1373_v11, 0.0  ;;  %v1376_v52 = vmul.f32 %v4153_v4, %v4153_v4  ;;  %v1399_v10 = vsel %vm34_vm0, %v1374_v5, 0.0  ;;  %v2004_v62 = vrot.slane %v1590_v35, 1  ;;  %3169 = vmatpush3.bf16.msra.mxu1 %v3395_v30  ;;  %v3402_v5 = vld [vmem:[%s5178_s6 + $0x70] sm:$0xff]   ;;  %v1307_v30 = vld [vmem:[%s5179_s3] sm:$0x1] }
 0x24a   :  { %v1386_v23 = vadd.f32 %v1385_v0, %v1384_v61  ;;  %v2002_v15 = vsel %vm5187_vm3, %v2000_v34, %v2001_v49  ;;  %v1377_v27 = vmul.f32 %v4155_v37, %v4155_v37  ;;  %v1401_v28 = vsel %vm34_vm0, %v1375_v39, 0.0  ;;  %v3396_v61 = vld [vmem:[%s5178_s6 + $0x58] sm:$0xff]  }
 0x24b   :  { %v2005_v29 = vsel %vm5187_vm3, %v2003_v3, %v2004_v62  ;;  %v1378_v38 = vmul.f32 %v4157_v60, %v4157_v60  ;;  %v1403_v0 = vsel %vm34_vm0, %v1376_v52, 0.0  ;;  %v1379_v40 = vmul.f32 %v4159_v51, %v4159_v51  ;;  %3170 = vmatprep.subr.bf16.mxu1 %v3396_v61  ;;  %v4270_v3 = vld [vmem:[#allocation2 + $0x30] sm:$0xff]  ;;  %v4274_v52 = vld [vmem:[#allocation2 + $0x60] sm:$0xff] }
 0x24c   :  { %v1388_v47 = vadd.f32 %v1387_v43, %v1386_v23  ;;  %v2008_v32 = vpack.c.bf16 %v2005_v29, %v2002_v15  ;;  %v1405_v43 = vsel %vm34_vm0, %v1377_v27, 0.0  ;;  %v1422_v49 = vlaneseq  ;;  %v4278_v15 = vld [vmem:[#allocation2 + $0x90] sm:$0xff]  ;;  %v4285_v29 = vld [vmem:[#allocation2 + $0xc0] sm:$0xff] }
 0x24d   :  { %v1407_v46 = vsel %vm34_vm0, %v1378_v38, 0.0 }
 0x24e   :  { %v1390_v36 = vadd.f32 %v1389_v13, %v1388_v47  ;;  %2016 = vst.msk [vmem:[#allocation3 + $0x138] sm:$0xff] %vm34_vm0, %v2008_v32  ;;  %v3397_v47 = vld [vmem:[%s5178_s6 + $0x18] sm:$0xff]   ;;  %v3398_v13 = vld [vmem:[%s5178_s6 + $0x60] sm:$0xff]   ;;  %v4268_v35 = vshrl.u32 %v1422_v49, 7  ;;  %v4334_v49 = vld [vmem:[#allocation2 + $0xd0] sm:$0x1] }
 0x24f   :  { %3171 = vmatpush3.bf16.msra.mxu1 %v3397_v47 }
 0x250   :  { %v1392_v20 = vadd.f32 %v1391_v42, %v1390_v36  ;;  %v3399_v36 = vld [vmem:[%s5178_s6 + $0x20] sm:$0xff]   ;;  %v3400_v42 = vld [vmem:[%s5178_s6 + $0x68] sm:$0xff]   ;;  %3172 = vmatprep.subr.bf16.mxu1 %v3398_v13  ;;  %5194 = vst [vmem:[#allocation7_spill] sm:$0xff] %v4268_v35  ;;  %v5185_v62 = vsub.s32 0, %v4268_v35 }
 0x251   :  { %v4303_v13 = vld [vmem:[#allocation2 + $0x40] sm:$0x1] }
 0x252   :  { %v1394_v59 = vadd.f32 %v1393_v57, %v1392_v20  ;;  %v1409_v20 = vsel %vm34_vm0, %v1379_v40, 0.0  ;;  %v3404_v57 = vld [vmem:[%s5178_s6 + $0xc0] sm:$0xff]  }
 0x253   :  { %3228 = vmatprep.subr.bf16.mxu0 %v3404_v57  ;;  %3173 = vmatpush3.bf16.msra.mxu1 %v3399_v36 }
 0x254   :  { %v1396_v12 = vadd.f32 %v1395_v45, %v1394_v59  ;;  %v3405_v59 = vld [vmem:[%s5178_s6 + $0x80] sm:$0xff]   ;;  %v3401_v45 = vld [vmem:[%s5178_s6 + $0x28] sm:$0xff]   ;;  %3174 = vmatprep.subr.bf16.mxu1 %v3400_v42  ;;  %v4309_v42 = vld [vmem:[#allocation2 + $0x70] sm:$0x1] }
 0x255   :  { %3229 = vmatpush3.bf16.msra.mxu0 %v3405_v59  ;;  %v4315_v59 = vld [vmem:[#allocation2 + $0x120] sm:$0xff] }
 0x256   :  { %v1398_v2 = vadd.f32 %v1397_v55, %v1396_v12  ;;  %v3403_v12 = vld [vmem:[%s5178_s6 + $0x30] sm:$0xff]  }
 0x257   :  { %3175 = vmatpush3.bf16.msra.mxu1 %v3401_v45  ;;  %v4317_v45 = vld [vmem:[#allocation2 + $0x138] sm:$0xff] }
 0x258   :  { %v1400_v25 = vadd.f32 %v1399_v10, %v1398_v2  ;;  %3176 = vmatprep.subr.bf16.mxu1 %v3402_v5  ;;  %v4276_v10 = vld [vmem:[#allocation2 + $0x78] sm:$0xff] }
 0x25a   :  { %v1402_v22 = vadd.f32 %v1401_v28, %v1400_v25  ;;  %v4283_v28 = vld [vmem:[#allocation2 + $0xa8] sm:$0xff] }
 0x25b   :  { %3177 = vmatpush3.bf16.msra.mxu1 %v3403_v12  ;;  %v4323_v12 = vld [vmem:[#allocation2 + $0x168] sm:$0xff] }
 0x25c   :  { %v1404_v23 = vadd.f32 %v1403_v0, %v1402_v22  ;;  %v4294_v0 = vld [vmem:[#allocation2 + $0xd8] sm:$0xff] }
 0x25e   :  { %v1406_v53 = vadd.f32 %v1405_v43, %v1404_v23  ;;  %v4296_v23 = vld [vmem:[#allocation2 + $0xf0] sm:$0xff] }
 0x260   :  { %v1408_v11 = vadd.f32 %v1407_v46, %v1406_v53  ;;  %v4301_v53 = vld [vmem:[#allocation2 + $0x108] sm:$0xff] }
 0x262   :  { %v1410_v58 = vadd.f32 %v1409_v20, %v1408_v11  ;;  %v4307_v11 = vld [vmem:[#allocation2 + $0x58] sm:$0x1] }
 0x264   :  { %v1411_v56 = vrot.slane %v1410_v58, 4 }
 0x266   :  { %v1412_v55 = vadd.f32 %v1411_v56, %v1410_v58  ;;  %v4313_v58 = vld [vmem:[#allocation2 + $0x88] sm:$0x1] }
 0x268   :  { %v1413_v8 = vrot.slane %v1412_v55, 2 }
 0x26a   :  { %v1414_v31 = vadd.f32 %v1413_v8, %v1412_v55  ;;  %v4321_v8 = vld [vmem:[#allocation2 + $0x150] sm:$0xff]  ;;  %v2978_v55 = vld [vmem:[%s5181_s4] ss:$0 sm:$0xff] }
 0x26c   :  { %v1415_v34 = vrot.slane %v1414_v31, 1 }
 0x26e   :  { %v1416_v39 = vadd.f32 %v1415_v34, %v1414_v31  ;;  %v4325_v31 = vld [vmem:[#allocation2 + $0xa0] sm:$0x1] }
 0x270   :  { %v1417_v44 = vmul.f32 0.0078125, %v1416_v39  ;;  %v4330_v39 = vstv %s5180_s5 }
 0x272   :  { %v1418_v2 = vadd.f32 1e-05, %v1417_v44  ;;  %v4332_v44 = vld [vmem:[#allocation2 + $0xb8] sm:$0x1] }
 0x274   :  { %3426 = vrsqrt.f32 %v1418_v2  ;;  %v4336_v2 = vld [vmem:[#allocation2 + $0xe8] sm:$0x1] }
 0x275   :  { %5195 = vst [vmem:[#allocation8_spill] sm:$0xff] %v4336_v2  ;;  %v4406_v2 = vld [vmem:[#allocation2 + $0x118] sm:$0x1] }
 0x27e   :  { %v3427_v56 = vpop.eup %3426 }
 0x27f   :  { %v1420_v34 = vmul.f32 %v3427_v56, %v1307_v30 }
 0x281   :  { %v1425_v30 = vrot.slane %v1420_v34, %v5185_v62 }
 0x283   :  { %v1427_v22 = vmul.f32 %v1425_v30, %v4122_v1  ;;  %v1428_v5 = vmul.f32 %v1425_v30, %v4125_v63  ;;  %v1429_v34 = vmul.f32 %v1425_v30, %v4128_v16  ;;  %v1430_v62 = vmul.f32 %v1425_v30, %v4131_v17 }
 0x284   :  { %v1431_v57 = vmul.f32 %v1425_v30, %v4134_v18  ;;  %v1432_v20 = vmul.f32 %v1425_v30, %v4137_v19  ;;  %v1433_v50 = vmul.f32 %v1425_v30, %v4140_v26  ;;  %v1434_v32 = vmul.f32 %v1425_v30, %v4143_v33 }
 0x285   :  { %v1435_v1 = vmul.f32 %v1425_v30, %v4145_v54  ;;  %v1436_v63 = vmul.f32 %v1425_v30, %v4147_v21  ;;  %v1437_v16 = vmul.f32 %v1425_v30, %v4149_v41  ;;  %v1438_v17 = vmul.f32 %v1425_v30, %v4151_v48 }
 0x286   :  { %v1439_v38 = vmul.f32 %v1425_v30, %v4153_v4  ;;  %v1440_v56 = vmul.f32 %v1425_v30, %v4155_v37  ;;  %v1441_v18 = vmul.f32 %v1425_v30, %v4157_v60  ;;  %v1442_v19 = vmul.f32 %v1425_v30, %v4159_v51 }
 0x287   :  { %v4370_v40 = vadd.f32 %v2978_v55, %v1427_v22  ;;  %v4372_v26 = vadd.f32 %v2978_v55, %v1428_v5  ;;  %v4374_v33 = vadd.f32 %v2978_v55, %v1429_v34  ;;  %v1452_v54 = vadd.f32 %v2978_v55, %v1430_v62 }
 0x288   :  { %v1453_v21 = vadd.f32 %v2978_v55, %v1431_v57  ;;  %v1454_v61 = vadd.f32 %v2978_v55, %v1432_v20  ;;  %v1455_v41 = vadd.f32 %v2978_v55, %v1433_v50  ;;  %v1456_v36 = vadd.f32 %v2978_v55, %v1434_v32 }
 0x289   :  { %v1457_v48 = vadd.f32 %v2978_v55, %v1435_v1  ;;  %v1458_v46 = vadd.f32 %v2978_v55, %v1436_v63  ;;  %v1459_v4 = vadd.f32 %v2978_v55, %v1437_v16  ;;  %v1460_v47 = vadd.f32 %v2978_v55, %v1438_v17 }
 0x28a   :  { %v1461_v37 = vadd.f32 %v2978_v55, %v1439_v38  ;;  %v1462_v43 = vadd.f32 %v2978_v55, %v1440_v56  ;;  %v1463_v60 = vadd.f32 %v2978_v55, %v1441_v18  ;;  %v1464_v27 = vadd.f32 %v2978_v55, %v1442_v19  ;;  %v4398_v19 = vld [vmem:[#allocation2 + $0x100] sm:$0x1] }
 0x28b   :  { %vm1468_vm5 = vcmp.ge.f32.partialorder %v4374_v33, 0.0  ;;  %vm1469_vm6 = vcmp.ge.f32.partialorder %v1452_v54, 0.0  ;;  %vm1470_vm7 = vcmp.ge.f32.partialorder %v1453_v21, 0.0  ;;  %vm1471_vm8 = vcmp.ge.f32.partialorder %v1454_v61, 0.0 }
 0x28c   :  { %vm1472_vm9 = vcmp.ge.f32.partialorder %v1455_v41, 0.0  ;;  %vm1473_vm10 = vcmp.ge.f32.partialorder %v1456_v36, 0.0  ;;  %vm1474_vm11 = vcmp.ge.f32.partialorder %v1457_v48, 0.0  ;;  %vm1475_vm12 = vcmp.ge.f32.partialorder %v1458_v46, 0.0 }
 0x28d   :  { %vm1476_vm13 = vcmp.ge.f32.partialorder %v1459_v4, 0.0  ;;  %vm1477_vm14 = vcmp.ge.f32.partialorder %v1460_v47, 0.0  ;;  %vm1478_vm15 = vcmp.ge.f32.partialorder %v1461_v37, 0.0  ;;  %vm1479_vm1 = vcmp.ge.f32.partialorder %v1462_v43, 0.0 }
 0x28e   :  { %vm1480_vm4 = vcmp.ge.f32.partialorder %v1463_v60, 0.0  ;;  %vm1481_vm3 = vcmp.ge.f32.partialorder %v1464_v27, 0.0  ;;  %v1483_v51 = vmul.f32 %v4330_v39, %v4370_v40  ;;  %v1484_v50 = vmul.f32 %v4330_v39, %v4372_v26 }
 0x28f   :  { %v1485_v62 = vmul.f32 %v4330_v39, %v4374_v33  ;;  %v1486_v22 = vmul.f32 %v4330_v39, %v1452_v54  ;;  %v1487_v32 = vmul.f32 %v4330_v39, %v1453_v21  ;;  %v1488_v38 = vmul.f32 %v4330_v39, %v1454_v61 }
 0x290   :  { %v1489_v20 = vmul.f32 %v4330_v39, %v1455_v41  ;;  %v1490_v57 = vmul.f32 %v4330_v39, %v1456_v36  ;;  %v1491_v5 = vmul.f32 %v4330_v39, %v1457_v48  ;;  %v1492_v55 = vmul.f32 %v4330_v39, %v1458_v46 }
 0x291   :  { %v1493_v30 = vmul.f32 %v4330_v39, %v1459_v4  ;;  %v1494_v56 = vmul.f32 %v4330_v39, %v1460_v47  ;;  %v1495_v34 = vmul.f32 %v4330_v39, %v1461_v37  ;;  %v1496_v1 = vmul.f32 %v4330_v39, %v1462_v43 }
 0x292   :  { %v1497_v63 = vmul.f32 %v4330_v39, %v1463_v60  ;;  %v1498_v16 = vmul.f32 %v4330_v39, %v1464_v27  ;;  %v1502_v17 = vsel %vm1469_vm6, %v1452_v54, %v1486_v22  ;;  %v1503_v18 = vsel %vm1470_vm7, %v1453_v21, %v1487_v32  ;;  %v4408_v39 = vld [vmem:[#allocation2 + $0x180] sm:$0xff]  ;;  %v4410_v54 = vld [vmem:[#allocation2 + $0x198] sm:$0xff]  ;;  %v4424_v32 = vld [vmem:[#allocation2 + $0x130] sm:$0x1] }
 0x293   :  { %v1504_v25 = vsel %vm1471_vm8, %v1454_v61, %v1488_v38  ;;  %v1505_v35 = vsel %vm1472_vm9, %v1455_v41, %v1489_v20  ;;  %v1506_v24 = vsel %vm1473_vm10, %v1456_v36, %v1490_v57  ;;  %v1507_v14 = vsel %vm1474_vm11, %v1457_v48, %v1491_v5  ;;  %1518 = vst.msk [vmem:[#allocation2 + $0x80] sm:$0xff] %vm34_vm0, %v1502_v17  ;;  %v4420_v48 = vld [vmem:[#allocation2 + $0x160] sm:$0x1]  ;;  %v4422_v22 = vld [vmem:[#allocation2 + $0x178] sm:$0x1]  ;;  %v3410_v17 = vld [vmem:[%s5178_s6 + $0xd0] sm:$0xff]  }
 0x294   :  { %1519 = vst.msk [vmem:[#allocation2 + $0x98] sm:$0xff] %vm34_vm0, %v1503_v18  ;;  %v1508_v21 = vsel %vm1475_vm12, %v1458_v46, %v1492_v55  ;;  %v1509_v61 = vsel %vm1476_vm13, %v1459_v4, %v1493_v30  ;;  %v1510_v41 = vsel %vm1477_vm14, %v1460_v47, %v1494_v56  ;;  %v1511_v36 = vsel %vm1478_vm15, %v1461_v37, %v1495_v34  ;;  %v4452_v37 = vld [vmem:[#allocation2 + $0x148] sm:$0x1]  ;;  %v1534_v38 = vld [vmem:[#allocation2 + $0x18] sm:$0xff]  ;;  %v4457_v57 = vld [vmem:[#allocation2 + $0x190] sm:$0x1] }
 0x295   :  { %1522 = vst.msk [vmem:[#allocation2 + $0xe0] sm:$0xff] %vm34_vm0, %v1506_v24  ;;  %1523 = vst.msk [vmem:[#allocation2 + $0xf8] sm:$0xff] %vm34_vm0, %v1507_v14  ;;  %v1512_v46 = vsel %vm1479_vm1, %v1462_v43, %v1496_v1  ;;  %v1513_v47 = vsel %vm1480_vm4, %v1463_v60, %v1497_v63  ;;  %v1514_v4 = vsel %vm1481_vm3, %v1464_v27, %v1498_v16  ;;  %vm1466_vm6 = vcmp.ge.f32.partialorder %v4370_v40, 0.0  ;;  %v3406_v24 = vld [vmem:[%s5178_s6 + $0xc8] sm:$0xff]   ;;  %v1531_v60 = vld [vmem:[#allocation2] sm:$0xff] }
 0x296   :  { %1520 = vst.msk [vmem:[#allocation2 + $0xb0] sm:$0xff] %vm34_vm0, %v1504_v25  ;;  %1521 = vst.msk [vmem:[#allocation2 + $0xc8] sm:$0xff] %vm34_vm0, %v1505_v35  ;;  %v3407_v14 = vld [vmem:[%s5178_s6 + $0x88] sm:$0xff]   ;;  %v3408_v35 = vld [vmem:[%s5178_s6 + $0x78] sm:$0xff]   ;;  %vm1467_vm3 = vcmp.ge.f32.partialorder %v4372_v26, 0.0  ;;  %v1499_v25 = vsel %vm1466_vm6, %v4370_v40, %v1483_v51  ;;  %v1501_v27 = vsel %vm1468_vm5, %v4374_v33, %v1485_v62  ;;  %3230 = vmatprep.subr.bf16.mxu0 %v3406_v24  ;;  %v1623_v40 = vrot.slane %v1531_v60, 7 }
 0x297   :  { %1524 = vst.msk [vmem:[#allocation2 + $0x110] sm:$0xff] %vm34_vm0, %v1508_v21  ;;  %1525 = vst.msk [vmem:[#allocation2 + $0x128] sm:$0xff] %vm34_vm0, %v1509_v61  ;;  %v1500_v20 = vsel %vm1467_vm3, %v4372_v26, %v1484_v50  ;;  %v4459_v5 = vld [vmem:[#allocation2 + $0x1a8] sm:$0x1]  ;;  %3178 = vmatprep.subr.bf16.mxu1 %v3408_v35  ;;  %v1626_v33 = vrot.slane %v1534_v38, 7  ;;  %3231 = vmatpush3.bf16.msra.mxu0 %v3407_v14  ;;  %v3409_v55 = vld [vmem:[%s5178_s6 + $0x38] sm:$0xff]  }
 0x298   :  { %1526 = vst.msk [vmem:[#allocation2 + $0x140] sm:$0xff] %vm34_vm0, %v1510_v41  ;;  %1527 = vst.msk [vmem:[#allocation2 + $0x158] sm:$0xff] %vm34_vm0, %v1511_v36  ;;  %v5196_v34 = vrot.slane %v4096_v7, 7  ;;  %v5197_v63 = vrot.slane %v4098_v9, 7  ;;  %v3411_v18 = vld [vmem:[%s5178_s6 + $0x90] sm:$0xff]   ;;  %3179 = vmatpush3.bf16.msra.mxu1 %v3409_v55  ;;  %3232 = vmatprep.subr.bf16.mxu0 %v3410_v17  ;;  %v5198_v55 = vrot.slane %v4276_v10, 7 }
 0x299   :  { %1528 = vst.msk [vmem:[#allocation2 + $0x170] sm:$0xff] %vm34_vm0, %v1512_v46  ;;  %1529 = vst.msk [vmem:[#allocation2 + $0x188] sm:$0xff] %vm34_vm0, %v1513_v47  ;;  %v5202_v56 = vrot.slane %v4270_v3, 7  ;;  %v5205_v3 = vrot.slane %v4272_v6, 7  ;;  %v5206_v6 = vrot.slane %v4303_v13, 1  ;;  %vm5207_vm4 = vcmask 1046528  }
 0x29a   :  { %1530 = vst.msk [vmem:[#allocation2 + $0x1a0] sm:$0xff] %vm34_vm0, %v1514_v4  ;;  %1515 = vst.msk [vmem:[#allocation2 + $0x38] sm:$0xff] %vm34_vm0, %v1499_v25  ;;  %v1625_v1 = vsel %vm260_vm2, %v1623_v40, %v5196_v34  ;;  %v1628_v16 = vsel %vm260_vm2, %v1626_v33, %v5197_v63  ;;  %v4483_v21 = vld [vmem:[#allocation2 + $0x80] sm:$0xff]  ;;  %v5210_v13 = vrot.slane %v4296_v23, 7  ;;  %v5215_v23 = vrot.slane %v4301_v53, 7 }
 0x29b   :  { %1517 = vst.msk [vmem:[#allocation2 + $0x68] sm:$0xff] %vm34_vm0, %v1501_v27  ;;  %1516 = vst.msk [vmem:[#allocation2 + $0x50] sm:$0xff] %vm34_vm0, %v1500_v20  ;;  %v4485_v61 = vld [vmem:[#allocation2 + $0x98] sm:$0xff]  ;;  %v1687_v47 = vpack.c.bf16 %v1628_v16, %v1625_v1  ;;  %v1639_v4 = vrot.slane %v4483_v21, 7  ;;  %v1882_v24 = vrot.slane %v4483_v21, 1  ;;  %3233 = vmatpush3.bf16.msra.mxu0 %v3411_v18  ;;  %v5199_v1 = vrot.slane %v4278_v15, 7 }
 0x29c   :  { %v1642_v35 = vrot.slane %v4485_v61, 7  ;;  %v1885_v25 = vrot.slane %v4485_v61, 1  ;;  %v4504_v40 = vld [vmem:[#allocation2 + $0xe0] sm:$0xff]  ;;  %v5200_v18 = vrot.slane %v4283_v28, 7  ;;  %v4532_v28 = vld [vmem:[#allocation2 + $0xf8] sm:$0xff]  ;;  %v5204_v15 = vrot.slane %v4294_v0, 7  ;;  %vm5209_vm5 = vmmov %vm5207_vm4 }
 0x29d   :  { %v4492_v14 = vld [vmem:[#allocation2 + $0xb0] sm:$0xff]  ;;  %v4496_v27 = vld [vmem:[#allocation2 + $0xc8] sm:$0xff]  ;;  %1695 = vst.msk [vmem:[#allocation3] sm:$0xff] %vm34_vm0, %v1687_v47  ;;  %v1640_v34 = vsel %vm260_vm2, %v5198_v55, %v1639_v4  ;;  %v1651_v16 = vrot.slane %v4504_v40, 7  ;;  %v5201_v4 = vrot.slane %v4285_v29, 7  ;;  %v3412_v29 = vld [vmem:[%s5178_s6 + $0xd8] sm:$0xff]  }
 0x29e   :  { %v1645_v60 = vrot.slane %v4492_v14, 7  ;;  %v4501_v38 = vpack.c.bf16 %v4492_v14, %v4485_v61  ;;  %v1648_v33 = vrot.slane %v4496_v27, 7  ;;  %v1643_v63 = vsel %vm260_vm2, %v5199_v1, %v1642_v35  ;;  %v3415_v20 = vld [vmem:[%s5178_s6 + $0xe0] sm:$0xff]   ;;  %v4570_v0 = vld [vmem:[#allocation2 + $0x128] sm:$0xff]  ;;  %3234 = vmatprep.subr.bf16.mxu0 %v3412_v29  ;;  %vm5212_vm7 = vmmov %vm5207_vm4 }
 0x29f   :  { %v4517_v17 = vpack.c.bf16 %v4504_v40, %v4496_v27  ;;  %v1652_v47 = vsel %vm260_vm2, %v5204_v15, %v1651_v16  ;;  %v5208_v16 = vrot.slane %v4307_v11, 1  ;;  %v5211_v15 = vrot.slane %v4309_v42, 1  ;;  %vm5214_vm8 = vmmov %vm5207_vm4  ;;  %v4608_v29 = vld [vmem:[#allocation2 + $0x158] sm:$0xff] }
 0x2a0   :  { %1828 = vst.msk [vmem:[#allocation3 + $0x60] sm:$0xff] %vm34_vm0, %v4501_v38  ;;  %v1646_v10 = vsel %vm260_vm2, %v5200_v18, %v1645_v60  ;;  %v1649_v35 = vsel %vm260_vm2, %v5201_v4, %v1648_v33  ;;  %v4534_v60 = vld [vmem:[#allocation2 + $0x110] sm:$0xff]  ;;  %v3413_v33 = vld [vmem:[%s5178_s6 + $0x98] sm:$0xff]   ;;  %v4545_v4 = vld [vmem:[%s5178_s6 + $0x100] sm:$0xff]   ;;  %vm5216_vm9 = vcmask 1048064  }
 0x2a1   :  { %v1538_v46 = vld [vmem:[#allocation2 + $0x38] sm:$0xff]  ;;  %1829 = vst.msk [vmem:[#allocation3 + $0x88] sm:$0xff] %vm34_vm0, %v4517_v17  ;;  %3235 = vmatpush3.bf16.msra.mxu0 %v3413_v33  ;;  %3328 = vmatprep.subr.bf16.mxu1 %v4545_v4  ;;  %v4610_v33 = vld [vmem:[#allocation2 + $0x170] sm:$0xff]  ;;  %vm5220_vm10 = vmmov %vm5207_vm4 }
 0x2a2   :  { %v1544_v36 = vld [vmem:[#allocation2 + $0x68] sm:$0xff]  ;;  %v1541_v55 = vld [vmem:[#allocation2 + $0x50] sm:$0xff]  ;;  %v1873_v1 = vrot.slane %v1538_v46, 1  ;;  %v1630_v30 = vrot.slane %v1538_v46, 7  ;;  %3236 = vmatprep.subr.bf16.mxu0 %v3415_v20  ;;  %vm5223_vm11 = vmmov %vm5207_vm4 }
 0x2a3   :  { %v1636_v50 = vrot.slane %v1544_v36, 7  ;;  %v1779_v41 = vpack.c.bf16 %v4483_v21, %v1544_v36  ;;  %v1633_v18 = vrot.slane %v1541_v55, 7  ;;  %v1778_v26 = vpack.c.bf16 %v1541_v55, %v1538_v46  ;;  %vm5226_vm12 = vmmov %vm5207_vm4 }
 0x2a4   :  { %v1876_v62 = vrot.slane %v1541_v55, 1  ;;  %v1879_v51 = vrot.slane %v1544_v36, 1  ;;  %v1631_v43 = vsel %vm260_vm2, %v5202_v56, %v1630_v30  ;;  %v5203_v36 = vrot.slane %v4274_v52, 7  ;;  %vm5232_vm13 = vmmov %vm5207_vm4 }
 0x2a5   :  { %1827 = vst.msk [vmem:[#allocation3 + $0x38] sm:$0xff] %vm34_vm0, %v1779_v41  ;;  %v4554_v55 = vpack.c.bf16 %v1646_v10, %v1643_v63  ;;  %1795 = vrot.lane.b32.xlu0 %v1778_v26, %s3433_s15  ;;  %1826 = vst.msk [vmem:[#allocation3 + $0x10] sm:$0xff] %vm34_vm0, %v1778_v26  ;;  %v1634_v52 = vsel %vm260_vm2, %v5205_v3, %v1633_v18  ;;  %v1654_v56 = vrot.slane %v4532_v28, 7  ;;  %v1657_v26 = vrot.slane %v4534_v60, 7 }
 0x2a6   :  { %v1637_v46 = vsel %vm260_vm2, %v5203_v36, %v1636_v50  ;;  %v4567_v50 = vpack.c.bf16 %v1652_v47, %v1649_v35  ;;  %v1688_v63 = vpack.c.bf16 %v1634_v52, %v1631_v43  ;;  %v1878_v10 = vsel %vm5209_vm5, %v1876_v62, %v5208_v16  ;;  %v4583_v47 = vld [vmem:[#allocation2 + $0x140] sm:$0xff]  ;;  %v1794_v36 = vpop.permute.xlu0 %1793  ;;  %vm5234_vm14 = vmmov %vm5207_vm4 }
 0x2a7   :  { %v1689_v30 = vpack.c.bf16 %v1640_v34, %v1637_v46  ;;  %1698 = vst.msk [vmem:[#allocation3 + $0x78] sm:$0xff] %vm34_vm0, %v4554_v55  ;;  %1770 = vst.msk [vmem:[#allocation3 + $0x30] sm:$0xff] %vm34_vm0, %v4554_v55  ;;  %v1875_v34 = vsel %vm5207_vm4, %v1873_v1, %v5206_v6  ;;  %v3416_v43 = vld [vmem:[%s5178_s6 + $0xa0] sm:$0xff]   ;;  %v1655_v11 = vsel %vm260_vm2, %v5210_v13, %v1654_v56  ;;  %v5213_v1 = vrot.slane %v4313_v58, 1 }
 0x2a8   :  { %1699 = vst.msk [vmem:[#allocation3 + $0xa0] sm:$0xff] %vm34_vm0, %v4567_v50  ;;  %1771 = vst.msk [vmem:[#allocation3 + $0x58] sm:$0xff] %vm34_vm0, %v4567_v50  ;;  %v4598_v62 = vpack.c.bf16 %v1878_v10, %v1875_v34  ;;  %v1881_v35 = vsel %vm5212_vm7, %v1879_v51, %v5211_v15  ;;  %1724 = vrot.lane.b32.xlu1 %v1688_v63, %s3433_s15  ;;  %v1658_v42 = vsel %vm260_vm2, %v5215_v23, %v1657_v26  ;;  %v4678_v15 = vld [vmem:[#allocation2 + $0x188] sm:$0xff] }
 0x2a9   :  { %1697 = vst.msk [vmem:[#allocation3 + $0x50] sm:$0xff] %vm34_vm0, %v1689_v30  ;;  %1769 = vst.msk [vmem:[#allocation3 + $0x8] sm:$0xff] %vm34_vm0, %v1689_v30  ;;  %v1884_v18 = vsel %vm5214_vm8, %v1882_v24, %v5213_v1  ;;  %v4621_v58 = vpack.c.bf16 %v4534_v60, %v4532_v28  ;;  %v1660_v21 = vrot.slane %v4570_v0, 7  ;;  %v3417_v24 = vld [vmem:[%s5178_s6 + $0xe8] sm:$0xff]   ;;  %1797 = vrot.lane.b32.xlu0 %v1779_v41, %s3433_s15  ;;  %v1663_v53 = vrot.slane %v4583_v47, 7  ;;  %v5229_v1 = vld [vmem:[#allocation8_spill] sm:$0xff] }
 0x2aa   :  { %1696 = vst.msk [vmem:[#allocation3 + $0x28] sm:$0xff] %vm34_vm0, %v1688_v63  ;;  %v4617_v51 = vpack.c.bf16 %v1884_v18, %v1881_v35  ;;  %v4629_v20 = vpack.c.bf16 %v1658_v42, %v1655_v11  ;;  %1940 = vst.msk [vmem:[#allocation3 + $0x40] sm:$0xff] %vm34_vm0, %v4598_v62  ;;  %v4636_v46 = vpack.c.bf16 %v4583_v47, %v4570_v0  ;;  %v1903_v3 = vrot.slane %v4570_v0, 1  ;;  %v3418_v0 = vld [vmem:[%s5178_s6 + $0xa8] sm:$0xff]   ;;  %v4680_v35 = vld [vmem:[#allocation2 + $0x1a0] sm:$0xff] }
 0x2ab   :  { %1817 = vst.msk [vmem:[#allocation3 + $0x8] sm:$0xff] %vm5216_vm9, %v1794_v36  ;;  %v1906_v41 = vrot.slane %v4583_v47, 1  ;;  %v5217_v52 = vrot.slane %v4315_v59, 7  ;;  %v1666_v63 = vrot.slane %v4608_v29, 7  ;;  %v1669_v26 = vrot.slane %v4610_v33, 7  ;;  %3237 = vmatpush3.bf16.msra.mxu0 %v3416_v43  ;;  %vm5236_vm15 = vmmov %vm5207_vm4 }
 0x2ac   :  { %2009 = vst.msk [vmem:[#allocation3 + $0x20] sm:$0xff] %vm34_vm0, %v4617_v51  ;;  %1941 = vst.msk [vmem:[#allocation3 + $0x68] sm:$0xff] %vm34_vm0, %v4617_v51  ;;  %v5218_v59 = vrot.slane %v4317_v45, 7  ;;  %v5219_v34 = vrot.slane %v4325_v31, 1  ;;  %v5221_v10 = vrot.slane %v4332_v44, 1  ;;  %v5222_v47 = vrot.slane %v4492_v14, 1  ;;  %3238 = vmatprep.subr.bf16.mxu0 %v3417_v24  ;;  %1726 = vrot.lane.b32.xlu1 %v1689_v30, %s3433_s15 }
 0x2ad   :  { %1830 = vst.msk [vmem:[#allocation3 + $0xb0] sm:$0xff] %vm34_vm0, %v4621_v58  ;;  %v1661_v56 = vsel %vm260_vm2, %v5217_v52, %v1660_v21  ;;  %1700 = vst.msk [vmem:[#allocation3 + $0xc8] sm:$0xff] %vm34_vm0, %v4629_v20  ;;  %v5224_v13 = vrot.slane %v4334_v49, 1  ;;  %v5225_v11 = vrot.slane %v4496_v27, 1  ;;  %v5227_v44 = vrot.slane %v4321_v8, 7  ;;  %v3419_v27 = vld [vmem:[%s5178_s6 + $0xf0] sm:$0xff]   ;;  %1799 = vrot.lane.b32.xlu0 %v4501_v38, %s3433_s15 }
 0x2ae   :  { %1772 = vst.msk [vmem:[#allocation3 + $0x80] sm:$0xff] %vm34_vm0, %v4629_v20  ;;  %1831 = vst.msk [vmem:[#allocation3 + $0xd8] sm:$0xff] %vm34_vm0, %v4636_v46  ;;  %v1664_v6 = vsel %vm260_vm2, %v5218_v59, %v1663_v53  ;;  %v1887_v16 = vsel %vm5220_vm10, %v1885_v25, %v5219_v34  ;;  %v1890_v43 = vsel %vm5223_vm11, %v5222_v47, %v5221_v10  ;;  %v5228_v14 = vrot.slane %v4323_v12, 7  ;;  %v3420_v21 = vld [vmem:[%s5178_s6 + $0xb0] sm:$0xff]   ;;  %v1536_v34 = vld [vmem:[#allocation2 + $0x28] sm:$0x1] }
 0x2af   :  { %v1893_v45 = vsel %vm5226_vm12, %v5225_v11, %v5224_v13  ;;  %v4683_v31 = vpack.c.bf16 %v1664_v6, %v1661_v56  ;;  %v1667_v61 = vsel %vm260_vm2, %v5227_v44, %v1666_v63  ;;  %v4691_v25 = vpack.c.bf16 %v1890_v43, %v1887_v16  ;;  %3239 = vmatpush3.bf16.msra.mxu0 %v3418_v0  ;;  %vm5238_vm1 = vmmov %vm5207_vm4  ;;  %v1533_v6 = vld [vmem:[#allocation2 + $0x10] sm:$0x1] }
 0x2b0   :  { %v1670_v49 = vsel %vm260_vm2, %v5228_v14, %v1669_v26  ;;  %v5230_v18 = vrot.slane %v5229_v1, 1  ;;  %v5231_v8 = vrot.slane %v4504_v40, 1  ;;  %v4707_v12 = vpack.c.bf16 %v4610_v33, %v4608_v29  ;;  %3240 = vmatprep.subr.bf16.mxu0 %v3419_v27  ;;  %1728 = vrot.lane.b32.xlu1 %v4554_v55, %s3433_s15  ;;  %vm5242_vm6 = vmmov %vm5238_vm1 }
 0x2b1   :  { %v4698_v30 = vpack.c.bf16 %v1670_v49, %v1667_v61  ;;  %v1897_v23 = vrot.slane %v4532_v28, 1  ;;  %1701 = vst.msk [vmem:[#allocation3 + $0xf0] sm:$0xff] %vm34_vm0, %v4683_v31  ;;  %1773 = vst.msk [vmem:[#allocation3 + $0xa8] sm:$0xff] %vm34_vm0, %v4683_v31  ;;  %v1900_v40 = vrot.slane %v4534_v60, 1  ;;  %v1708_v42 = vrot.slane %v4678_v15, 7  ;;  %1801 = vrot.lane.b32.xlu0 %v4517_v17, %s3433_s15  ;;  %v3422_v17 = vld [vmem:[%s5178_s6 + $0xb8] sm:$0xff]  }
 0x2b2   :  { %v1896_v36 = vsel %vm5232_vm13, %v5231_v8, %v5230_v18  ;;  %2010 = vst.msk [vmem:[#allocation3 + $0x48] sm:$0xff] %vm34_vm0, %v4691_v25  ;;  %1942 = vst.msk [vmem:[#allocation3 + $0x90] sm:$0xff] %vm34_vm0, %v4691_v25  ;;  %v1711_v28 = vrot.slane %v4680_v35, 7  ;;  %v5233_v60 = vrot.slane %v4398_v19, 1  ;;  %v1909_v53 = vrot.slane %v4608_v29, 1  ;;  %v2018_v26 = vld [vmem:[#allocation3 + $0x8] sm:$0xff] }
 0x2b3   :  { %v4718_v38 = vpack.c.bf16 %v1896_v36, %v1893_v45  ;;  %1702 = vst.msk [vmem:[#allocation3 + $0x118] sm:$0xff] %vm34_vm0, %v4698_v30  ;;  %1774 = vst.msk [vmem:[#allocation3 + $0xd0] sm:$0xff] %vm34_vm0, %v4698_v30  ;;  %v1912_v52 = vrot.slane %v4610_v33, 1  ;;  %v5235_v56 = vrot.slane %v4424_v32, 1  ;;  %v5237_v19 = vrot.slane %v4406_v2, 1  ;;  %v3421_v2 = vld [vmem:[%s5178_s6 + $0xf8] sm:$0xff]   ;;  %2401 = vmatprep.mubr.bf16.mxu1 %v2018_v26  ;;  %3241 = vmatpush3.bf16.msra.mxu0 %v3420_v21 }
 0x2b4   :  { %1832 = vst.msk [vmem:[#allocation3 + $0x100] sm:$0xff] %vm34_vm0, %v4707_v12  ;;  %v1899_v24 = vsel %vm5234_vm14, %v1897_v23, %v5233_v60  ;;  %v5239_v33 = vrot.slane %v4408_v39, 7  ;;  %v5241_v55 = vrot.slane %v4452_v37, 1  ;;  %v5243_v10 = vrot.slane %v4420_v48, 1  ;;  %vm5244_vm3 = vmmov %vm5238_vm1  ;;  %3242 = vmatprep.subr.bf16.mxu0 %v3421_v2  ;;  %1730 = vrot.lane.b32.xlu1 %v4567_v50, %s3433_s15  ;;  %v3431_v8 = vld [vmem:[#allocation2 + $0x1d0] sm:$0xff]  ;;  %v3425_v26 = vld [vmem:[%s5178_s6 + $0x118] sm:$0xff]  }
 0x2b5   :  { %v1905_v63 = vsel %vm5236_vm15, %v1903_v3, %v5235_v56  ;;  %2011 = vst.msk [vmem:[#allocation3 + $0x70] sm:$0xff] %vm34_vm0, %v4718_v38  ;;  %1943 = vst.msk [vmem:[#allocation3 + $0xb8] sm:$0xff] %vm34_vm0, %v4718_v38  ;;  %v1902_v29 = vsel %vm5238_vm1, %v1900_v40, %v5237_v19  ;;  %v5240_v3 = vrot.slane %v4410_v54, 7  ;;  %v5245_v47 = vrot.slane %v4422_v22, 1  ;;  %1732 = vrot.lane.b32.xlu0 %v4629_v20, %s3433_s15  ;;  %v1588_v20 = vld [vmem:[#allocation2 + $0x1c8] sm:$0xff] }
 0x2b6   :  { %v1709_v32 = vsel %vm260_vm2, %v5239_v33, %v1708_v42  ;;  %v1908_v59 = vsel %vm5242_vm6, %v1906_v41, %v5241_v55  ;;  %v1936_v39 = vpack.c.bf16 %v1902_v29, %v1899_v24  ;;  %v1911_v54 = vsel %vm5244_vm3, %v1909_v53, %v5243_v10  ;;  %vm5246_vm4 = vmmov %vm5238_vm1 }
 0x2b7   :  { %v1712_v0 = vsel %vm260_vm2, %v5240_v3, %v1711_v28  ;;  %v1914_v37 = vsel %vm5246_vm4, %v1912_v52, %v5245_v47  ;;  %v1937_v43 = vpack.c.bf16 %v1908_v59, %v1905_v63  ;;  %v1949_v13 = vrot.slane %v4678_v15, 1  ;;  %vm5248_vm5 = vmmov %vm5238_vm1  ;;  %3243 = vmatpush3.bf16.msra.mxu0 %v3422_v17  ;;  %v3424_v52 = vld [vmem:[%s5178_s6 + $0x110] sm:$0xff]  }
 0x2b8   :  { %v1715_v16 = vpack.c.bf16 %v1712_v0, %v1709_v32  ;;  %v1938_v41 = vpack.c.bf16 %v1914_v37, %v1911_v54  ;;  %v1952_v11 = vrot.slane %v4680_v35, 1  ;;  %2012 = vst.msk [vmem:[#allocation3 + $0x98] sm:$0xff] %vm34_vm0, %v1936_v39  ;;  %1944 = vst.msk [vmem:[#allocation3 + $0xe0] sm:$0xff] %vm34_vm0, %v1936_v39  ;;  %v1825_v48 = vpack.c.bf16 %v4680_v35, %v4678_v15 }
 0x2b9   :  { %v1868_v22 = vrot.slane %v1533_v6, 1  ;;  %v1871_v45 = vrot.slane %v1536_v34, 1  ;;  %2013 = vst.msk [vmem:[#allocation3 + $0xc0] sm:$0xff] %vm34_vm0, %v1937_v43  ;;  %1945 = vst.msk [vmem:[#allocation3 + $0x108] sm:$0xff] %vm34_vm0, %v1937_v43  ;;  %v5247_v44 = vrot.slane %v4457_v57, 1  ;;  %v5249_v15 = vrot.slane %v4459_v5, 1  ;;  %1966 = vrot.lane.b32.xlu1 %v4598_v62, %s3433_s15  ;;  %1968 = vrot.lane.b32.xlu0 %v4617_v51, %s3433_s15 }
 0x2ba   :  { %1775 = vst.msk [vmem:[#allocation3 + $0xf8] sm:$0xff] %vm34_vm0, %v1715_v16  ;;  %2014 = vst.msk [vmem:[#allocation3 + $0xe8] sm:$0xff] %vm34_vm0, %v1938_v41  ;;  %v5251_v14 = vrot.slane %v4096_v7, 1  ;;  %v5253_v27 = vrot.slane %v4098_v9, 1  ;;  %v3430_v5 = vld [vmem:[#allocation2 + $0x1b8] sm:$0xff]  ;;  %v1764_v36 = vrot.slane %v3431_v8, 7 }
 0x2bb   :  { %1946 = vst.msk [vmem:[#allocation3 + $0x130] sm:$0xff] %vm34_vm0, %v1938_v41  ;;  %v1951_v61 = vsel %vm5248_vm5, %v1949_v13, %v5247_v44  ;;  %vm5250_vm7 = vmmov %vm5238_vm1  ;;  %v1761_v18 = vrot.slane %v3430_v5, 7  ;;  %v1585_v7 = vld [vmem:[#allocation2 + $0x1b0] sm:$0xff]  ;;  %v1763_v23 = vrot.slane %v1588_v20, 7  ;;  %v5255_v62 = vld [vmem:[#allocation6_spill] sm:$0xff] }
 0x2bc   :  { %v1954_v35 = vsel %vm5250_vm7, %v1952_v11, %v5249_v15  ;;  %1833 = vst.msk [vmem:[#allocation3 + $0x128] sm:$0xff] %vm34_vm0, %v1825_v48  ;;  %vm5252_vm8 = vmmov %vm5238_vm1  ;;  %v1760_v9 = vrot.slane %v1585_v7, 7  ;;  %v5256_v51 = vld [vmem:[#allocation5_spill] sm:$0xff] }
 0x2bd   :  { %v1957_v50 = vpack.c.bf16 %v1954_v35, %v1951_v61  ;;  %v1869_v49 = vsel %vm5252_vm8, %v5251_v14, %v1868_v22  ;;  %vm5254_vm9 = vmmov %vm5238_vm1  ;;  %v1765_v42 = vsel %vm260_vm2, %v1763_v23, %v1764_v36  ;;  %1803 = vrot.lane.b32.xlu1 %v4621_v58, %s3433_s15  ;;  %1805 = vrot.lane.b32.xlu0 %v4636_v46, %s3433_s15  ;;  %v2021_v20 = vld [vmem:[#allocation3 + $0x20] sm:$0xff]  ;;  %v2026_v23 = vld [vmem:[#allocation3 + $0x48] sm:$0xff] }
 0x2be   :  { %v1872_v57 = vsel %vm5254_vm9, %v5253_v27, %v1871_v45  ;;  %v1762_v40 = vsel %vm260_vm2, %v1760_v9, %v1761_v18  ;;  %v5257_v58 = vpack.c.bf16 %v5255_v62, %v5256_v51  ;;  %vm5258_vm2 = vcmask 1048064  }
 0x2bf   :  { %v1931_v1 = vpack.c.bf16 %v1872_v57, %v1869_v49  ;;  %2015 = vst.msk [vmem:[#allocation3 + $0x110] sm:$0xff] %vm34_vm0, %v1957_v50  ;;  %v1768_v28 = vpack.c.bf16 %v1765_v42, %v1762_v40  ;;  %vm5259_vm10 = vmmov %vm5258_vm2  ;;  %v2031_v42 = vld [vmem:[#allocation3 + $0x70] sm:$0xff]  ;;  %v2036_v51 = vld [vmem:[#allocation3 + $0x98] sm:$0xff] }
 0x2c0   :  { %vm5260_vm11 = vmmov %vm5258_vm2 }
 0x2c1   :  { %1939 = vst.msk [vmem:[#allocation3 + $0x18] sm:$0xff] %vm34_vm0, %v1931_v1  ;;  %1776 = vst.msk [vmem:[#allocation3 + $0x120] sm:$0xff] %vm34_vm0, %v1768_v28  ;;  %1734 = vrot.lane.b32.xlu1 %v4683_v31, %s3433_s15  ;;  %1736 = vrot.lane.b32.xlu0 %v4698_v30, %s3433_s15 }
 0x2c2   :  { %vm5261_vm12 = vmmov %vm5258_vm2 }
 0x2c3   :  { %vm5262_vm13 = vmmov %vm5258_vm2 }
 0x2c4   :  { %vm5263_vm14 = vmmov %vm5258_vm2 }
 0x2c5   :  { %1970 = vrot.lane.b32.xlu1 %v4691_v25, %s3433_s15  ;;  %1972 = vrot.lane.b32.xlu0 %v4718_v38, %s3433_s15  ;;  %vm5264_vm15 = vmmov %vm5258_vm2  ;;  %v3423_v38 = vld [vmem:[%s5178_s6 + $0x108] sm:$0xff]  }
 0x2c6   :  { %vm5265_vm1 = vmmov %vm5258_vm2 }
 0x2c7   :  { %vm5266_vm6 = vmmov %vm5265_vm1 }
 0x2c8   :  { %vm5267_vm3 = vmmov %vm5265_vm1 }
 0x2c9   :  { %1807 = vrot.lane.b32.xlu1 %v4707_v12, %s3433_s15  ;;  %1974 = vrot.lane.b32.xlu0 %v1936_v39, %s3433_s15  ;;  %vm5268_vm4 = vmmov %vm5265_vm1 }
 0x2ca   :  { %vm5269_vm5 = vmmov %vm5265_vm1 }
 0x2cb   :  { %vm5270_vm7 = vmmov %vm5265_vm1 }
 0x2cc   :  { %vm5271_vm8 = vmmov %vm5265_vm1 }
 0x2cd   :  { %1738 = vrot.lane.b32.xlu1 %v1715_v16, %s3433_s15  ;;  %1978 = vrot.lane.b32.xlu0 %v1938_v41, %s3433_s15  ;;  %vm5272_vm9 = vmmov %vm5265_vm1 }
 0x2d1   :  { %1976 = vrot.lane.b32.xlu1 %v1937_v43, %s3433_s15  ;;  %1980 = vrot.lane.b32.xlu0 %v1957_v50, %s3433_s15 }
 0x2d5   :  { %1837 = vrot.lane.b32.xlu1 %v1825_v48, %s3433_s15 }
 0x2d9   :  { %1839 = vrot.lane.b32.xlu1 %v5257_v58, %s3433_s15  ;;  %v2041_v58 = vld [vmem:[#allocation3 + $0xc0] sm:$0xff] }
 0x317   :  { %v1796_v46 = vpop.permute.xlu0 %1795 }
 0x318   :  { %1818 = vst.msk [vmem:[#allocation3 + $0x30] sm:$0xff] %vm5258_vm2, %v1796_v46  ;;  %vm5273_vm2 = vmmov %vm5265_vm1  ;;  %v2046_v46 = vld [vmem:[#allocation3 + $0xe8] sm:$0xff] }
 0x31a   :  { %v1725_v31 = vpop.permute.xlu1 %1724 }
 0x31b   :  { %1748 = vst.msk [vmem:[#allocation3] sm:$0xff] %vm5259_vm10, %v1725_v31  ;;  %v1798_v25 = vpop.permute.xlu0 %1797  ;;  %vm5274_vm10 = vmmov %vm5265_vm1  ;;  %v2051_v31 = vld [vmem:[#allocation3 + $0x110] sm:$0xff] }
 0x31c   :  { %1819 = vst.msk [vmem:[#allocation3 + $0x58] sm:$0xff] %vm5260_vm11, %v1798_v25  ;;  %vm5275_vm11 = vmmov %vm5265_vm1 }
 0x31d   :  { %1843 = vst.msk [vmem:[#allocation3 + $0x10] sm:$0xff] %vm5261_vm12, %v1798_v25  ;;  %vm5276_vm12 = vmmov %vm5265_vm1  ;;  %v2056_v25 = vld [vmem:[#allocation3 + $0x138] sm:$0xff] }
 0x31e   :  { %v1727_v30 = vpop.permute.xlu1 %1726 }
 0x31f   :  { %1749 = vst.msk [vmem:[#allocation3 + $0x28] sm:$0xff] %vm5262_vm13, %v1727_v30  ;;  %v1800_v12 = vpop.permute.xlu0 %1799  ;;  %v2023_v53 = vld [vmem:[#allocation3 + $0x30] sm:$0xff]  ;;  %vm5277_vm13 = vmmov %vm5265_vm1 }
 0x320   :  { %1820 = vst.msk [vmem:[#allocation3 + $0x80] sm:$0xff] %vm5263_vm14, %v1800_v12  ;;  %vm5278_vm14 = vmmov %vm5265_vm1 }
 0x321   :  { %1844 = vst.msk [vmem:[#allocation3 + $0x38] sm:$0xff] %vm5264_vm15, %v1800_v12  ;;  %vm5279_vm15 = vmmov %vm5265_vm1 }
 0x322   :  { %v1729_v21 = vpop.permute.xlu1 %1728  ;;  %v2017_v60 = vld [vmem:[#allocation3] sm:$0xff] }
 0x323   :  { %1750 = vst.msk [vmem:[#allocation3 + $0x50] sm:$0xff] %vm5265_vm1, %v1729_v21  ;;  %v1802_v24 = vpop.permute.xlu0 %1801  ;;  %2402 = vmatmul.mubr.bf16.vlgmr.msra.gmra.mrb[32].mxu1 %v2017_v60  ;;  %v2028_v33 = vld [vmem:[#allocation3 + $0x58] sm:$0xff] }
 0x324   :  { %1821 = vst.msk [vmem:[#allocation3 + $0xa8] sm:$0xff] %vm5266_vm6, %v1802_v24  ;;  %3329 = vmatpush3.bf16.msra.mxu1 %v4545_v4  ;;  %2409 = vmatprep.mubr.bf16.mxu1 %v2023_v53  ;;  %v2019_v2 = vld [vmem:[#allocation3 + $0x10] sm:$0xff]  ;;  %vm5280_vm6 = vmmov %vm5265_vm1 }
 0x325   :  { %1845 = vst.msk [vmem:[#allocation3 + $0x60] sm:$0xff] %vm5267_vm3, %v1802_v24  ;;  %3330 = vmatprep.subr.bf16.mxu1 %v3423_v38  ;;  %vm5281_vm3 = vmmov %vm5265_vm1 }
 0x326   :  { %v1731_v56 = vpop.permute.xlu1 %1730  ;;  %v2022_v4 = vld [vmem:[#allocation3 + $0x28] sm:$0xff] }
 0x327   :  { %1751 = vst.msk [vmem:[#allocation3 + $0x78] sm:$0xff] %vm5268_vm4, %v1731_v56  ;;  %v1733_v63 = vpop.permute.xlu0 %1732  ;;  %v2033_v34 = vld [vmem:[#allocation3 + $0x80] sm:$0xff]  ;;  %vm5282_vm4 = vmmov %vm5265_vm1 }
 0x328   :  { %1752 = vst.msk [vmem:[#allocation3 + $0xa0] sm:$0xff] %vm5269_vm5, %v1733_v63  ;;  %3331 = vmatpush3.bf16.msra.mxu1 %v3423_v38  ;;  %v2024_v43 = vld [vmem:[#allocation3 + $0x38] sm:$0xff]  ;;  %vm5283_vm5 = vmmov %vm5265_vm1 }
 0x329   :  { %3332 = vmatprep.subr.bf16.mxu1 %v3424_v52 }
 0x32a   :  { %v2027_v55 = vld [vmem:[#allocation3 + $0x50] sm:$0xff] }
 0x32b   :  { %v1967_v19 = vpop.permute.xlu1 %1966  ;;  %v1969_v29 = vpop.permute.xlu0 %1968  ;;  %2410 = vmatmul.mubr.bf16.gmra.mrb[36].mxu1 %v2022_v4  ;;  %v2038_v41 = vld [vmem:[#allocation3 + $0xa8] sm:$0xff] }
 0x32c   :  { %1990 = vst.msk [vmem:[#allocation3 + $0x18] sm:$0xff] %vm5270_vm7, %v1967_v19  ;;  %2417 = vmatprep.mubr.bf16.mxu1 %v2028_v33  ;;  %3333 = vmatpush3.bf16.msra.mxu1 %v3424_v52  ;;  %vm5284_vm7 = vmmov %vm5265_vm1  ;;  %v2029_v61 = vld [vmem:[#allocation3 + $0x60] sm:$0xff] }
 0x32d   :  { %1991 = vst.msk [vmem:[#allocation3 + $0x40] sm:$0xff] %vm5271_vm8, %v1969_v29  ;;  %3334 = vmatprep.subr.bf16.mxu1 %v3425_v26  ;;  %vm5285_vm8 = vmmov %vm5265_vm1 }
 0x32e   :  { %v2032_v47 = vld [vmem:[#allocation3 + $0x78] sm:$0xff] }
 0x32f   :  { %v1804_v32 = vpop.permute.xlu1 %1803  ;;  %v1806_v3 = vpop.permute.xlu0 %1805  ;;  %v2037_v22 = vld [vmem:[#allocation3 + $0xa0] sm:$0xff] }
 0x330   :  { %1822 = vst.msk [vmem:[#allocation3 + $0xd0] sm:$0xff] %vm5272_vm9, %v1804_v32  ;;  %3335 = vmatpush3.bf16.msra.mxu1 %v3425_v26  ;;  %vm5286_vm9 = vmmov %vm5265_vm1 }
 0x331   :  { %1846 = vst.msk [vmem:[#allocation3 + $0x88] sm:$0xff] %vm5273_vm2, %v1804_v32  ;;  %vm5287_vm2 = vmmov %vm5265_vm1 }
 0x332   :  { %1823 = vst.msk [vmem:[#allocation3 + $0xf8] sm:$0xff] %vm5274_vm10, %v1806_v3 }
 0x333   :  { %1847 = vst.msk [vmem:[#allocation3 + $0xb0] sm:$0xff] %vm5275_vm11, %v1806_v3  ;;  %v1735_v0 = vpop.permute.xlu1 %1734  ;;  %v2020_v59 = vld [vmem:[#allocation3 + $0x18] sm:$0xff]  ;;  %v1737_v6 = vpop.permute.xlu0 %1736  ;;  %2418 = vmatmul.mubr.bf16.gmra.mrb[40].mxu1 %v2027_v55 }
 0x334   :  { %1753 = vst.msk [vmem:[#allocation3 + $0xc8] sm:$0xff] %vm5276_vm12, %v1735_v0  ;;  %2498 = vmatprep.mubr.bf16.mxu0 %v2020_v59  ;;  %v2025_v39 = vld [vmem:[#allocation3 + $0x40] sm:$0xff]  ;;  %2425 = vmatprep.mubr.bf16.mxu1 %v2033_v34 }
 0x335   :  { %1754 = vst.msk [vmem:[#allocation3 + $0xf0] sm:$0xff] %vm5277_vm13, %v1737_v6  ;;  %2499 = vmatmul.mubr.bf16.vlgmr.msra.gmra.mrb[48].mxu0 %v2019_v2 }
 0x336   :  { %2506 = vmatprep.mubr.bf16.mxu0 %v2025_v39 }
 0x337   :  { %v1971_v16 = vpop.permute.xlu1 %1970  ;;  %v1973_v10 = vpop.permute.xlu0 %1972  ;;  %v2043_v44 = vld [vmem:[#allocation3 + $0xd0] sm:$0xff] }
 0x338   :  { %1992 = vst.msk [vmem:[#allocation3 + $0x68] sm:$0xff] %vm5278_vm14, %v1971_v16  ;;  %v2034_v27 = vld [vmem:[#allocation3 + $0x88] sm:$0xff] }
 0x339   :  { %1993 = vst.msk [vmem:[#allocation3 + $0x90] sm:$0xff] %vm5279_vm15, %v1973_v10  ;;  %v2048_v49 = vld [vmem:[#allocation3 + $0xf8] sm:$0xff] }
 0x33a   :  { %v2039_v18 = vld [vmem:[#allocation3 + $0xb0] sm:$0xff] }
 0x33b   :  { %v1808_v54 = vpop.permute.xlu1 %1807  ;;  %v1975_v37 = vpop.permute.xlu0 %1974  ;;  %2426 = vmatmul.mubr.bf16.gmra.mrb[44].mxu1 %v2032_v47  ;;  %v2042_v50 = vld [vmem:[#allocation3 + $0xc8] sm:$0xff] }
 0x33c   :  { %1824 = vst.msk [vmem:[#allocation3 + $0x120] sm:$0xff] %vm5265_vm1, %v1808_v54  ;;  %2433 = vmatprep.mubr.bf16.mxu1 %v2038_v41  ;;  %v2047_v1 = vld [vmem:[#allocation3 + $0xf0] sm:$0xff] }
 0x33d   :  { %1848 = vst.msk [vmem:[#allocation3 + $0xd8] sm:$0xff] %vm5280_vm6, %v1808_v54  ;;  %2507 = vmatmul.mubr.bf16.gmra.mrb[52].mxu0 %v2024_v43 }
 0x33e   :  { %1994 = vst.msk [vmem:[#allocation3 + $0xb8] sm:$0xff] %vm5281_vm3, %v1975_v37 }
 0x33f   :  { %v1739_v13 = vpop.permute.xlu1 %1738  ;;  %v2030_v11 = vld [vmem:[#allocation3 + $0x68] sm:$0xff]  ;;  %v1979_v17 = vpop.permute.xlu0 %1978 }
 0x340   :  { %1755 = vst.msk [vmem:[#allocation3 + $0x118] sm:$0xff] %vm5282_vm4, %v1739_v13  ;;  %2514 = vmatprep.mubr.bf16.mxu0 %v2030_v11  ;;  %v2035_v15 = vld [vmem:[#allocation3 + $0x90] sm:$0xff] }
 0x341   :  { %1996 = vst.msk [vmem:[#allocation3 + $0x108] sm:$0xff] %vm5283_vm5, %v1979_v17 }
 0x343   :  { %v1977_v48 = vpop.permute.xlu1 %1976  ;;  %v1981_v45 = vpop.permute.xlu0 %1980  ;;  %2434 = vmatmul.mubr.bf16.gmra.mrb[48].mxu1 %v2037_v22  ;;  %v2053_v5 = vld [vmem:[#allocation3 + $0x120] sm:$0xff] }
 0x344   :  { %1995 = vst.msk [vmem:[#allocation3 + $0xe0] sm:$0xff] %vm5284_vm7, %v1977_v48  ;;  %2441 = vmatprep.mubr.bf16.mxu1 %v2043_v44  ;;  %v2044_v7 = vld [vmem:[#allocation3 + $0xd8] sm:$0xff] }
 0x345   :  { %1997 = vst.msk [vmem:[#allocation3 + $0x130] sm:$0xff] %vm5285_vm8, %v1981_v45  ;;  %2515 = vmatmul.mubr.bf16.gmra.mrb[56].mxu0 %v2029_v61  ;;  %v2040_v57 = vld [vmem:[#allocation3 + $0xb8] sm:$0xff] }
 0x346   :  { %2522 = vmatprep.mubr.bf16.mxu0 %v2035_v15 }
 0x347   :  { %v1838_v35 = vpop.permute.xlu1 %1837  ;;  %v2052_v36 = vld [vmem:[#allocation3 + $0x118] sm:$0xff] }
 0x348   :  { %1849 = vst.msk [vmem:[#allocation3 + $0x100] sm:$0xff] %vm5286_vm9, %v1838_v35  ;;  %v2050_v9 = vld [vmem:[#allocation3 + $0x108] sm:$0xff] }
 0x34b   :  { %v1840_v14 = vpop.permute.xlu1 %1839  ;;  %2442 = vmatmul.mubr.bf16.gmra.mrb[52].mxu1 %v2042_v50  ;;  %v2045_v8 = vld [vmem:[#allocation3 + $0xe0] sm:$0xff] }
 0x34c   :  { %1850 = vst.msk [vmem:[#allocation3 + $0x128] sm:$0xff] %vm5287_vm2, %v1840_v14  ;;  %2449 = vmatprep.mubr.bf16.mxu1 %v2048_v49  ;;  %v2055_v28 = vld [vmem:[#allocation3 + $0x130] sm:$0xff] }
 0x34d   :  { %2523 = vmatmul.mubr.bf16.gmra.mrb[60].mxu0 %v2034_v27 }
 0x34e   :  { %2530 = vmatprep.mubr.bf16.mxu0 %v2040_v57 }
 0x34f   :  { %v2049_v40 = vld [vmem:[#allocation3 + $0x100] sm:$0xff] }
 0x353   :  { %2450 = vmatmul.mubr.bf16.gmra.mrb[56].mxu1 %v2047_v1  ;;  %v2054_v62 = vld [vmem:[#allocation3 + $0x128] sm:$0xff] }
 0x354   :  { %2457 = vmatprep.mubr.bf16.mxu1 %v2053_v5 }
 0x355   :  { %2531 = vmatmul.mubr.bf16.gmra.mrb[64].mxu0 %v2039_v18 }
 0x356   :  { %2538 = vmatprep.mubr.bf16.mxu0 %v2045_v8 }
 0x35b   :  { %2458 = vmatmul.mubr.bf16.gmra.mrb[60].mxu1 %v2052_v36 }
 0x35c   :  { %3336 = vmatprep.mubr.msk.bf16.mxu1 %vm34_vm0, %v2021_v20 }
 0x35d   :  { %2539 = vmatmul.mubr.bf16.gmra.mrb[68].mxu0 %v2044_v7 }
 0x35e   :  { %2546 = vmatprep.mubr.bf16.mxu0 %v2050_v9 }
 0x363   :  { %3337 = vmatmul.mubr.msk.bf16.vlgmr.msra.gmra.mrb[64].mxu1 %vm34_vm0, %v2026_v23 }
 0x364   :  { %3340 = vmatprep.mubr.msk.bf16.mxu1 %vm34_vm0, %v2031_v42 }
 0x365   :  { %2547 = vmatmul.mubr.bf16.gmra.mrb[72].mxu0 %v2049_v40 }
 0x366   :  { %2554 = vmatprep.mubr.bf16.mxu0 %v2055_v28 }
 0x36b   :  { %3341 = vmatmul.mubr.msk.bf16.gmra.mrb[68].mxu1 %vm34_vm0, %v2036_v51 }
 0x36c   :  { %3344 = vmatprep.mubr.msk.bf16.mxu1 %vm34_vm0, %v2041_v58 }
 0x36d   :  { %2555 = vmatmul.mubr.bf16.gmra.mrb[76].mxu0 %v2054_v62 }
 0x373   :  { %3345 = vmatmul.mubr.msk.bf16.gmra.mrb[72].mxu1 %vm34_vm0, %v2046_v46 }
 0x374   :  { %3348 = vmatprep.mubr.msk.bf16.mxu1 %vm34_vm0, %v2051_v31 }
 0x37b   :  { %3349 = vmatmul.mubr.msk.bf16.gmra.mrb[76].mxu1 %vm34_vm0, %v2056_v25 }
 0x3f6   :  { %v3180_v30 = vpop.f32.mrb[32].mxu1 }
 0x3f7   :  { %v3181_v12 = vpop.f32.mrb[33].mxu1 }
 0x3f8   :  { %v3182_v38 = vadd.f32 %v3181_v12, %v3180_v30  ;;  %v3183_v21 = vpop.f32.mrb[34].mxu1 }
 0x3f9   :  { %v3184_v60 = vpop.f32.mrb[35].mxu1 }
 0x3fa   :  { %v3185_v24 = vadd.f32 %v3184_v60, %v3183_v21 }
 0x3fe   :  { %v3186_v53 = vpop.f32.mrb[36].mxu1 }
 0x3ff   :  { %v3187_v52 = vpop.f32.mrb[37].mxu1 }
 0x400   :  { %v3188_v56 = vadd.f32 %v3187_v52, %v3186_v53  ;;  %v3189_v63 = vpop.f32.mrb[38].mxu1 }
 0x401   :  { %v3190_v26 = vpop.f32.mrb[39].mxu1 }
 0x402   :  { %v3191_v19 = vadd.f32 %v3190_v26, %v3189_v63 }
 0x406   :  { %v3192_v4 = vpop.f32.mrb[40].mxu1 }
 0x407   :  { %v3193_v29 = vpop.f32.mrb[41].mxu1 }
 0x408   :  { %v3244_v33 = vpop.f32.mrb[48].mxu0  ;;  %v3194_v32 = vadd.f32 %v3193_v29, %v3192_v4  ;;  %v3195_v3 = vpop.f32.mrb[42].mxu1 }
 0x409   :  { %v3245_v0 = vpop.f32.mrb[49].mxu0  ;;  %v3196_v59 = vpop.f32.mrb[43].mxu1 }
 0x40a   :  { %v3246_v55 = vadd.f32 %v3245_v0, %v3244_v33  ;;  %v3247_v6 = vpop.f32.mrb[50].mxu0  ;;  %v3197_v34 = vadd.f32 %v3196_v59, %v3195_v3 }
 0x40b   :  { %v3248_v2 = vpop.f32.mrb[51].mxu0 }
 0x40c   :  { %v3249_v39 = vadd.f32 %v3248_v2, %v3247_v6  ;;  %v4882_v16 = vadd.f32 %v3246_v55, %v3182_v38 }
 0x40e   :  { %v4884_v10 = vadd.f32 %v3249_v39, %v3185_v24  ;;  %v3198_v54 = vpop.f32.mrb[44].mxu1 }
 0x40f   :  { %v3199_v47 = vpop.f32.mrb[45].mxu1 }
 0x410   :  { %v3250_v37 = vpop.f32.mrb[52].mxu0  ;;  %v3200_v41 = vadd.f32 %v3199_v47, %v3198_v54  ;;  %v3201_v43 = vpop.f32.mrb[46].mxu1 }
 0x411   :  { %v3251_v13 = vpop.f32.mrb[53].mxu0  ;;  %v3202_v17 = vpop.f32.mrb[47].mxu1 }
 0x412   :  { %v3252_v11 = vadd.f32 %v3251_v13, %v3250_v37  ;;  %v3253_v48 = vpop.f32.mrb[54].mxu0  ;;  %v3203_v22 = vadd.f32 %v3202_v17, %v3201_v43 }
 0x413   :  { %v3254_v45 = vpop.f32.mrb[55].mxu0 }
 0x414   :  { %v3255_v44 = vadd.f32 %v3254_v45, %v3253_v48  ;;  %v2509_v61 = vadd.f32 %v3252_v11, %v3188_v56 }
 0x416   :  { %v4886_v15 = vadd.f32 %v3255_v44, %v3191_v19  ;;  %v3204_v35 = vpop.f32.mrb[48].mxu1 }
 0x417   :  { %v3205_v50 = vpop.f32.mrb[49].mxu1 }
 0x418   :  { %v3256_v14 = vpop.f32.mrb[56].mxu0  ;;  %v3206_v49 = vadd.f32 %v3205_v50, %v3204_v35  ;;  %v3207_v27 = vpop.f32.mrb[50].mxu1 }
 0x419   :  { %v3257_v57 = vpop.f32.mrb[57].mxu0  ;;  %v3208_v5 = vpop.f32.mrb[51].mxu1 }
 0x41a   :  { %v3258_v1 = vadd.f32 %v3257_v57, %v3256_v14  ;;  %v3259_v18 = vpop.f32.mrb[58].mxu0  ;;  %v3209_v8 = vadd.f32 %v3208_v5, %v3207_v27 }
 0x41b   :  { %v3260_v36 = vpop.f32.mrb[59].mxu0 }
 0x41c   :  { %v3261_v7 = vadd.f32 %v3260_v36, %v3259_v18  ;;  %v4888_v20 = vadd.f32 %v3258_v1, %v3194_v32 }
 0x41e   :  { %v4890_v9 = vadd.f32 %v3261_v7, %v3197_v34  ;;  %v3210_v23 = vpop.f32.mrb[52].mxu1 }
 0x41f   :  { %v3211_v40 = vpop.f32.mrb[53].mxu1 }
 0x420   :  { %v3262_v42 = vpop.f32.mrb[60].mxu0  ;;  %v3212_v28 = vadd.f32 %v3211_v40, %v3210_v23  ;;  %v3213_v62 = vpop.f32.mrb[54].mxu1 }
 0x421   :  { %v3263_v51 = vpop.f32.mrb[61].mxu0  ;;  %v3214_v46 = vpop.f32.mrb[55].mxu1 }
 0x422   :  { %v3264_v58 = vadd.f32 %v3263_v51, %v3262_v42  ;;  %v3265_v31 = vpop.f32.mrb[62].mxu0  ;;  %v3215_v25 = vadd.f32 %v3214_v46, %v3213_v62 }
 0x423   :  { %v3266_v30 = vpop.f32.mrb[63].mxu0 }
 0x424   :  { %v3267_v12 = vadd.f32 %v3266_v30, %v3265_v31  ;;  %v2525_v38 = vadd.f32 %v3264_v58, %v3200_v41 }
 0x426   :  { %v2528_v21 = vadd.f32 %v3267_v12, %v3203_v22  ;;  %v3216_v60 = vpop.f32.mrb[56].mxu1 }
 0x427   :  { %v3217_v24 = vpop.f32.mrb[57].mxu1 }
 0x428   :  { %v3268_v53 = vpop.f32.mrb[64].mxu0  ;;  %v3218_v52 = vadd.f32 %v3217_v24, %v3216_v60  ;;  %v3219_v56 = vpop.f32.mrb[58].mxu1 }
 0x429   :  { %v3269_v63 = vpop.f32.mrb[65].mxu0  ;;  %v3220_v19 = vpop.f32.mrb[59].mxu1 }
 0x42a   :  { %v3270_v26 = vadd.f32 %v3269_v63, %v3268_v53  ;;  %v3271_v4 = vpop.f32.mrb[66].mxu0  ;;  %v3221_v29 = vadd.f32 %v3220_v19, %v3219_v56 }
 0x42b   :  { %v3272_v33 = vpop.f32.mrb[67].mxu0 }
 0x42c   :  { %v3273_v32 = vadd.f32 %v3272_v33, %v3271_v4  ;;  %v4892_v3 = vadd.f32 %v3270_v26, %v3206_v49 }
 0x42e   :  { %v4894_v0 = vadd.f32 %v3273_v32, %v3209_v8  ;;  %v3222_v55 = vpop.f32.mrb[60].mxu1 }
 0x42f   :  { %v3223_v59 = vpop.f32.mrb[61].mxu1 }
 0x430   :  { %v3274_v6 = vpop.f32.mrb[68].mxu0  ;;  %v3224_v34 = vadd.f32 %v3223_v59, %v3222_v55  ;;  %v3225_v2 = vpop.f32.mrb[62].mxu1 }
 0x431   :  { %v3275_v39 = vpop.f32.mrb[69].mxu0  ;;  %v3226_v47 = vpop.f32.mrb[63].mxu1 }
 0x432   :  { %v3276_v54 = vadd.f32 %v3275_v39, %v3274_v6  ;;  %v3277_v37 = vpop.f32.mrb[70].mxu0  ;;  %v3227_v41 = vadd.f32 %v3226_v47, %v3225_v2 }
 0x433   :  { %v3278_v43 = vpop.f32.mrb[71].mxu0 }
 0x434   :  { %v3279_v13 = vadd.f32 %v3278_v43, %v3277_v37  ;;  %v2541_v11 = vadd.f32 %v3276_v54, %v3212_v28 }
 0x436   :  { %v2544_v17 = vadd.f32 %v3279_v13, %v3215_v25  ;;  %v3338_v48 = vpop.f32.mrb[64].mxu1 }
 0x437   :  { %v4896_v22 = vadd.f32 %v3338_v48, %v2509_v61  ;;  %v2597_v44 = vpop.f32.mrb[65].mxu1 }
 0x438   :  { %v3280_v45 = vpop.f32.mrb[72].mxu0  ;;  %v4899_v35 = vadd.f32 %v2597_v44, %v4882_v16  ;;  %v3339_v14 = vpop.f32.mrb[66].mxu1 }
 0x439   :  { %v3281_v50 = vpop.f32.mrb[73].mxu0  ;;  %v4902_v27 = vadd.f32 %v3339_v14, %v4886_v15  ;;  %v2600_v1 = vpop.f32.mrb[67].mxu1  ;;  %v2665_v15 = vsel %vm34_vm0, %v4896_v22, 0.0 }
 0x43a   :  { %v3282_v49 = vadd.f32 %v3281_v50, %v3280_v45  ;;  %v3283_v57 = vpop.f32.mrb[74].mxu0  ;;  %v4905_v5 = vadd.f32 %v2600_v1, %v4884_v10  ;;  %v2662_v36 = vsel %vm34_vm0, %v4899_v35, 0.0 }
 0x43b   :  { %v3284_v18 = vpop.f32.mrb[75].mxu0  ;;  %v2667_v51 = vsel %vm34_vm0, %v4902_v27, 0.0 }
 0x43c   :  { %v3285_v8 = vadd.f32 %v3284_v18, %v3283_v57  ;;  %v2549_v61 = vadd.f32 %v3282_v49, %v3218_v52  ;;  %v2663_v16 = vsel %vm34_vm0, %v4905_v5, 0.0 }
 0x43d   :  { %v2664_v7 = vadd.f32 %v2663_v16, %v2662_v36 }
 0x43e   :  { %v2552_v23 = vadd.f32 %v3285_v8, %v3221_v29  ;;  %v3342_v40 = vpop.f32.mrb[68].mxu1 }
 0x43f   :  { %v2666_v42 = vadd.f32 %v2665_v15, %v2664_v7  ;;  %v4913_v28 = vadd.f32 %v3342_v40, %v2525_v38  ;;  %v2613_v62 = vpop.f32.mrb[69].mxu1 }
 0x440   :  { %v3286_v10 = vpop.f32.mrb[76].mxu0  ;;  %v4918_v58 = vadd.f32 %v2613_v62, %v4888_v20  ;;  %v3343_v31 = vpop.f32.mrb[70].mxu1 }
 0x441   :  { %v3287_v46 = vpop.f32.mrb[77].mxu0  ;;  %v2668_v25 = vadd.f32 %v2667_v51, %v2666_v42  ;;  %v2625_v12 = vadd.f32 %v3343_v31, %v2528_v21  ;;  %v2616_v24 = vpop.f32.mrb[71].mxu1  ;;  %v2673_v29 = vsel %vm34_vm0, %v4913_v28, 0.0 }
 0x442   :  { %v3288_v30 = vadd.f32 %v3287_v46, %v3286_v10  ;;  %v3289_v60 = vpop.f32.mrb[78].mxu0  ;;  %v2669_v53 = vsel %vm34_vm0, %v4918_v58, 0.0  ;;  %v2617_v38 = vadd.f32 %v2616_v24, %v4890_v9 }
 0x443   :  { %v3290_v52 = vpop.f32.mrb[79].mxu0  ;;  %v2670_v56 = vadd.f32 %v2669_v53, %v2668_v25  ;;  %v2675_v59 = vsel %vm34_vm0, %v2625_v12, 0.0 }
 0x444   :  { %v3291_v63 = vadd.f32 %v3290_v52, %v3289_v60  ;;  %v2557_v26 = vadd.f32 %v3288_v30, %v3224_v34  ;;  %v2671_v19 = vsel %vm34_vm0, %v2617_v38, 0.0 }
 0x445   :  { %v2672_v20 = vadd.f32 %v2671_v19, %v2670_v56 }
 0x446   :  { %v2560_v4 = vadd.f32 %v3291_v63, %v3227_v41  ;;  %v3346_v33 = vpop.f32.mrb[72].mxu1 }
 0x447   :  { %v2674_v21 = vadd.f32 %v2673_v29, %v2672_v20  ;;  %v2638_v32 = vadd.f32 %v3346_v33, %v2541_v11  ;;  %v2629_v55 = vpop.f32.mrb[73].mxu1 }
 0x448   :  { %v2630_v6 = vadd.f32 %v2629_v55, %v4892_v3  ;;  %v3347_v9 = vpop.f32.mrb[74].mxu1 }
 0x449   :  { %v2676_v2 = vadd.f32 %v2675_v59, %v2674_v21  ;;  %v2641_v39 = vadd.f32 %v3347_v9, %v2544_v17  ;;  %v2632_v54 = vpop.f32.mrb[75].mxu1  ;;  %v2681_v13 = vsel %vm34_vm0, %v2638_v32, 0.0 }
 0x44a   :  { %v2677_v34 = vsel %vm34_vm0, %v2630_v6, 0.0  ;;  %v2633_v47 = vadd.f32 %v2632_v54, %v4894_v0 }
 0x44b   :  { %v2678_v37 = vadd.f32 %v2677_v34, %v2676_v2  ;;  %v2683_v3 = vsel %vm34_vm0, %v2641_v39, 0.0 }
 0x44c   :  { %v2679_v41 = vsel %vm34_vm0, %v2633_v47, 0.0 }
 0x44d   :  { %v2680_v43 = vadd.f32 %v2679_v41, %v2678_v37 }
 0x44e   :  { %v3350_v11 = vpop.f32.mrb[76].mxu1 }
 0x44f   :  { %v2682_v48 = vadd.f32 %v2681_v13, %v2680_v43  ;;  %v2654_v45 = vadd.f32 %v3350_v11, %v2557_v26  ;;  %v2645_v44 = vpop.f32.mrb[77].mxu1 }
 0x450   :  { %v2646_v50 = vadd.f32 %v2645_v44, %v2549_v61  ;;  %v3351_v14 = vpop.f32.mrb[78].mxu1 }
 0x451   :  { %v2684_v17 = vadd.f32 %v2683_v3, %v2682_v48  ;;  %v2657_v49 = vadd.f32 %v3351_v14, %v2560_v4  ;;  %v2648_v57 = vpop.f32.mrb[79].mxu1  ;;  %v2689_v16 = vsel %vm34_vm0, %v2654_v45, 0.0 }
 0x452   :  { %v2685_v1 = vsel %vm34_vm0, %v2646_v50, 0.0  ;;  %v2649_v0 = vadd.f32 %v2648_v57, %v2552_v23 }
 0x453   :  { %v2686_v18 = vadd.f32 %v2685_v1, %v2684_v17  ;;  %v2691_v15 = vsel %vm34_vm0, %v2657_v49, 0.0 }
 0x454   :  { %v2687_v8 = vsel %vm34_vm0, %v2649_v0, 0.0 }
 0x455   :  { %v2688_v36 = vadd.f32 %v2687_v8, %v2686_v18 }
 0x457   :  { %v2690_v7 = vadd.f32 %v2689_v16, %v2688_v36 }
 0x459   :  { %v2692_v40 = vadd.f32 %v2691_v15, %v2690_v7 }
 0x45b   :  { %v2693_v42 = vrot.slane %v2692_v40, 4 }
 0x45d   :  { %v2694_v10 = vadd.f32 %v2693_v42, %v2692_v40 }
 0x45f   :  { %v2695_v61 = vrot.slane %v2694_v10, 2 }
 0x461   :  { %v2696_v62 = vadd.f32 %v2695_v61, %v2694_v10 }
 0x463   :  { %v2697_v51 = vrot.slane %v2696_v62, 1 }
 0x465   :  { %v2698_v46 = vadd.f32 %v2697_v51, %v2696_v62 }
 0x467   :  { %v2699_v31 = vmul.f32 0.0078125, %v2698_v46 }
 0x469   :  { %v4938_v25 = vsub.f32 %v4899_v35, %v2699_v31  ;;  %v4941_v23 = vsub.f32 %v4905_v5, %v2699_v31  ;;  %v4944_v30 = vsub.f32 %v4896_v22, %v2699_v31  ;;  %v4947_v60 = vsub.f32 %v4902_v27, %v2699_v31 }
 0x46a   :  { %v4950_v24 = vsub.f32 %v4918_v58, %v2699_v31  ;;  %v4952_v53 = vsub.f32 %v2617_v38, %v2699_v31  ;;  %v4955_v52 = vsub.f32 %v4913_v28, %v2699_v31  ;;  %v4957_v56 = vsub.f32 %v2625_v12, %v2699_v31 }
 0x46b   :  { %v4959_v35 = vsub.f32 %v2630_v6, %v2699_v31  ;;  %v4961_v5 = vsub.f32 %v2633_v47, %v2699_v31  ;;  %v4963_v63 = vsub.f32 %v2638_v32, %v2699_v31  ;;  %v4965_v22 = vsub.f32 %v2641_v39, %v2699_v31 }
 0x46c   :  { %v4967_v27 = vsub.f32 %v2646_v50, %v2699_v31  ;;  %v4969_v26 = vsub.f32 %v2649_v0, %v2699_v31  ;;  %v4971_v58 = vsub.f32 %v2654_v45, %v2699_v31  ;;  %v4973_v38 = vsub.f32 %v2657_v49, %v2699_v31 }
 0x46d   :  { %v2716_v28 = vmul.f32 %v4938_v25, %v4938_v25  ;;  %v2717_v12 = vmul.f32 %v4941_v23, %v4941_v23  ;;  %v2718_v19 = vmul.f32 %v4944_v30, %v4944_v30  ;;  %v2719_v20 = vmul.f32 %v4947_v60, %v4947_v60 }
 0x46e   :  { %v2720_v21 = vmul.f32 %v4950_v24, %v4950_v24  ;;  %v2721_v59 = vmul.f32 %v4952_v53, %v4952_v53  ;;  %v2722_v2 = vmul.f32 %v4955_v52, %v4955_v52  ;;  %v2723_v34 = vmul.f32 %v4957_v56, %v4957_v56 }
 0x46f   :  { %v2732_v4 = vsel %vm34_vm0, %v2716_v28, 0.0  ;;  %v2733_v29 = vsel %vm34_vm0, %v2717_v12, 0.0  ;;  %v2735_v32 = vsel %vm34_vm0, %v2718_v19, 0.0  ;;  %v2737_v6 = vsel %vm34_vm0, %v2719_v20, 0.0 }
 0x470   :  { %v2734_v33 = vadd.f32 %v2733_v29, %v2732_v4  ;;  %v2739_v39 = vsel %vm34_vm0, %v2720_v21, 0.0  ;;  %v2741_v47 = vsel %vm34_vm0, %v2721_v59, 0.0  ;;  %v2724_v41 = vmul.f32 %v4959_v35, %v4959_v35  ;;  %v2660_v21 = vld [vmem:[%s5182_s7] sm:$0x1]  ;;  %v5288_v59 = vld [vmem:[#allocation7_spill] sm:$0xff] }
 0x471   :  { %v2743_v43 = vsel %vm34_vm0, %v2722_v2, 0.0  ;;  %v2725_v11 = vmul.f32 %v4961_v5, %v4961_v5  ;;  %v2745_v48 = vsel %vm34_vm0, %v2723_v34, 0.0  ;;  %v2726_v44 = vmul.f32 %v4963_v63, %v4963_v63  ;;  %v3023_v2 = vld [vmem:[%s5183_s8] ss:$0 sm:$0xff] }
 0x472   :  { %v2736_v55 = vadd.f32 %v2735_v32, %v2734_v33  ;;  %v2747_v3 = vsel %vm34_vm0, %v2724_v41, 0.0  ;;  %v2727_v14 = vmul.f32 %v4965_v22, %v4965_v22  ;;  %v2728_v57 = vmul.f32 %v4967_v27, %v4967_v27  ;;  %v2818_v41 = vld [vmem:[%s5175_s0 + $0x20] sm:$0xff] }
 0x473   :  { %v2749_v17 = vsel %vm34_vm0, %v2725_v11, 0.0  ;;  %v2751_v1 = vsel %vm34_vm0, %v2726_v44, 0.0  ;;  %v2729_v18 = vmul.f32 %v4969_v26, %v4969_v26  ;;  %v2730_v16 = vmul.f32 %v4971_v58, %v4971_v58  ;;  %v2873_v11 = vld [vmem:[%s5175_s0 + $0x10] sm:$0xff]  ;;  %v2902_v44 = vld [vmem:[%s5175_s0 + $0x38] sm:$0xff] }
 0x474   :  { %v2738_v9 = vadd.f32 %v2737_v6, %v2736_v55  ;;  %v2753_v8 = vsel %vm34_vm0, %v2727_v14, 0.0  ;;  %v2755_v7 = vsel %vm34_vm0, %v2728_v57, 0.0  ;;  %v2731_v40 = vmul.f32 %v4973_v38, %v4973_v38 }
 0x475   :  { %v2757_v42 = vsel %vm34_vm0, %v2729_v18, 0.0  ;;  %v2759_v61 = vsel %vm34_vm0, %v2730_v16, 0.0  ;;  %v5289_v6 = vsub.s32 0, %v5288_v59 }
 0x476   :  { %v2740_v54 = vadd.f32 %v2739_v39, %v2738_v9  ;;  %v2761_v51 = vsel %vm34_vm0, %v2731_v40, 0.0 }
 0x478   :  { %v2742_v37 = vadd.f32 %v2741_v47, %v2740_v54 }
 0x47a   :  { %v2744_v13 = vadd.f32 %v2743_v43, %v2742_v37  ;;  %v2817_v37 = vld [vmem:[%s5175_s0] sm:$0xff] }
 0x47c   :  { %v2746_v45 = vadd.f32 %v2745_v48, %v2744_v13 }
 0x47e   :  { %v2748_v50 = vadd.f32 %v2747_v3, %v2746_v45 }
 0x480   :  { %v2750_v49 = vadd.f32 %v2749_v17, %v2748_v50 }
 0x482   :  { %v2752_v0 = vadd.f32 %v2751_v1, %v2750_v49 }
 0x484   :  { %v2754_v36 = vadd.f32 %v2753_v8, %v2752_v0 }
 0x486   :  { %v2756_v15 = vadd.f32 %v2755_v7, %v2754_v36 }
 0x488   :  { %v2758_v10 = vadd.f32 %v2757_v42, %v2756_v15 }
 0x48a   :  { %v2760_v62 = vadd.f32 %v2759_v61, %v2758_v10 }
 0x48c   :  { %v2762_v46 = vadd.f32 %v2761_v51, %v2760_v62 }
 0x48e   :  { %v2763_v31 = vrot.slane %v2762_v46, 4 }
 0x490   :  { %v2764_v28 = vadd.f32 %v2763_v31, %v2762_v46 }
 0x492   :  { %v2765_v12 = vrot.slane %v2764_v28, 2 }
 0x494   :  { %v2766_v19 = vadd.f32 %v2765_v12, %v2764_v28 }
 0x496   :  { %v2767_v20 = vrot.slane %v2766_v19, 1 }
 0x498   :  { %v2768_v4 = vadd.f32 %v2767_v20, %v2766_v19 }
 0x49a   :  { %v2769_v29 = vmul.f32 0.0078125, %v2768_v4 }
 0x49c   :  { %v2770_v33 = vadd.f32 1e-05, %v2769_v29 }
 0x49e   :  { %3428 = vrsqrt.f32 %v2770_v33 }
 0x4a8   :  { %v3429_v32 = vpop.eup %3428 }
 0x4a9   :  { %v2772_v55 = vmul.f32 %v3429_v32, %v2660_v21 }
 0x4ab   :  { %v2777_v9 = vrot.slane %v2772_v55, %v5289_v6 }
 0x4ad   :  { %v2779_v39 = vmul.f32 %v2777_v9, %v4938_v25  ;;  %v2780_v54 = vmul.f32 %v2777_v9, %v4941_v23  ;;  %v2783_v34 = vmul.f32 %v2777_v9, %v4950_v24  ;;  %v2784_v47 = vmul.f32 %v2777_v9, %v4952_v53  ;;  %v2845_v24 = vld [vmem:[%s5175_s0 + $0x8] sm:$0xff] }
 0x4ae   :  { %v2787_v43 = vmul.f32 %v2777_v9, %v4959_v35  ;;  %v2788_v13 = vmul.f32 %v2777_v9, %v4961_v5  ;;  %v2791_v25 = vmul.f32 %v2777_v9, %v4967_v27  ;;  %v2792_v23 = vmul.f32 %v2777_v9, %v4969_v26  ;;  %v2846_v53 = vld [vmem:[%s5175_s0 + $0x28] sm:$0xff]  ;;  %v2874_v27 = vld [vmem:[%s5175_s0 + $0x30] sm:$0xff]  ;;  %v2901_v26 = vld [vmem:[%s5175_s0 + $0x18] sm:$0xff] }
 0x4af   :  { %v2801_v48 = vadd.f32 %v3023_v2, %v2779_v39  ;;  %v2802_v35 = vadd.f32 %v3023_v2, %v2780_v54  ;;  %v2805_v45 = vadd.f32 %v3023_v2, %v2783_v34  ;;  %v2806_v5 = vadd.f32 %v3023_v2, %v2784_v47 }
 0x4b0   :  { %v2809_v3 = vadd.f32 %v3023_v2, %v2787_v43  ;;  %v2810_v50 = vadd.f32 %v3023_v2, %v2788_v13  ;;  %v2813_v14 = vadd.f32 %v3023_v2, %v2791_v25  ;;  %v2814_v17 = vadd.f32 %v3023_v2, %v2792_v23 }
 0x4b1   :  { %v2819_v49 = vadd.f32 %v2817_v37, %v2801_v48  ;;  %v2820_v57 = vadd.f32 %v2818_v41, %v2802_v35  ;;  %v2847_v1 = vadd.f32 %v2845_v24, %v2805_v45  ;;  %v2848_v0 = vadd.f32 %v2846_v53, %v2806_v5 }
 0x4b2   :  { %v2875_v18 = vadd.f32 %v2873_v11, %v2809_v3  ;;  %v2876_v8 = vadd.f32 %v2874_v27, %v2810_v50  ;;  %v2903_v36 = vadd.f32 %v2901_v26, %v2813_v14  ;;  %v2904_v16 = vadd.f32 %v2902_v44, %v2814_v17 }
 0x4b3   :  { %2821 = vst.msk [vmem:[%s5184_s9] sm:$0xff] %vm34_vm0, %v2819_v49  ;;  %2822 = vst.msk [vmem:[%s5184_s9 + $0x20] sm:$0xff] %vm34_vm0, %v2820_v57  ;;  %v2782_v7 = vmul.f32 %v2777_v9, %v4947_v60  ;;  %v2781_v15 = vmul.f32 %v2777_v9, %v4944_v30  ;;  %v2786_v40 = vmul.f32 %v2777_v9, %v4957_v56 }
 0x4b4   :  { %2849 = vst.msk [vmem:[%s5184_s9 + $0x8] sm:$0xff] %vm34_vm0, %v2847_v1  ;;  %2850 = vst.msk [vmem:[%s5184_s9 + $0x28] sm:$0xff] %vm34_vm0, %v2848_v0  ;;  %v2785_v42 = vmul.f32 %v2777_v9, %v4955_v52  ;;  %v2790_v30 = vmul.f32 %v2777_v9, %v4965_v22  ;;  %v2789_v60 = vmul.f32 %v2777_v9, %v4963_v63 }
 0x4b5   :  { %2905 = vst.msk [vmem:[%s5184_s9 + $0x18] sm:$0xff] %vm34_vm0, %v2903_v36  ;;  %2906 = vst.msk [vmem:[%s5184_s9 + $0x38] sm:$0xff] %vm34_vm0, %v2904_v16  ;;  %v2794_v52 = vmul.f32 %v2777_v9, %v4973_v38  ;;  %v2793_v56 = vmul.f32 %v2777_v9, %v4971_v58  ;;  %v2804_v10 = vadd.f32 %v3023_v2, %v2782_v7 }
 0x4b6   :  { %2877 = vst.msk [vmem:[%s5184_s9 + $0x10] sm:$0xff] %vm34_vm0, %v2875_v18  ;;  %2878 = vst.msk [vmem:[%s5184_s9 + $0x30] sm:$0xff] %vm34_vm0, %v2876_v8  ;;  %v2803_v61 = vadd.f32 %v3023_v2, %v2781_v15  ;;  %v2808_v62 = vadd.f32 %v3023_v2, %v2786_v40  ;;  %v2807_v51 = vadd.f32 %v3023_v2, %v2785_v42 }
 0x4b7   :  { %v2812_v46 = vadd.f32 %v3023_v2, %v2790_v30  ;;  %v2811_v31 = vadd.f32 %v3023_v2, %v2789_v60  ;;  %v2816_v28 = vadd.f32 %v3023_v2, %v2794_v52  ;;  %v2815_v12 = vadd.f32 %v3023_v2, %v2793_v56  ;;  %vm5290_vm0 = vmmov %vm5265_vm1 }
 0x4b8   :  { %vm5291_vm10 = vmmov %vm5290_vm0 }
 0x4b9   :  { %vm5292_vm11 = vmmov %vm5290_vm0 }
 0x4ba   :  { %vm5293_vm12 = vmmov %vm5290_vm0 }
 0x4bb   :  { %vm5294_vm13 = vmmov %vm5290_vm0 }
 0x4bc   :  { %vm5295_vm14 = vmmov %vm5290_vm0 }
 0x4bd   :  { %v2824_v19 = vld [vmem:[%s5175_s0 + $0x20] sm:$0xff]  ;;  %v2852_v22 = vld [vmem:[%s5175_s0 + $0x28] sm:$0xff]  ;;  %v2880_v38 = vld [vmem:[%s5175_s0 + $0x30] sm:$0xff] }
 0x4be   :  { %v2823_v63 = vld [vmem:[%s5175_s0] sm:$0xff]  ;;  %2829 = vrot.lane.b32.xlu1 %v2824_v19, %s3433_s15  ;;  %v2851_v58 = vld [vmem:[%s5175_s0 + $0x8] sm:$0xff]  ;;  %v2879_v20 = vld [vmem:[%s5175_s0 + $0x10] sm:$0xff] }
 0x4bf   :  { %2827 = vrot.lane.b32.xlu0 %v2823_v63, %s3433_s15  ;;  %v2908_v4 = vld [vmem:[%s5175_s0 + $0x38] sm:$0xff]  ;;  %vm5296_vm15 = vmmov %vm5290_vm0 }
 0x4c0   :  { %v2907_v29 = vld [vmem:[%s5175_s0 + $0x18] sm:$0xff]  ;;  %vm5297_vm1 = vmmov %vm5290_vm0 }
 0x4c2   :  { %2857 = vrot.lane.b32.xlu1 %v2852_v22, %s3433_s15 }
 0x4c3   :  { %2855 = vrot.lane.b32.xlu0 %v2851_v58, %s3433_s15 }
 0x4c6   :  { %2885 = vrot.lane.b32.xlu1 %v2880_v38, %s3433_s15 }
 0x4c7   :  { %2883 = vrot.lane.b32.xlu0 %v2879_v20, %s3433_s15 }
 0x4ca   :  { %2913 = vrot.lane.b32.xlu1 %v2908_v4, %s3433_s15 }
 0x4cb   :  { %2911 = vrot.lane.b32.xlu0 %v2907_v29, %s3433_s15 }
 0x530   :  { %v2830_v33 = vpop.permute.xlu1 %2829 }
 0x531   :  { %v2828_v21 = vpop.permute.xlu0 %2827  ;;  %v2834_v32 = vadd.f32 %v2830_v33, %v2804_v10 }
 0x532   :  { %v2833_v55 = vadd.f32 %v2828_v21, %v2803_v61 }
 0x533   :  { %2839 = vrot.lane.b32.xlu1 %v2834_v32, %s3433_s15 }
 0x534   :  { %2837 = vrot.lane.b32.xlu0 %v2833_v55, %s3433_s15  ;;  %v2858_v59 = vpop.permute.xlu1 %2857 }
 0x535   :  { %v2856_v6 = vpop.permute.xlu0 %2855  ;;  %v2862_v9 = vadd.f32 %v2858_v59, %v2808_v62 }
 0x536   :  { %v2861_v2 = vadd.f32 %v2856_v6, %v2807_v51 }
 0x537   :  { %2867 = vrot.lane.b32.xlu1 %v2862_v9, %s3433_s15 }
 0x538   :  { %2865 = vrot.lane.b32.xlu0 %v2861_v2, %s3433_s15  ;;  %v2886_v39 = vpop.permute.xlu1 %2885 }
 0x539   :  { %v2884_v54 = vpop.permute.xlu0 %2883  ;;  %v2890_v34 = vadd.f32 %v2886_v39, %v2812_v46 }
 0x53a   :  { %v2889_v47 = vadd.f32 %v2884_v54, %v2811_v31 }
 0x53b   :  { %2895 = vrot.lane.b32.xlu1 %v2890_v34, %s3433_s15 }
 0x53c   :  { %2893 = vrot.lane.b32.xlu0 %v2889_v47, %s3433_s15  ;;  %v2914_v37 = vpop.permute.xlu1 %2913 }
 0x53d   :  { %v2912_v41 = vpop.permute.xlu0 %2911  ;;  %v2918_v43 = vadd.f32 %v2914_v37, %v2816_v28 }
 0x53e   :  { %v2917_v13 = vadd.f32 %v2912_v41, %v2815_v12 }
 0x53f   :  { %2923 = vrot.lane.b32.xlu1 %v2918_v43, %s3433_s15 }
 0x540   :  { %2921 = vrot.lane.b32.xlu0 %v2917_v13, %s3433_s15 }
 0x5a5   :  { %v2840_v25 = vpop.permute.xlu1 %2839 }
 0x5a6   :  { %v2838_v23 = vpop.permute.xlu0 %2837  ;;  %2844 = vst.msk [vmem:[%s5184_s9 + $0x20] sm:$0xff] %vm5290_vm0, %v2840_v25 }
 0x5a7   :  { %2843 = vst.msk [vmem:[%s5184_s9] sm:$0xff] %vm5291_vm10, %v2838_v23 }
 0x5a9   :  { %v2868_v24 = vpop.permute.xlu1 %2867 }
 0x5aa   :  { %v2866_v53 = vpop.permute.xlu0 %2865  ;;  %2872 = vst.msk [vmem:[%s5184_s9 + $0x28] sm:$0xff] %vm5292_vm11, %v2868_v24 }
 0x5ab   :  { %2871 = vst.msk [vmem:[%s5184_s9 + $0x8] sm:$0xff] %vm5293_vm12, %v2866_v53 }
 0x5ad   :  { %v2896_v11 = vpop.permute.xlu1 %2895 }
 0x5ae   :  { %v2894_v48 = vpop.permute.xlu0 %2893  ;;  %2900 = vst.msk [vmem:[%s5184_s9 + $0x30] sm:$0xff] %vm5294_vm13, %v2896_v11 }
 0x5af   :  { %2899 = vst.msk [vmem:[%s5184_s9 + $0x10] sm:$0xff] %vm5295_vm14, %v2894_v48 }
 0x5b1   :  { %v2924_v35 = vpop.permute.xlu1 %2923 }
 0x5b2   :  { %v2922_v45 = vpop.permute.xlu0 %2921  ;;  %2928 = vst.msk [vmem:[%s5184_s9 + $0x38] sm:$0xff] %vm5296_vm15, %v2924_v35 }
 0x5b3   :  { %2927 = vst.msk [vmem:[%s5184_s9 + $0x18] sm:$0xff] %vm5297_vm1, %v2922_v45 }

</bundles_post_ra>
